<compile_context>
chip_gen: v6e
topology: v6e:2x2x1
jax: 0.10.0
libtpu: 0.0.40
codegen_flags: <defaults>
</compile_context>

<pallas_src>
import math
import functools

import jax
import jax.numpy as jnp
from jax.experimental import pallas as pl


def _encoder_block_kernel(
    x_ref,            # (R, E)   f32, R = S*B rows, row r <-> (s = r // B, b = r % B)
    wqkv_ref,         # (E, 3E)  bf16, fused [Wq*scale | Wk | Wv] (right-multiply layout)
    bqkv_ref,         # (1, 3E)  f32,  fused [bq*scale | bk | bv]
    wo_ref,           # (E, E)   bf16
    bo_ref,           # (1, E)   f32
    g1_ref, beta1_ref,  # (1, E) f32   layernorm1 gamma / beta
    w1_ref,           # (E, F)   bf16
    b1_ref,           # (1, F)   f32
    w2_ref,           # (F, E)   bf16
    b2_ref,           # (1, E)   f32
    g2_ref, beta2_ref,  # (1, E) f32   layernorm2 gamma / beta
    o_ref,            # (R, E)   f32
    *, num_heads, head_dim, batch,
):
    x = x_ref[...]                                                   # (R, E) f32
    R, E = x.shape
    H, D, B = num_heads, head_dim, batch

    # ---- fused QKV projection: one bf16 MXU matmul, f32 accumulation ----
    qkv = jnp.dot(x.astype(jnp.bfloat16), wqkv_ref[...],
                  preferred_element_type=jnp.float32) + bqkv_ref[...]
    q = qkv[:, :E].reshape(R, H, D).astype(jnp.bfloat16)     # 1/sqrt(D) already folded in
    k = qkv[:, E:2 * E].reshape(R, H, D).astype(jnp.bfloat16)
    v = qkv[:, 2 * E:].reshape(R, H, D).astype(jnp.bfloat16)

    # ---- all heads in one batched contraction (k.T absorbed into dot_general) ----
    s = jnp.einsum("rhd,thd->hrt", q, k,
                   preferred_element_type=jnp.float32)               # (H, R, R) f32

    # In-kernel cross-batch mask (rows r, t attend iff r % B == t % B).
    row_b = jax.lax.broadcasted_iota(jnp.int32, (R, R), 0) % B
    col_b = jax.lax.broadcasted_iota(jnp.int32, (R, R), 1) % B
    bias = jnp.where(row_b == col_b, 0.0, -1e30).astype(jnp.float32)  # (R, R)
    s = s + bias[None, :, :]

    # Softmax entirely in f32; approx reciprocal goes to the EUP slot (~free).
    s = s - jnp.max(s, axis=-1, keepdims=True)
    p = jnp.exp(s)
    p = p * pl.reciprocal(jnp.sum(p, axis=-1, keepdims=True), approx=True)

    ctx = jnp.einsum("hrt,thd->rhd", p.astype(jnp.bfloat16), v,
                     preferred_element_type=jnp.float32)             # (R, H, D) f32
    attn = jnp.dot(ctx.reshape(R, E).astype(jnp.bfloat16), wo_ref[...],
                   preferred_element_type=jnp.float32) + bo_ref[...]

    def layer_norm(t, g, b):
        # Single-pass mean / variance (one sum + one sum-of-squares per row).
        inv_e = 1.0 / t.shape[-1]
        s1 = jnp.sum(t, axis=-1, keepdims=True)
        s2 = jnp.sum(t * t, axis=-1, keepdims=True)
        mu = s1 * inv_e
        var = s2 * inv_e - mu * mu
        return (t - mu) * jax.lax.rsqrt(var + 1e-5) * g + b

    # ---- add & norm 1 ----
    # TODO(synk): nn.Dropout / attention-weight dropout are identity in eval mode;
    # training-mode dropout is not implemented.
    y = layer_norm(attn + x, g1_ref[...], beta1_ref[...])

    # ---- feed-forward (bf16 MXU operands, f32 accumulate / bias / ReLU) ----
    h1 = jnp.dot(y.astype(jnp.bfloat16), w1_ref[...],
                 preferred_element_type=jnp.float32) + b1_ref[...]
    h1 = jnp.maximum(h1, 0.0)                                        # ReLU
    f = jnp.dot(h1.astype(jnp.bfloat16), w2_ref[...],
                preferred_element_type=jnp.float32) + b2_ref[...]

    # ---- add & norm 2 ----
    z = layer_norm(f + y, g2_ref[...], beta2_ref[...])
    o_ref[...] = z.astype(o_ref.dtype)                               # 128-lane dense store


def recursive_pattern_generator(x_sbe, params, *, num_heads):
    """x_sbe: (S, B, E) float32 — PyTorch nn.MultiheadAttention default layout."""
    S, B, E = x_sbe.shape
    head_dim = E // num_heads
    R = S * B
    scale = 1.0 / math.sqrt(head_dim)

    # Free contiguous reshape (no HBM transpose): row r <-> (s = r // B, b = r % B).
    x_flat = x_sbe.reshape(R, E)

    # Fused QKV weight / bias: attention scale folded into the Q columns, bf16 for the MXU.
    # (In a real deployment these casts happen once at parameter-load time.)
    wqkv = jnp.concatenate(
        [params["wq"] * scale, params["wk"], params["wv"]], axis=1
    ).astype(jnp.bfloat16)                                           # (E, 3E) bf16
    bqkv = jnp.concatenate(
        [params["bq"] * scale, params["bk"], params["bv"]], axis=1
    ).astype(jnp.float32)                                            # (1, 3E) f32
    wo = params["wo"].astype(jnp.bfloat16)
    w1 = params["w1"].astype(jnp.bfloat16)
    w2 = params["w2"].astype(jnp.bfloat16)

    kernel = functools.partial(_encoder_block_kernel,
                               num_heads=num_heads, head_dim=head_dim, batch=B)

    # Single invocation (no grid): the whole problem is R=16 rows, so grid-step
    # pipeline overhead and per-step weight re-buffering would dominate. All operands
    # fit VMEM comfortably; default full-array VMEM mapping is used.
    out = pl.pallas_call(
        kernel,
        out_shape=jax.ShapeDtypeStruct((R, E), jnp.float32),
    )(
        x_flat, wqkv, bqkv,
        wo, params["bo"],
        params["g1"], params["beta1"],
        w1, params["b1"],
        w2, params["b2"],
        params["g2"], params["beta2"],
    )
    return out.reshape(S, B, E)   # free contiguous reshape back to (S, B, E)


def _reference(x_sbe, params, *, num_heads):
    """Pure-JAX f32 reference replicating PyTorch semantics (eval mode)."""
    S, B, E = x_sbe.shape
    D = E // num_heads
    x = jnp.transpose(x_sbe, (1, 0, 2))        # (B, S, E)

    q = x @ params["wq"] + params["bq"]
    k = x @ params["wk"] + params["bk"]
    v = x @ params["wv"] + params["bv"]

    def heads(t):  # (B, S, E) -> (B, H, S, D)
        return jnp.transpose(t.reshape(B, S, num_heads, D), (0, 2, 1, 3))

    qh, kh, vh = heads(q), heads(k), heads(v)
    s = jnp.einsum("bhsd,bhtd->bhst", qh, kh) / math.sqrt(D)
    p = jax.nn.softmax(s, axis=-1)
    o = jnp.einsum("bhst,bhtd->bhsd", p, vh)
    o = jnp.transpose(o, (0, 2, 1, 3)).reshape(B, S, E)
    attn = o @ params["wo"] + params["bo"]

    def ln(t, g, b):
        mu = jnp.mean(t, axis=-1, keepdims=True)
        var = jnp.mean((t - mu) ** 2, axis=-1, keepdims=True)
        return (t - mu) * jax.lax.rsqrt(var + 1e-5) * g + b

    y = ln(attn + x, params["g1"], params["beta1"])
    h1 = jnp.maximum(y @ params["w1"] + params["b1"], 0.0)
    f = h1 @ params["w2"] + params["b2"]
    z = ln(f + y, params["g2"], params["beta2"])
    return jnp.transpose(z, (1, 0, 2))


def _init_params(key, E, F):
    ks = jax.random.split(key, 10)
    n = lambda k, shape, s=0.05: (s * jax.random.normal(k, shape)).astype(jnp.float32)
    return {
        "wq": n(ks[0], (E, E)), "wk": n(ks[1], (E, E)), "wv": n(ks[2], (E, E)),
        "bq": n(ks[3], (1, E)), "bk": n(ks[4], (1, E)), "bv": n(ks[5], (1, E)),
        "wo": n(ks[6], (E, E)), "bo": n(ks[7], (1, E)),
        "g1": jnp.ones((1, E), jnp.float32), "beta1": jnp.zeros((1, E), jnp.float32),
        "w1": n(ks[8], (E, F)), "b1": jnp.zeros((1, F), jnp.float32),
        "w2": n(ks[9], (F, E)), "b2": jnp.zeros((1, E), jnp.float32),
        "g2": jnp.ones((1, E), jnp.float32), "beta2": jnp.zeros((1, E), jnp.float32),
    }


if __name__ == "__main__":
    S, B, E = 8, 2, 128       # seq, batch, embed (E=128 -> one vreg per row, head_dim=8)
    NUM_HEADS = 16
    FFN_DIM = 256

    key = jax.random.PRNGKey(0)
    kx, kp = jax.random.split(key)
    x = jax.random.normal(kx, (S, B, E), dtype=jnp.float32)
    params = _init_params(kp, E, FFN_DIM)

    fn = jax.jit(functools.partial(recursive_pattern_generator, num_heads=NUM_HEADS))
    out = jax.block_until_ready(fn(x, params))

    ref = _reference(x, params, num_heads=NUM_HEADS)
    assert out.shape == (S, B, E)
    err = float(jnp.max(jnp.abs(out - ref)))
    # Tolerance accounts for bf16 MXU operands (4 matmuls + 2 einsums) and the
    # approximate softmax reciprocal vs. the pure-f32 reference.
    assert err < 5e-2, f"mismatch vs reference: max abs err = {err}"

    print("KERNEL_OK")
</pallas_src>

<mosaic_0001>
module attributes {stable_mosaic.version = 11 : i64} {
  func.func @_encoder_block_kernel(%arg0: memref<16x128xf32, #tpu.memory_space<vmem>>, %arg1: memref<128x384xbf16, #tpu.memory_space<vmem>>, %arg2: memref<1x384xf32, #tpu.memory_space<vmem>>, %arg3: memref<128x128xbf16, #tpu.memory_space<vmem>>, %arg4: memref<1x128xf32, #tpu.memory_space<vmem>>, %arg5: memref<1x128xf32, #tpu.memory_space<vmem>>, %arg6: memref<1x128xf32, #tpu.memory_space<vmem>>, %arg7: memref<128x256xbf16, #tpu.memory_space<vmem>>, %arg8: memref<1x256xf32, #tpu.memory_space<vmem>>, %arg9: memref<256x128xbf16, #tpu.memory_space<vmem>>, %arg10: memref<1x128xf32, #tpu.memory_space<vmem>>, %arg11: memref<1x128xf32, #tpu.memory_space<vmem>>, %arg12: memref<1x128xf32, #tpu.memory_space<vmem>>, %arg13: memref<16x128xf32, #tpu.memory_space<vmem>>) attributes {dimension_semantics = [], scalar_prefetch = 0 : i64, scratch_operands = 0 : i64, tpu.core_type = #tpu.core_type<tc>} {
    %c0 = arith.constant 0 : index
    %c0_0 = arith.constant 0 : index
    %0 = vector.load %arg0[%c0, %c0_0] : memref<16x128xf32, #tpu.memory_space<vmem>>, vector<16x128xf32>
    %1 = arith.truncf %0 : vector<16x128xf32> to vector<16x128xbf16>
    %c0_1 = arith.constant 0 : index
    %c0_2 = arith.constant 0 : index
    %2 = vector.load %arg1[%c0_1, %c0_2] : memref<128x384xbf16, #tpu.memory_space<vmem>>, vector<128x384xbf16>
    %cst = arith.constant dense<0.000000e+00> : vector<16x384xf32>
    %3 = tpu.matmul %1, %2, %cst {dimension_numbers = #tpu.dot_dimension_numbers<[1], [0], [0], [1], [0, 0, 1, 1], [], []>} : vector<16x128xbf16>, vector<128x384xbf16>, vector<16x384xf32> -> vector<16x384xf32>
    %c0_3 = arith.constant 0 : index
    %c0_4 = arith.constant 0 : index
    %4 = vector.load %arg2[%c0_3, %c0_4] : memref<1x384xf32, #tpu.memory_space<vmem>>, vector<1x384xf32>
    %5 = vector.broadcast %4 : vector<1x384xf32> to vector<16x384xf32>
    %6 = arith.addf %3, %5 : vector<16x384xf32>
    %7 = vector.extract_strided_slice %6 {offsets = [0, 0], sizes = [16, 128], strides = [1, 1]} : vector<16x384xf32> to vector<16x128xf32>
    %8 = vector.shape_cast %7 : vector<16x128xf32> to vector<16x16x8xf32>
    %9 = arith.truncf %8 : vector<16x16x8xf32> to vector<16x16x8xbf16>
    %10 = vector.extract_strided_slice %6 {offsets = [0, 128], sizes = [16, 128], strides = [1, 1]} : vector<16x384xf32> to vector<16x128xf32>
    %11 = vector.shape_cast %10 : vector<16x128xf32> to vector<16x16x8xf32>
    %12 = arith.truncf %11 : vector<16x16x8xf32> to vector<16x16x8xbf16>
    %13 = vector.extract_strided_slice %6 {offsets = [0, 256], sizes = [16, 128], strides = [1, 1]} : vector<16x384xf32> to vector<16x128xf32>
    %14 = vector.shape_cast %13 : vector<16x128xf32> to vector<16x16x8xf32>
    %15 = arith.truncf %14 : vector<16x16x8xf32> to vector<16x16x8xbf16>
    "tpu.trace_start"() <{level = 10 : i32, message = "rhd,thd->hrt"}> : () -> ()
    %cst_5 = arith.constant dense<0.000000e+00> : vector<16x16x16xf32>
    %16 = tpu.matmul %9, %12, %cst_5 {dimension_numbers = #tpu.dot_dimension_numbers<[2], [2], [0], [0], [0, 1, 0, 0, 1, 0], [1], [1]>} : vector<16x16x8xbf16>, vector<16x16x8xbf16>, vector<16x16x16xf32> -> vector<16x16x16xf32>
    "tpu.trace_stop"() : () -> ()
    %17 = tpu.iota {dimensions = array<i32: 0>} : vector<16x16xi32>
    %c2_i32 = arith.constant 2 : i32
    %c0_i32 = arith.constant 0 : i32
    %18 = arith.cmpi eq, %c2_i32, %c0_i32 : i32
    %c1_i32 = arith.constant 1 : i32
    %19 = arith.select %18, %c1_i32, %c2_i32 : i32
    %20 = vector.broadcast %19 : i32 to vector<16x16xi32>
    %21 = arith.remsi %17, %20 : vector<16x16xi32>
    %c0_i32_6 = arith.constant 0 : i32
    %22 = vector.broadcast %c0_i32_6 : i32 to vector<16x16xi32>
    %23 = arith.cmpi ne, %21, %22 : vector<16x16xi32>
    %c0_i32_7 = arith.constant 0 : i32
    %24 = vector.broadcast %c0_i32_7 : i32 to vector<16x16xi32>
    %25 = arith.cmpi slt, %21, %24 : vector<16x16xi32>
    %c0_i32_8 = arith.constant 0 : i32
    %26 = arith.cmpi slt, %19, %c0_i32_8 : i32
    %27 = vector.broadcast %26 : i1 to vector<16x16xi1>
    %28 = vector.broadcast %27 : vector<16x16xi1> to vector<16x16xi1>
    %29 = arith.xori %25, %28 : vector<16x16xi1>
    %30 = arith.andi %29, %23 : vector<16x16xi1>
    %31 = vector.broadcast %19 : i32 to vector<16x16xi32>
    %32 = arith.addi %21, %31 : vector<16x16xi32>
    %33 = arith.select %30, %32, %21 : vector<16x16xi1>, vector<16x16xi32>
    %34 = tpu.iota {dimensions = array<i32: 1>} : vector<16x16xi32>
    %c2_i32_9 = arith.constant 2 : i32
    %c0_i32_10 = arith.constant 0 : i32
    %35 = arith.cmpi eq, %c2_i32_9, %c0_i32_10 : i32
    %c1_i32_11 = arith.constant 1 : i32
    %36 = arith.select %35, %c1_i32_11, %c2_i32_9 : i32
    %37 = vector.broadcast %36 : i32 to vector<16x16xi32>
    %38 = arith.remsi %34, %37 : vector<16x16xi32>
    %c0_i32_12 = arith.constant 0 : i32
    %39 = vector.broadcast %c0_i32_12 : i32 to vector<16x16xi32>
    %40 = arith.cmpi ne, %38, %39 : vector<16x16xi32>
    %c0_i32_13 = arith.constant 0 : i32
    %41 = vector.broadcast %c0_i32_13 : i32 to vector<16x16xi32>
    %42 = arith.cmpi slt, %38, %41 : vector<16x16xi32>
    %c0_i32_14 = arith.constant 0 : i32
    %43 = arith.cmpi slt, %36, %c0_i32_14 : i32
    %44 = vector.broadcast %43 : i1 to vector<16x16xi1>
    %45 = vector.broadcast %44 : vector<16x16xi1> to vector<16x16xi1>
    %46 = arith.xori %42, %45 : vector<16x16xi1>
    %47 = arith.andi %46, %40 : vector<16x16xi1>
    %48 = vector.broadcast %36 : i32 to vector<16x16xi32>
    %49 = arith.addi %38, %48 : vector<16x16xi32>
    %50 = arith.select %47, %49, %38 : vector<16x16xi1>, vector<16x16xi32>
    %51 = arith.cmpi eq, %33, %50 : vector<16x16xi32>
    %cst_15 = arith.constant 0.000000e+00 : f32
    %cst_16 = arith.constant -1.000000e+30 : f32
    %52 = vector.broadcast %cst_15 : f32 to vector<16x16xf32>
    %53 = vector.broadcast %cst_16 : f32 to vector<16x16xf32>
    %54 = arith.select %51, %52, %53 : vector<16x16xi1>, vector<16x16xf32>
    %55 = vector.shape_cast %54 : vector<16x16xf32> to vector<1x16x16xf32>
    %56 = vector.broadcast %55 : vector<1x16x16xf32> to vector<16x16x16xf32>
    %57 = arith.addf %16, %56 : vector<16x16x16xf32>
    %cst_17 = arith.constant dense<0xFF800000> : vector<16x16xf32>
    %58 = vector.multi_reduction <maximumf>, %57, %cst_17 [2] : vector<16x16x16xf32> to vector<16x16xf32>
    %59 = vector.shape_cast %58 : vector<16x16xf32> to vector<16x16x1xf32>
    %60 = vector.broadcast %59 : vector<16x16x1xf32> to vector<16x16x16xf32>
    %61 = arith.subf %57, %60 : vector<16x16x16xf32>
    %62 = math.exp %61 : vector<16x16x16xf32>
    %cst_18 = arith.constant dense<0.000000e+00> : vector<16x16xf32>
    %63 = vector.multi_reduction <add>, %62, %cst_18 [2] : vector<16x16x16xf32> to vector<16x16xf32>
    %64 = vector.shape_cast %63 : vector<16x16xf32> to vector<16x16x1xf32>
    %65 = tpu.reciprocal %64 {approx = true} : vector<16x16x1xf32> -> vector<16x16x1xf32>
    %66 = vector.broadcast %65 : vector<16x16x1xf32> to vector<16x16x16xf32>
    %67 = arith.mulf %62, %66 : vector<16x16x16xf32>
    %68 = arith.truncf %67 : vector<16x16x16xf32> to vector<16x16x16xbf16>
    "tpu.trace_start"() <{level = 10 : i32, message = "hrt,thd->rhd"}> : () -> ()
    %cst_19 = arith.constant dense<0.000000e+00> : vector<16x8x16xf32>
    %69 = tpu.matmul %15, %68, %cst_19 {dimension_numbers = #tpu.dot_dimension_numbers<[0], [2], [2], [1], [0, 1, 0, 2, 1, 1], [1], [0]>} : vector<16x16x8xbf16>, vector<16x16x16xbf16>, vector<16x8x16xf32> -> vector<16x8x16xf32>
    %70 = tpu.transpose %69, [2, 0, 1] : vector<16x8x16xf32> -> vector<16x16x8xf32>
    "tpu.trace_stop"() : () -> ()
    %71 = vector.shape_cast %70 : vector<16x16x8xf32> to vector<16x128xf32>
    %72 = arith.truncf %71 : vector<16x128xf32> to vector<16x128xbf16>
    %c0_20 = arith.constant 0 : index
    %c0_21 = arith.constant 0 : index
    %73 = vector.load %arg3[%c0_20, %c0_21] : memref<128x128xbf16, #tpu.memory_space<vmem>>, vector<128x128xbf16>
    %cst_22 = arith.constant dense<0.000000e+00> : vector<16x128xf32>
    %74 = tpu.matmul %72, %73, %cst_22 {dimension_numbers = #tpu.dot_dimension_numbers<[1], [0], [0], [1], [0, 0, 1, 1], [], []>} : vector<16x128xbf16>, vector<128x128xbf16>, vector<16x128xf32> -> vector<16x128xf32>
    %c0_23 = arith.constant 0 : index
    %c0_24 = arith.constant 0 : index
    %75 = vector.load %arg4[%c0_23, %c0_24] : memref<1x128xf32, #tpu.memory_space<vmem>>, vector<1x128xf32>
    %76 = vector.broadcast %75 : vector<1x128xf32> to vector<16x128xf32>
    %77 = arith.addf %74, %76 : vector<16x128xf32>
    %78 = arith.addf %77, %0 : vector<16x128xf32>
    %c0_25 = arith.constant 0 : index
    %c0_26 = arith.constant 0 : index
    %79 = vector.load %arg5[%c0_25, %c0_26] : memref<1x128xf32, #tpu.memory_space<vmem>>, vector<1x128xf32>
    %c0_27 = arith.constant 0 : index
    %c0_28 = arith.constant 0 : index
    %80 = vector.load %arg6[%c0_27, %c0_28] : memref<1x128xf32, #tpu.memory_space<vmem>>, vector<1x128xf32>
    %cst_29 = arith.constant dense<0.000000e+00> : vector<16xf32>
    %81 = vector.multi_reduction <add>, %78, %cst_29 [1] : vector<16x128xf32> to vector<16xf32>
    %82 = vector.shape_cast %81 : vector<16xf32> to vector<16x1xf32>
    %83 = arith.mulf %78, %78 : vector<16x128xf32>
    %cst_30 = arith.constant dense<0.000000e+00> : vector<16xf32>
    %84 = vector.multi_reduction <add>, %83, %cst_30 [1] : vector<16x128xf32> to vector<16xf32>
    %85 = vector.shape_cast %84 : vector<16xf32> to vector<16x1xf32>
    %cst_31 = arith.constant 7.812500e-03 : f32
    %86 = vector.broadcast %cst_31 : f32 to vector<16x1xf32>
    %87 = arith.mulf %82, %86 : vector<16x1xf32>
    %cst_32 = arith.constant 7.812500e-03 : f32
    %88 = vector.broadcast %cst_32 : f32 to vector<16x1xf32>
    %89 = arith.mulf %85, %88 : vector<16x1xf32>
    %90 = arith.mulf %87, %87 : vector<16x1xf32>
    %91 = arith.subf %89, %90 : vector<16x1xf32>
    %92 = vector.broadcast %87 : vector<16x1xf32> to vector<16x128xf32>
    %93 = arith.subf %78, %92 : vector<16x128xf32>
    %cst_33 = arith.constant 9.99999974E-6 : f32
    %94 = vector.broadcast %cst_33 : f32 to vector<16x1xf32>
    %95 = arith.addf %91, %94 : vector<16x1xf32>
    %96 = math.rsqrt %95 : vector<16x1xf32>
    %97 = vector.broadcast %96 : vector<16x1xf32> to vector<16x128xf32>
    %98 = arith.mulf %93, %97 : vector<16x128xf32>
    %99 = vector.broadcast %79 : vector<1x128xf32> to vector<16x128xf32>
    %100 = arith.mulf %98, %99 : vector<16x128xf32>
    %101 = vector.broadcast %80 : vector<1x128xf32> to vector<16x128xf32>
    %102 = arith.addf %100, %101 : vector<16x128xf32>
    %103 = arith.truncf %102 : vector<16x128xf32> to vector<16x128xbf16>
    %c0_34 = arith.constant 0 : index
    %c0_35 = arith.constant 0 : index
    %104 = vector.load %arg7[%c0_34, %c0_35] : memref<128x256xbf16, #tpu.memory_space<vmem>>, vector<128x256xbf16>
    %cst_36 = arith.constant dense<0.000000e+00> : vector<16x256xf32>
    %105 = tpu.matmul %103, %104, %cst_36 {dimension_numbers = #tpu.dot_dimension_numbers<[1], [0], [0], [1], [0, 0, 1, 1], [], []>} : vector<16x128xbf16>, vector<128x256xbf16>, vector<16x256xf32> -> vector<16x256xf32>
    %c0_37 = arith.constant 0 : index
    %c0_38 = arith.constant 0 : index
    %106 = vector.load %arg8[%c0_37, %c0_38] : memref<1x256xf32, #tpu.memory_space<vmem>>, vector<1x256xf32>
    %107 = vector.broadcast %106 : vector<1x256xf32> to vector<16x256xf32>
    %108 = arith.addf %105, %107 : vector<16x256xf32>
    %cst_39 = arith.constant 0.000000e+00 : f32
    %109 = vector.broadcast %cst_39 : f32 to vector<16x256xf32>
    %110 = arith.maximumf %108, %109 : vector<16x256xf32>
    %111 = arith.truncf %110 : vector<16x256xf32> to vector<16x256xbf16>
    %c0_40 = arith.constant 0 : index
    %c0_41 = arith.constant 0 : index
    %112 = vector.load %arg9[%c0_40, %c0_41] : memref<256x128xbf16, #tpu.memory_space<vmem>>, vector<256x128xbf16>
    %cst_42 = arith.constant dense<0.000000e+00> : vector<16x128xf32>
    %113 = tpu.matmul %111, %112, %cst_42 {dimension_numbers = #tpu.dot_dimension_numbers<[1], [0], [0], [1], [0, 0, 1, 1], [], []>} : vector<16x256xbf16>, vector<256x128xbf16>, vector<16x128xf32> -> vector<16x128xf32>
    %c0_43 = arith.constant 0 : index
    %c0_44 = arith.constant 0 : index
    %114 = vector.load %arg10[%c0_43, %c0_44] : memref<1x128xf32, #tpu.memory_space<vmem>>, vector<1x128xf32>
    %115 = vector.broadcast %114 : vector<1x128xf32> to vector<16x128xf32>
    %116 = arith.addf %113, %115 : vector<16x128xf32>
    %117 = arith.addf %116, %102 : vector<16x128xf32>
    %c0_45 = arith.constant 0 : index
    %c0_46 = arith.constant 0 : index
    %118 = vector.load %arg11[%c0_45, %c0_46] : memref<1x128xf32, #tpu.memory_space<vmem>>, vector<1x128xf32>
    %c0_47 = arith.constant 0 : index
    %c0_48 = arith.constant 0 : index
    %119 = vector.load %arg12[%c0_47, %c0_48] : memref<1x128xf32, #tpu.memory_space<vmem>>, vector<1x128xf32>
    %cst_49 = arith.constant dense<0.000000e+00> : vector<16xf32>
    %120 = vector.multi_reduction <add>, %117, %cst_49 [1] : vector<16x128xf32> to vector<16xf32>
    %121 = vector.shape_cast %120 : vector<16xf32> to vector<16x1xf32>
    %122 = arith.mulf %117, %117 : vector<16x128xf32>
    %cst_50 = arith.constant dense<0.000000e+00> : vector<16xf32>
    %123 = vector.multi_reduction <add>, %122, %cst_50 [1] : vector<16x128xf32> to vector<16xf32>
    %124 = vector.shape_cast %123 : vector<16xf32> to vector<16x1xf32>
    %cst_51 = arith.constant 7.812500e-03 : f32
    %125 = vector.broadcast %cst_51 : f32 to vector<16x1xf32>
    %126 = arith.mulf %121, %125 : vector<16x1xf32>
    %cst_52 = arith.constant 7.812500e-03 : f32
    %127 = vector.broadcast %cst_52 : f32 to vector<16x1xf32>
    %128 = arith.mulf %124, %127 : vector<16x1xf32>
    %129 = arith.mulf %126, %126 : vector<16x1xf32>
    %130 = arith.subf %128, %129 : vector<16x1xf32>
    %131 = vector.broadcast %126 : vector<16x1xf32> to vector<16x128xf32>
    %132 = arith.subf %117, %131 : vector<16x128xf32>
    %cst_53 = arith.constant 9.99999974E-6 : f32
    %133 = vector.broadcast %cst_53 : f32 to vector<16x1xf32>
    %134 = arith.addf %130, %133 : vector<16x1xf32>
    %135 = math.rsqrt %134 : vector<16x1xf32>
    %136 = vector.broadcast %135 : vector<16x1xf32> to vector<16x128xf32>
    %137 = arith.mulf %132, %136 : vector<16x128xf32>
    %138 = vector.broadcast %118 : vector<1x128xf32> to vector<16x128xf32>
    %139 = arith.mulf %137, %138 : vector<16x128xf32>
    %140 = vector.broadcast %119 : vector<1x128xf32> to vector<16x128xf32>
    %141 = arith.addf %139, %140 : vector<16x128xf32>
    %c0_54 = arith.constant 0 : index
    %c0_55 = arith.constant 0 : index
    %142 = vector.load %arg13[%c0_54, %c0_55] : memref<16x128xf32, #tpu.memory_space<vmem>>, vector<16x128xf32>
    tpu.vector_store %arg13[%c0_54, %c0_55], %141 {strides = array<i32>} : memref<16x128xf32, #tpu.memory_space<vmem>>, vector<16x128xf32>,
    return
  }
}

</mosaic_0001>

<bundles_post_ra>
// kernel: recursive_pattern_generator.1
= control target key start
LH: loop header
LB: loop body
LE: loop exit
PB: predicated region body
PF: predicated region fallthrough
CT: control target
= control target key end

     0   :  { %v11482_v2 = vmov 0   ;;  %s11463_s0 = inlined_call_operand.vmem [shape: f32[16,128], index: 0, kind: input, shape index: {}]   ;;  %s11464_s1 = inlined_call_operand.vmem [shape: bf16[128,384], index: 1, kind: input, shape index: {}]   ;;  %s11465_s2 = inlined_call_operand.vmem [shape: f32[1,384], index: 2, kind: input, shape index: {}]   ;;  %s11466_s3 = inlined_call_operand.vmem [shape: bf16[128,128], index: 3, kind: input, shape index: {}]   ;;  %s11467_s4 = inlined_call_operand.vmem [shape: f32[1,128], index: 4, kind: input, shape index: {}]   ;;  %s11468_s5 = inlined_call_operand.vmem [shape: f32[1,128], index: 5, kind: input, shape index: {}]   ;;  %s11469_s6 = inlined_call_operand.vmem [shape: f32[1,128], index: 6, kind: input, shape index: {}]   ;;  %s11470_s7 = inlined_call_operand.vmem [shape: bf16[128,256], index: 7, kind: input, shape index: {}]   ;;  %s11471_s8 = inlined_call_operand.vmem [shape: f32[1,256], index: 8, kind: input, shape index: {}]   ;;  %s11472_s9 = inlined_call_operand.vmem [shape: bf16[256,128], index: 9, kind: input, shape index: {}]   ;;  %s11473_s10 = inlined_call_operand.vmem [shape: f32[1,128], index: 10, kind: input, shape index: {}]   ;;  %s11474_s11 = inlined_call_operand.vmem [shape: f32[1,128], index: 11, kind: input, shape index: {}]   ;;  %s11475_s12 = inlined_call_operand.vmem [shape: f32[1,128], index: 12, kind: input, shape index: {}]   ;;  %s11476_s13 = inlined_call_operand.hbm [shape: f32[16,128], index: 13, kind: output, shape index: {}]  }
   0x1   :  { %v8834_v0 = vld [vmem:[%s11464_s1 + $0xac] ss:$12 sps:$4 sm:$0xff]   ;;  %v8836_v1 = vld [vmem:[%s11464_s1 + $0xa8] ss:$12 sps:$4 sm:$0xff]   ;;  %258 = vmatprep.mubr.bf16.mxu0 %v11482_v2  ;;  %v8839_v4 = vld [vmem:[%s11464_s1 + $0x90] ss:$12 sps:$4 sm:$0xff]  }
   0x2   :  { %226 = vmatprep.subr.bf16.mxu0 %v8834_v0  ;;  %v8837_v3 = vld [vmem:[%s11464_s1 + $0x94] ss:$12 sps:$4 sm:$0xff]   ;;  %v8840_v5 = vld [vmem:[%s11464_s1 + $0x7c] ss:$12 sps:$4 sm:$0xff]   ;;  %v8842_v6 = vld [vmem:[%s11464_s1 + $0x78] ss:$12 sps:$4 sm:$0xff]  }
   0x3   :  { %227 = vmatpush1.bf16.msra.mxu0 %v8836_v1  ;;  %v8843_v7 = vld [vmem:[%s11464_s1 + $0x64] ss:$12 sps:$4 sm:$0xff]   ;;  %v8845_v8 = vld [vmem:[%s11464_s1 + $0x60] ss:$12 sps:$4 sm:$0xff]   ;;  %v8848_v10 = vld [vmem:[%s11464_s1 + $0x48] ss:$12 sps:$4 sm:$0xff]  }
   0x4   :  { %228 = vmatprep.subr.bf16.mxu0 %v8837_v3  ;;  %v8846_v9 = vld [vmem:[%s11464_s1 + $0x4c] ss:$12 sps:$4 sm:$0xff]   ;;  %v8849_v11 = vld [vmem:[%s11464_s1 + $0x34] ss:$12 sps:$4 sm:$0xff]   ;;  %v8851_v12 = vld [vmem:[%s11464_s1 + $0x30] ss:$12 sps:$4 sm:$0xff]  }
   0x5   :  { %v8852_v13 = vld [vmem:[%s11464_s1 + $0x1c] ss:$12 sps:$4 sm:$0xff]   ;;  %v8854_v14 = vld [vmem:[%s11464_s1 + $0x18] ss:$12 sps:$4 sm:$0xff]   ;;  %v8857_v16 = vld [vmem:[%s11464_s1] ss:$12 sps:$4 sm:$0xff]  }
   0x6   :  { %v8855_v15 = vld [vmem:[%s11464_s1 + $0x4] ss:$12 sps:$4 sm:$0xff]   ;;  %v47_v18 = vld [vmem:[%s11463_s0 + $0x8] sm:$0xff] }
   0x7   :  { %229 = vmatpush1.bf16.msra.mxu0 %v8839_v4  ;;  %v46_v17 = vld [vmem:[%s11463_s0] sm:$0xff] }
   0x8   :  { %230 = vmatprep.subr.bf16.mxu0 %v8840_v5  ;;  %v9222_v19 = vpack.c.bf16 %v47_v18, %v46_v17 }
   0xb   :  { %231 = vmatpush1.bf16.msra.mxu0 %v8842_v6 }
   0xc   :  { %232 = vmatprep.subr.bf16.mxu0 %v8843_v7 }
   0xf   :  { %233 = vmatpush1.bf16.msra.mxu0 %v8845_v8 }
  0x10   :  { %234 = vmatprep.subr.bf16.mxu0 %v8846_v9 }
  0x13   :  { %235 = vmatpush1.bf16.msra.mxu0 %v8848_v10 }
  0x14   :  { %236 = vmatprep.subr.bf16.mxu0 %v8849_v11 }
  0x17   :  { %237 = vmatpush1.bf16.msra.mxu0 %v8851_v12 }
  0x18   :  { %238 = vmatprep.subr.bf16.mxu0 %v8852_v13 }
  0x1b   :  { %239 = vmatpush1.bf16.msra.mxu0 %v8854_v14 }
  0x1c   :  { %240 = vmatprep.subr.bf16.mxu0 %v8855_v15 }
  0x1f   :  { %241 = vmatpush1.bf16.msra.mxu0 %v8857_v16 }
  0x22   :  { %259 = vmatmul.mubr.bf16.vlgmr.msra.gmra.mxu0 %v9222_v19 }
  0x23   :  { %18 = vsyncpa [#allocation3], 0  ;;  %v11479_v20 = vlaneseq  ;;  %v9232_v23 = vld [vmem:[%s11465_s2] sm:$0x7]  ;;  %s9075_s29 = smov 104   ;;  %s9076_s30 = smov 120  }
  0x24   :  { %s9077_s2 = smov 96   ;;  %s9078_s14 = smov 112   ;;  %v8858_v33 = vld [vmem:[%s11464_s1 + $0xb0] ss:$12 sps:$4 sm:$0xff]   ;;  %v11480_v34 = vmov 0.0   ;;  %vm9084_vm0 = vmmov 0  }
  0x25   :  { %v9226_v21 = vshrl.u32 %v11479_v20, 7  ;;  %s9079_s15 = smov 88   ;;  %s9080_s16 = smov 80   ;;  %8504 = vmatprep.subr.bf16.mxu1 %v11480_v34  ;;  %8548 = vmatprep.subr.bf16.mxu0 %v11480_v34  ;;  %v8859_v35 = vld [vmem:[%s11464_s1 + $0x98] ss:$12 sps:$4 sm:$0xff]   ;;  %vm3355_vm1 = vcmask 1043456  }
  0x26   :  { %s9081_s19 = smov 72   ;;  %8505 = vmatpush3.bf16.msra.mxu1 %v8858_v33  ;;  %v8860_v36 = vld [vmem:[%s11464_s1 + $0x80] ss:$12 sps:$4 sm:$0xff]   ;;  %v8861_v37 = vld [vmem:[%s11464_s1 + $0x68] ss:$12 sps:$4 sm:$0xff]   ;;  %s9083_s23 = smov 64   ;;  %8520 = vmatprep.mubr.msk.bf16.mxu1 %vm9084_vm0, %v11480_v34 }
  0x27   :  { %11491 = vst [vmem:[#allocation5_spill] sm:$0xff] %v9226_v21  ;;  %v11477_v22 = vsub.s32 0, %v9226_v21  ;;  %v11478_v27 = vsub.s32 1, %v9226_v21  ;;  %8506 = vmatprep.subr.bf16.mxu1 %v11480_v34  ;;  %v8862_v38 = vld [vmem:[%s11464_s1 + $0x50] ss:$12 sps:$4 sm:$0xff]   ;;  %8550 = vmatprep.mubr.msk.bf16.mxu0 %vm9084_vm0, %v11480_v34  ;;  %s9085_s24 = smov 56  }
  0x28   :  { %v8863_v41 = vld [vmem:[%s11464_s1 + $0x38] ss:$12 sps:$4 sm:$0xff]   ;;  %v8864_v42 = vld [vmem:[%s11464_s1 + $0x20] ss:$12 sps:$4 sm:$0xff]   ;;  %v8865_v43 = vld [vmem:[%s11464_s1 + $0x8] ss:$12 sps:$4 sm:$0xff]  }
  0x29   :  { %v86_v24 = vrot.slane %v9232_v23, %v11477_v22  ;;  %v90_v28 = vrot.slane %v9232_v23, %v11478_v27  ;;  %s9086_s1 = smov 48   ;;  %s9087_s25 = smov 40   ;;  %v9092_v11 = vmov 1983009808   ;;  %v9093_v16 = vmov 1934713408  }
  0x2a   :  { %8507 = vmatpush3.bf16.msra.mxu1 %v8859_v35  ;;  %s9088_s26 = smov 32   ;;  %s9089_s27 = smov 24   ;;  %v405_v12 = vunpack.c.l.s4 %v9092_v11  ;;  %v469_v17 = vunpack.c.l.s4 %v9093_v16  ;;  %vm3351_vm2 = vcmask 64512   ;;  %vm4105_vm5 = vcmask 130048  }
  0x2b   :  { %8508 = vmatprep.subr.bf16.mxu1 %v11480_v34  ;;  %s9090_s28 = smov 16   ;;  %s9091_s17 = smov 8   ;;  %vm7654_vm6 = vcmask 195584   ;;  %vm7657_vm7 = vcmask 261120   ;;  %vm7660_vm8 = vcmask 326656   ;;  %vm7663_vm9 = vcmask 392192  }
  0x2c   :  { %v406_v15 = vunpack.c.0.s8 %v405_v12  ;;  %v470_v33 = vunpack.c.0.s8 %v469_v17  ;;  %vm7666_vm10 = vcmask 457728   ;;  %vm7669_vm11 = vcmask 523264  }
  0x2d   :  { %vm7672_vm12 = vcmask 588800   ;;  %vm7675_vm13 = vcmask 654336   ;;  %vm7678_vm14 = vcmask 719872   ;;  %vm7681_vm15 = vcmask 785408  }
  0x2e   :  { %8509 = vmatpush3.bf16.msra.mxu1 %v8860_v36 }
  0x2f   :  { %8510 = vmatprep.subr.bf16.mxu1 %v11480_v34 }
  0x32   :  { %8511 = vmatpush3.bf16.msra.mxu1 %v8861_v37 }
  0x33   :  { %8512 = vmatprep.subr.bf16.mxu1 %v11480_v34 }
  0x36   :  { %8513 = vmatpush3.bf16.msra.mxu1 %v8862_v38 }
  0x37   :  { %8514 = vmatprep.subr.bf16.mxu1 %v11480_v34 }
  0x3a   :  { %8515 = vmatpush3.bf16.msra.mxu1 %v8863_v41 }
  0x3b   :  { %8516 = vmatprep.subr.bf16.mxu1 %v11480_v34 }
  0x3e   :  { %8517 = vmatpush3.bf16.msra.mxu1 %v8864_v42 }
  0x3f   :  { %8518 = vmatprep.subr.bf16.mxu1 %v11480_v34 }
  0x42   :  { %8519 = vmatpush3.bf16.msra.mxu1 %v8865_v43 }
  0x43   :  { %8524 = vmatprep.subr.bf16.mxu1 %v11480_v34 }
  0x45   :  { %8521 = vmatmul.mubr.bf16.vlgmr.msra.gmra.mxu1 %v9222_v19 }
  0x46   :  { %8526 = vmatprep.mubr.msk.bf16.mxu1 %vm9084_vm0, %v11480_v34 }
  0xe2   :  { %v260_v25 = vpop.f32.mrf.mxu0 }
  0xe3   :  { %v9237_v26 = vadd.f32 %v260_v25, %v86_v24 }
  0xe4   :  { %v262_v29 = vpop.f32.mrf.mxu0 }
  0xe5   :  { %324 = vrot.lane.b32.xlu0 %v9237_v26, %s9075_s29  ;;  %312 = vrot.lane.b32.xlu1 %v9237_v26, %s9076_s30  ;;  %v9251_v30 = vadd.f32 %v262_v29, %v90_v28 }
  0xe6   :  { %v264_v31 = vpop.f32.mrf.mxu0 }
  0xe7   :  { %v9257_v32 = vadd.f32 %v264_v31, %v86_v24 }
  0xe8   :  { %v266_v39 = vpop.f32.mrf.mxu0 }
  0xe9   :  { %330 = vrot.lane.b32.xlu0 %v9237_v26, %s9077_s2  ;;  %318 = vrot.lane.b32.xlu1 %v9237_v26, %s9078_s14  ;;  %v9304_v40 = vadd.f32 %v266_v39, %v90_v28  ;;  %v9438_v28 = vsub.s32 %v406_v15, %v9226_v21 }
  0xed   :  { %336 = vrot.lane.b32.xlu0 %v9237_v26, %s9079_s15  ;;  %970 = vrot.lane.b32.xlu1 %v9251_v30, %s9078_s14 }
  0xf1   :  { %342 = vrot.lane.b32.xlu0 %v9237_v26, %s9080_s16  ;;  %320 = vrot.lane.b32.xlu1 %v9257_v32, %s9078_s14 }
  0xf5   :  { %348 = vrot.lane.b32.xlu0 %v9237_v26, %s9081_s19  ;;  %326 = vrot.lane.b32.xlu1 %v9257_v32, %s9075_s29 }
  0xf9   :  { %964 = vrot.lane.b32.xlu0 %v9251_v30, %s9076_s30  ;;  %332 = vrot.lane.b32.xlu1 %v9257_v32, %s9077_s2 }
  0xfd   :  { %976 = vrot.lane.b32.xlu0 %v9251_v30, %s9075_s29  ;;  %338 = vrot.lane.b32.xlu1 %v9257_v32, %s9079_s15 }
 0x101   :  { %982 = vrot.lane.b32.xlu0 %v9251_v30, %s9077_s2  ;;  %344 = vrot.lane.b32.xlu1 %v9257_v32, %s9080_s16 }
 0x105   :  { %988 = vrot.lane.b32.xlu0 %v9251_v30, %s9079_s15  ;;  %350 = vrot.lane.b32.xlu1 %v9257_v32, %s9081_s19 }
 0x109   :  { %994 = vrot.lane.b32.xlu0 %v9251_v30, %s9080_s16  ;;  %972 = vrot.lane.b32.xlu1 %v9304_v40, %s9078_s14 }
 0x10d   :  { %1000 = vrot.lane.b32.xlu0 %v9251_v30, %s9081_s19  ;;  %978 = vrot.lane.b32.xlu1 %v9304_v40, %s9075_s29 }
 0x111   :  { %1006 = vrot.lane.b32.xlu0 %v9251_v30, %s9083_s23  ;;  %984 = vrot.lane.b32.xlu1 %v9304_v40, %s9077_s2 }
 0x115   :  { %1012 = vrot.lane.b32.xlu0 %v9251_v30, %s9085_s24  ;;  %990 = vrot.lane.b32.xlu1 %v9304_v40, %s9079_s15 }
 0x119   :  { %1018 = vrot.lane.b32.xlu0 %v9251_v30, %s9086_s1  ;;  %996 = vrot.lane.b32.xlu1 %v9304_v40, %s9080_s16 }
 0x11d   :  { %1024 = vrot.lane.b32.xlu0 %v9251_v30, %s9087_s25  ;;  %1002 = vrot.lane.b32.xlu1 %v9304_v40, %s9081_s19 }
 0x121   :  { %1030 = vrot.lane.b32.xlu0 %v9251_v30, %s9088_s26  ;;  %1008 = vrot.lane.b32.xlu1 %v9304_v40, %s9083_s23 }
 0x125   :  { %1036 = vrot.lane.b32.xlu0 %v9251_v30, %s9089_s27  ;;  %1014 = vrot.lane.b32.xlu1 %v9304_v40, %s9085_s24 }
 0x129   :  { %1042 = vrot.lane.b32.xlu0 %v9251_v30, %s9090_s28  ;;  %1020 = vrot.lane.b32.xlu1 %v9304_v40, %s9086_s1 }
 0x12d   :  { %1048 = vrot.lane.b32.xlu0 %v9251_v30, %s9091_s17  ;;  %1026 = vrot.lane.b32.xlu1 %v9304_v40, %s9087_s25 }
 0x131   :  { %314 = vrot.lane.b32.xlu0 %v9257_v32, %s9076_s30  ;;  %1032 = vrot.lane.b32.xlu1 %v9304_v40, %s9088_s26 }
 0x135   :  { %966 = vrot.lane.b32.xlu0 %v9304_v40, %s9076_s30  ;;  %1038 = vrot.lane.b32.xlu1 %v9304_v40, %s9089_s27 }
 0x139   :  { %356 = vrot.lane.b32.xlu0 %v9257_v32, %s9083_s23  ;;  %1044 = vrot.lane.b32.xlu1 %v9304_v40, %s9090_s28 }
 0x13d   :  { %366 = vrot.lane.b32.xlu0 %v9237_v26, %s9086_s1  ;;  %1050 = vrot.lane.b32.xlu1 %v9304_v40, %s9091_s17 }
 0x141   :  { %372 = vrot.lane.b32.xlu0 %v9237_v26, %s9087_s25  ;;  %354 = vrot.lane.b32.xlu1 %v9237_v26, %s9083_s23 }
 0x145   :  { %360 = vrot.lane.b32.xlu1 %v9237_v26, %s9085_s24 }
 0x149   :  { %362 = vrot.lane.b32.xlu1 %v9257_v32, %s9085_s24 }
 0x157   :  { %v9390_v44 = vpop.permute.xlu0 %324  ;;  %v9392_v45 = vpop.permute.xlu1 %312 }
 0x15b   :  { %v9394_v46 = vpop.permute.xlu0 %330  ;;  %v9396_v47 = vpop.permute.xlu1 %318 }
 0x15f   :  { %v9398_v48 = vpop.permute.xlu0 %336  ;;  %v971_v49 = vpop.permute.xlu1 %970 }
 0x160   :  { %v1054_v25 = vcombine.low %v9251_v30, %v971_v49  ;;  %v1055_v35 = vcombine.high %v9251_v30, %v971_v49  ;;  %v9450_v30 = vsub.s32 %v470_v33, %v9226_v21 }
 0x162   :  { %v1062_v43 = vrot.slane %v1054_v25, %v9438_v28  ;;  %v1069_v49 = vrot.slane %v1055_v35, %v9438_v28 }
 0x163   :  { %v9400_v50 = vpop.permute.xlu0 %342  ;;  %v9402_v51 = vpop.permute.xlu1 %320 }
 0x164   :  { %11492 = vst [vmem:[#allocation6_spill] sm:$0xff] %v9402_v51 }
 0x167   :  { %v9404_v52 = vpop.permute.xlu0 %348  ;;  %v9406_v53 = vpop.permute.xlu1 %326 }
 0x16b   :  { %v965_v54 = vpop.permute.xlu0 %964  ;;  %v9408_v55 = vpop.permute.xlu1 %332 }
 0x16c   :  { %11493 = vst [vmem:[#allocation7_spill] sm:$0xff] %v9408_v55 }
 0x16f   :  { %v977_v56 = vpop.permute.xlu0 %976  ;;  %v9410_v57 = vpop.permute.xlu1 %338 }
 0x170   :  { %11494 = vst [vmem:[#allocation8_spill] sm:$0xff] %v9410_v57  ;;  %v1070_v18 = vcombine.low %v965_v54, %v977_v56  ;;  %v1071_v29 = vcombine.high %v965_v54, %v977_v56 }
 0x172   :  { %v1078_v36 = vrot.slane %v1070_v18, %v9438_v28  ;;  %v1085_v11 = vrot.slane %v1071_v29, %v9438_v28 }
 0x173   :  { %v983_v58 = vpop.permute.xlu0 %982  ;;  %v9412_v59 = vpop.permute.xlu1 %344 }
 0x174   :  { %11495 = vst [vmem:[#allocation9_spill] sm:$0xff] %v9412_v59  ;;  %v1134_v27 = vcombine.low %v1069_v49, %v1085_v11 }
 0x177   :  { %v989_v60 = vpop.permute.xlu0 %988  ;;  %v9414_v61 = vpop.permute.xlu1 %350 }
 0x178   :  { %11496 = vst [vmem:[#allocation10_spill] sm:$0xff] %v9414_v61 }
 0x17b   :  { %v995_v62 = vpop.permute.xlu0 %994  ;;  %v9416_v63 = vpop.permute.xlu1 %972 }
 0x17c   :  { %v1086_v37 = vcombine.low %v983_v58, %v995_v62  ;;  %v1087_v12 = vcombine.high %v983_v58, %v995_v62  ;;  %v1118_v58 = vcombine.low %v1062_v43, %v1078_v36 }
 0x17e   :  { %v1101_v33 = vrot.slane %v1087_v12, %v9438_v28 }
 0x17f   :  { %v1001_v0 = vpop.permute.xlu0 %1000  ;;  %v9418_v1 = vpop.permute.xlu1 %978 }
 0x180   :  { %v1102_v31 = vcombine.low %v989_v60, %v1001_v0  ;;  %v1103_v38 = vcombine.high %v989_v60, %v1001_v0  ;;  %v1094_v60 = vrot.slane %v1086_v37, %v9438_v28 }
 0x182   :  { %v1110_v15 = vrot.slane %v1102_v31, %v9438_v28  ;;  %v1117_v0 = vrot.slane %v1103_v38, %v9438_v28 }
 0x183   :  { %v9420_v3 = vpop.permute.xlu0 %1006  ;;  %v9422_v4 = vpop.permute.xlu1 %984 }
 0x184   :  { %v1150_v35 = vcombine.low %v1094_v60, %v1110_v15 }
 0x187   :  { %v1013_v5 = vpop.permute.xlu0 %1012  ;;  %v9424_v6 = vpop.permute.xlu1 %990 }
 0x18b   :  { %v9426_v7 = vpop.permute.xlu0 %1018  ;;  %v9428_v8 = vpop.permute.xlu1 %996 }
 0x18c   :  { %v1190_v54 = vcombine.low %v9420_v3, %v9426_v7  ;;  %v1191_v37 = vcombine.high %v9420_v3, %v9426_v7 }
 0x18e   :  { %v1198_v22 = vrot.slane %v1190_v54, %v9438_v28 }
 0x18f   :  { %v1025_v9 = vpop.permute.xlu0 %1024  ;;  %v9430_v10 = vpop.permute.xlu1 %1002 }
 0x190   :  { %v1206_v39 = vcombine.low %v1013_v5, %v1025_v9  ;;  %v1207_v62 = vcombine.high %v1013_v5, %v1025_v9  ;;  %v1126_v9 = vrot.slane %v1118_v58, %v9450_v30  ;;  %v1151_v58 = vcombine.high %v1094_v60, %v1110_v15 }
 0x191   :  { %v1327_v15 = vcombine.high %v9304_v40, %v9416_v63 }
 0x192   :  { %v1214_v16 = vrot.slane %v1206_v39, %v9438_v28  ;;  %v9471_v12 = vrot.slane %v1207_v62, %v9438_v28 }
 0x193   :  { %v1031_v13 = vpop.permute.xlu0 %1030  ;;  %v9432_v14 = vpop.permute.xlu1 %1008 }
 0x197   :  { %v1037_v19 = vpop.permute.xlu0 %1036  ;;  %v9434_v24 = vpop.permute.xlu1 %1014 }
 0x19b   :  { %v1043_v41 = vpop.permute.xlu0 %1042  ;;  %v9442_v42 = vpop.permute.xlu1 %1020 }
 0x19c   :  { %v1222_v56 = vcombine.low %v1031_v13, %v1043_v41  ;;  %v1223_v25 = vcombine.high %v1031_v13, %v1043_v41  ;;  %v1254_v13 = vcombine.low %v1198_v22, %v1214_v16  ;;  %v1135_v41 = vcombine.high %v1069_v49, %v1085_v11 }
 0x19e   :  { %v1230_v38 = vrot.slane %v1222_v56, %v9438_v28  ;;  %v1237_v54 = vrot.slane %v1223_v25, %v9438_v28  ;;  %v1166_v56 = vcombine.low %v1101_v33, %v1117_v0  ;;  %v1262_v25 = vrot.slane %v1254_v13, %v9450_v30 }
 0x19f   :  { %v1049_v17 = vpop.permute.xlu0 %1048  ;;  %v9456_v18 = vpop.permute.xlu1 %1026 }
 0x1a0   :  { %v1238_v29 = vcombine.low %v1037_v19, %v1049_v17  ;;  %v1239_v31 = vcombine.high %v1037_v19, %v1049_v17  ;;  %v1119_v19 = vcombine.high %v1062_v43, %v1078_v36  ;;  %v1326_v17 = vcombine.low %v9304_v40, %v9416_v63 }
 0x1a1   :  { %v1205_v36 = vrot.slane %v1191_v37, %v9438_v28  ;;  %v9497_v60 = vrot.slane %v1166_v56, %v9450_v30  ;;  %v1478_v63 = vcombine.low %v9434_v24, %v9456_v18  ;;  %v9516_v56 = vrot.slane %v1327_v15, %v9438_v28 }
 0x1a2   :  { %v1246_v39 = vrot.slane %v1238_v29, %v9438_v28  ;;  %v9465_v20 = vrot.slane %v1239_v31, %v9438_v28  ;;  %v1158_v29 = vrot.slane %v1150_v35, %v9450_v30  ;;  %v9480_v31 = vrot.slane %v1134_v27, %v9450_v30 }
 0x1a3   :  { %v9467_v5 = vpop.permute.xlu1 %1032  ;;  %v9474_v3 = vpop.permute.xlu0 %314  ;;  %v9489_v34 = vrot.slane %v1119_v19, %v9450_v30  ;;  %v9492_v35 = vrot.slane %v1135_v41, %v9450_v30  ;;  %v1167_v27 = vcombine.high %v1101_v33, %v1117_v0  ;;  %v1270_v37 = vcombine.low %v1205_v36, %v9471_v12 }
 0x1a4   :  { %v1286_v7 = vcombine.low %v1230_v38, %v1246_v39  ;;  %v1302_v11 = vcombine.low %v1237_v54, %v9465_v20  ;;  %v1287_v49 = vcombine.high %v1230_v38, %v1246_v39  ;;  %v1255_v38 = vcombine.high %v1198_v22, %v1214_v16 }
 0x1a5   :  { %v1183_v39 = vcombine.high %v1126_v9, %v1158_v29  ;;  %v1182_v2 = vcombine.low %v1126_v9, %v1158_v29  ;;  %v9501_v19 = vrot.slane %v1326_v17, %v9438_v28  ;;  %v1165_v0 = vrot.slane %v1151_v58, %v9450_v30 }
 0x1a6   :  { %v1294_v43 = vrot.slane %v1286_v7, %v9450_v30  ;;  %v9504_v41 = vrot.slane %v1302_v11, %v9450_v30  ;;  %v1301_v40 = vrot.slane %v1287_v49, %v9450_v30  ;;  %v9513_v9 = vrot.slane %v1167_v27, %v9450_v30 }
 0x1a7   :  { %v9485_v62 = vpop.permute.xlu1 %1038  ;;  %v967_v55 = vpop.permute.xlu0 %966  ;;  %v9519_v17 = vrot.slane %v1270_v37, %v9450_v30  ;;  %v1269_v29 = vrot.slane %v1255_v38, %v9450_v30  ;;  %v1303_v58 = vcombine.high %v1237_v54, %v9465_v20  ;;  %v1462_v11 = vcombine.low %v9432_v14, %v9442_v42 }
 0x1a8   :  { %v1319_v7 = vcombine.high %v1262_v25, %v1294_v43  ;;  %v1318_v13 = vcombine.low %v1262_v25, %v1294_v43  ;;  %v1374_v43 = vcombine.low %v9424_v6, %v9430_v10  ;;  %v1186_v49 = vcombine.low %v9480_v31, %v9497_v60 }
 0x1a9   :  { %v1322_v25 = vcombine.low %v9519_v17, %v9504_v41  ;;  %v1184_v27 = vcombine.low %v9489_v34, %v1165_v0  ;;  %v1320_v15 = vcombine.low %v1269_v29, %v1301_v40  ;;  %v1271_v20 = vcombine.high %v1205_v36, %v9471_v12 }
 0x1aa   :  { %v1599_v22 = vpack.c.bf16 %v1319_v7, %v1183_v39  ;;  %v1598_v16 = vpack.c.bf16 %v1318_v13, %v1182_v2  ;;  %v1342_v2 = vcombine.low %v967_v55, %v9418_v1  ;;  %v1358_v54 = vcombine.low %v9422_v4, %v9428_v8 }
 0x1ab   :  { %v9510_v33 = vpop.permute.xlu1 %1044  ;;  %v1375_v37 = vcombine.high %v9424_v6, %v9430_v10  ;;  %v1486_v38 = vrot.slane %v1478_v63, %v9438_v28  ;;  %v1188_v7 = vcombine.low %v9492_v35, %v9513_v9  ;;  %v1185_v12 = vcombine.high %v9489_v34, %v1165_v0 }
 0x1ac   :  { %2647 = vxpose.xlu1.c.b16.start.end [1/1] (short) (narrow) %v1599_v22, 16  ;;  %2631 = vxpose.xlu0.c.b16.start.end [1/1] (short) (narrow) %v1598_v16, 16  ;;  %v1494_v13 = vcombine.low %v9467_v5, %v9510_v33  ;;  %v1317_v16 = vrot.slane %v1303_v58, %v9450_v30  ;;  %v1382_v36 = vrot.slane %v1374_v43, %v9438_v28 }
 0x1ad   :  { %v1470_v59 = vrot.slane %v1462_v11, %v9438_v28  ;;  %v1350_v6 = vrot.slane %v1342_v2, %v9438_v28  ;;  %v1187_v10 = vcombine.high %v9480_v31, %v9497_v60  ;;  %v1602_v57 = vpack.c.bf16 %v1322_v25, %v1186_v49 }
 0x1ae   :  { %v1600_v61 = vpack.c.bf16 %v1320_v15, %v1184_v27  ;;  %v1285_v51 = vrot.slane %v1271_v20, %v9450_v30  ;;  %v1359_v58 = vcombine.high %v9422_v4, %v9428_v8  ;;  %v1366_v34 = vrot.slane %v1358_v54, %v9438_v28 }
 0x1af   :  { %v1051_v39 = vpop.permute.xlu1 %1050  ;;  %v9557_v0 = vrot.slane %v1375_v37, %v9438_v28  ;;  %v1526_v43 = vcombine.low %v1470_v59, %v1486_v38  ;;  %v1343_v11 = vcombine.high %v967_v55, %v9418_v1  ;;  %v1502_v2 = vrot.slane %v1494_v13, %v9438_v28 }
 0x1b0   :  { %v1510_v22 = vcombine.low %v9485_v62, %v1051_v39  ;;  %2695 = vxpose.xlu1.c.b16.start.end [1/1] (short) (narrow) %v1602_v57, 16  ;;  %2663 = vxpose.xlu0.c.b16.start.end [1/1] (short) (narrow) %v1600_v61, 16  ;;  %v1324_v31 = vcombine.low %v1285_v51, %v1317_v16  ;;  %v1479_v60 = vcombine.high %v9434_v24, %v9456_v18 }
 0x1b1   :  { %v1321_v49 = vcombine.high %v1269_v29, %v1301_v40  ;;  %v1390_v25 = vcombine.low %v9501_v19, %v1350_v6  ;;  %v1422_v4 = vcombine.low %v1366_v34, %v1382_v36  ;;  %v1463_v8 = vcombine.high %v9432_v14, %v9442_v42 }
 0x1b2   :  { %v1518_v63 = vrot.slane %v1510_v22, %v9438_v28  ;;  %v1604_v27 = vpack.c.bf16 %v1324_v31, %v1188_v7  ;;  %v1527_v20 = vcombine.high %v1470_v59, %v1486_v38  ;;  %v1323_v55 = vcombine.high %v9519_v17, %v9504_v41 }
 0x1b3   :  { %v1601_v54 = vpack.c.bf16 %v1321_v49, %v1185_v12  ;;  %v1398_v57 = vrot.slane %v1390_v25, %v9450_v30  ;;  %v1534_v61 = vrot.slane %v1526_v43, %v9450_v30  ;;  %v1357_v1 = vrot.slane %v1343_v11, %v9438_v28 }
 0x1b4   :  { %v1558_v15 = vcombine.low %v1502_v2, %v1518_v63  ;;  %v1511_v24 = vcombine.high %v9485_v62, %v1051_v39  ;;  %2727 = vxpose.xlu1.c.b16.start.end [1/1] (short) (narrow) %v1604_v27, 16  ;;  %v1391_v14 = vcombine.high %v9501_v19, %v1350_v6  ;;  %v1493_v42 = vrot.slane %v1479_v60, %v9438_v28 }
 0x1b5   :  { %2679 = vxpose.xlu0.c.b16.start.end [1/1] (short) (narrow) %v1601_v54, 16  ;;  %v1430_v59 = vrot.slane %v1422_v4, %v9450_v30  ;;  %v1423_v40 = vcombine.high %v1366_v34, %v1382_v36  ;;  %v1559_v41 = vcombine.high %v1502_v2, %v1518_v63  ;;  %v1495_v17 = vcombine.high %v9467_v5, %v9510_v33 }
 0x1b6   :  { %v1566_v18 = vrot.slane %v1558_v15, %v9450_v30  ;;  %v1325_v29 = vcombine.high %v1285_v51, %v1317_v16  ;;  %v1541_v38 = vrot.slane %v1527_v20, %v9450_v30  ;;  %v1603_v62 = vpack.c.bf16 %v1323_v55, %v1187_v10 }
 0x1b7   :  { %v1454_v39 = vcombine.low %v1398_v57, %v1430_v59  ;;  %v1405_v7 = vrot.slane %v1391_v14, %v9450_v30  ;;  %v1573_v19 = vrot.slane %v1559_v41, %v9450_v30  ;;  %v1373_v13 = vrot.slane %v1359_v58, %v9438_v28 }
 0x1b8   :  { %v1590_v37 = vcombine.low %v1534_v61, %v1566_v18  ;;  %v1477_v22 = vrot.slane %v1463_v8, %v9438_v28  ;;  %v1525_v12 = vrot.slane %v1511_v24, %v9438_v28  ;;  %v1406_v36 = vcombine.low %v9516_v56, %v1357_v1 }
 0x1b9   :  { %2711 = vxpose.xlu0.c.b16.start.end [1/1] (short) (narrow) %v1603_v62, 16  ;;  %v1189_v51 = vcombine.high %v9492_v35, %v9513_v9  ;;  %v1437_v33 = vrot.slane %v1423_v40, %v9450_v30  ;;  %v1592_v16 = vcombine.low %v1541_v38, %v1573_v19  ;;  %v1509_v6 = vrot.slane %v1495_v17, %v9438_v28  ;;  %v9604_v62 = vpop.f32.mrf.mxu1 }
 0x1ba   :  { %v1606_v5 = vpack.c.bf16 %v1590_v37, %v1454_v39  ;;  %v1438_v10 = vcombine.low %v1373_v13, %v9557_v0  ;;  %v1542_v63 = vcombine.low %v1477_v22, %v1493_v42  ;;  %v1591_v34 = vcombine.high %v1534_v61, %v1566_v18 }
 0x1bb   :  { %v1605_v58 = vpack.c.bf16 %v1325_v29, %v1189_v51  ;;  %v1456_v43 = vcombine.low %v1405_v7, %v1437_v33  ;;  %v1414_v11 = vrot.slane %v1406_v36, %v9450_v30  ;;  %v1574_v2 = vcombine.low %v1509_v6, %v1525_v12  ;;  %v8522_v39 = vpop.f32.mrf.mxu1 }
 0x1bc   :  { %2759 = vxpose.xlu1.c.b16.start.end [1/1] (short) (narrow) %v1606_v5, 16  ;;  %v1407_v31 = vcombine.high %v9516_v56, %v1357_v1  ;;  %v1455_v35 = vcombine.high %v1398_v57, %v1430_v59  ;;  %v1543_v60 = vcombine.high %v1477_v22, %v1493_v42  ;;  %v1575_v49 = vcombine.high %v1509_v6, %v1525_v12  ;;  %v9612_v22 = vpop.permute.xlu1 %354 }
 0x1bd   :  { %2743 = vxpose.xlu0.c.b16.start.end [1/1] (short) (narrow) %v1605_v58, 16  ;;  %v1608_v9 = vpack.c.bf16 %v1592_v16, %v1456_v43  ;;  %v1446_v25 = vrot.slane %v1438_v10, %v9450_v30  ;;  %v1550_v4 = vrot.slane %v1542_v63, %v9450_v30  ;;  %v1582_v8 = vrot.slane %v1574_v2, %v9450_v30 }
 0x1be   :  { %v1439_v27 = vcombine.high %v1373_v13, %v9557_v0  ;;  %v1607_v15 = vpack.c.bf16 %v1591_v34, %v1455_v35  ;;  %v1593_v20 = vcombine.high %v1541_v38, %v1573_v19  ;;  %v1589_v54 = vrot.slane %v1575_v49, %v9450_v30  ;;  %v9610_v13 = vpop.permute.xlu0 %356 }
 0x1bf   :  { %v1458_v55 = vcombine.low %v1414_v11, %v1446_v25  ;;  %v1594_v56 = vcombine.low %v1550_v4, %v1582_v8  ;;  %v1421_v57 = vrot.slane %v1407_v31, %v9450_v30  ;;  %v1557_v61 = vrot.slane %v1543_v60, %v9450_v30 }
 0x1c0   :  { %2791 = vxpose.xlu1.c.b16.start.end [1/1] (short) (narrow) %v1608_v9, 16  ;;  %v1457_v1 = vcombine.high %v1405_v7, %v1437_v33  ;;  %v1453_v18 = vrot.slane %v1439_v27, %v9450_v30  ;;  %v1595_v59 = vcombine.high %v1550_v4, %v1582_v8  ;;  %v1459_v40 = vcombine.high %v1414_v11, %v1446_v25  ;;  %v9608_v7 = vpop.f32.mrf.mxu1  ;;  %v9616_v36 = vpop.permute.xlu1 %360 }
 0x1c1   :  { %2775 = vxpose.xlu0.c.b16.start.end [1/1] (short) (narrow) %v1607_v15, 16  ;;  %v1610_v24 = vpack.c.bf16 %v1594_v56, %v1458_v55  ;;  %v1596_v14 = vcombine.low %v1557_v61, %v1589_v54  ;;  %v1597_v29 = vcombine.high %v1557_v61, %v1589_v54 }
 0x1c2   :  { %v1609_v42 = vpack.c.bf16 %v1593_v20, %v1457_v1  ;;  %v1460_v0 = vcombine.low %v1421_v57, %v1453_v18  ;;  %v1611_v17 = vpack.c.bf16 %v1595_v59, %v1459_v40  ;;  %v1461_v37 = vcombine.high %v1421_v57, %v1453_v18  ;;  %v8523_v19 = vpop.f32.mrf.mxu1  ;;  %v9614_v12 = vpop.permute.xlu0 %366 }
 0x1c4   :  { %2823 = vxpose.xlu1.c.b16.start.end [1/1] (short) (narrow) %v1610_v24, 16  ;;  %v1612_v41 = vpack.c.bf16 %v1596_v14, %v1460_v0  ;;  %v1613_v38 = vpack.c.bf16 %v1597_v29, %v1461_v37  ;;  %v9620_v5 = vpop.permute.xlu1 %362 }
 0x1c5   :  { %2807 = vxpose.xlu0.c.b16.start.end [1/1] (short) (narrow) %v1609_v42, 16 }
 0x1c6   :  { %v9618_v51 = vpop.permute.xlu0 %372 }
 0x1c8   :  { %2855 = vxpose.xlu1.c.b16.start.end [1/1] (short) (narrow) %v1612_v41, 16 }
 0x1c9   :  { %2839 = vxpose.xlu0.c.b16.start.end [1/1] (short) (narrow) %v1611_v17, 16 }
 0x1cc   :  { %368 = vrot.lane.b32.xlu1 %v9257_v32, %s9086_s1 }
 0x1cd   :  { %2871 = vxpose.xlu0.c.b16.start.end [1/1] (short) (narrow) %v1613_v38, 16 }
 0x1d0   :  { %374 = vrot.lane.b32.xlu1 %v9257_v32, %s9087_s25 }
 0x1d6   :  { %378 = vrot.lane.b32.xlu0 %v9237_v26, %s9088_s26 }
 0x20e   :  { %v2639_v33 = vpop.trf.xlu0  ;;  %v2655_v16 = vpop.trf.xlu1 }
 0x212   :  { %v2671_v6 = vpop.trf.xlu0  ;;  %v2703_v10 = vpop.trf.xlu1 }
 0x213   :  { %v2887_v8 = vcombine.low %v2639_v33, %v2703_v10 }
 0x215   :  { %v2894_v1 = vrot.slane %v2887_v8, %v9438_v28 }
 0x216   :  { %v2735_v58 = vpop.trf.xlu1 }
 0x217   :  { %v2687_v63 = vpop.trf.xlu0  ;;  %v2895_v60 = vcombine.low %v2671_v6, %v2735_v58 }
 0x219   :  { %v2902_v54 = vrot.slane %v2895_v60, %v9438_v28 }
 0x21b   :  { %v2719_v34 = vpop.trf.xlu0  ;;  %v2919_v0 = vcombine.low %v2894_v1, %v2902_v54  ;;  %v2920_v40 = vcombine.high %v2894_v1, %v2902_v54 }
 0x21c   :  { %v2955_v20 = vcombine.low %v2655_v16, %v2719_v34 }
 0x21d   :  { %v2927_v16 = vrot.slane %v2919_v0, %v9450_v30  ;;  %v2934_v6 = vrot.slane %v2920_v40, %v9450_v30 }
 0x21e   :  { %v2767_v43 = vpop.trf.xlu1  ;;  %v2962_v18 = vrot.slane %v2955_v20, %v9438_v28 }
 0x21f   :  { %v2751_v11 = vpop.trf.xlu0 }
 0x220   :  { %v2963_v49 = vcombine.low %v2687_v63, %v2751_v11 }
 0x222   :  { %v2799_v2 = vpop.trf.xlu1  ;;  %v2970_v56 = vrot.slane %v2963_v49, %v9438_v28 }
 0x223   :  { %v2783_v31 = vpop.trf.xlu0 }
 0x224   :  { %v2987_v41 = vcombine.low %v2962_v18, %v2970_v56  ;;  %v2988_v17 = vcombine.high %v2962_v18, %v2970_v56 }
 0x226   :  { %v2831_v35 = vpop.trf.xlu1  ;;  %v2995_v10 = vrot.slane %v2987_v41, %v9450_v30  ;;  %v3002_v63 = vrot.slane %v2988_v17, %v9450_v30  ;;  %v419_v41 = vcombine.high %v9392_v45, %v9390_v44  ;;  %v450_v17 = vcombine.low %v9398_v48, %v9404_v52 }
 0x227   :  { %v2815_v9 = vpop.trf.xlu0  ;;  %v2903_v25 = vcombine.low %v2767_v43, %v2831_v35 }
 0x229   :  { %v2910_v57 = vrot.slane %v2903_v25, %v9438_v28 }
 0x22a   :  { %v2863_v4 = vpop.trf.xlu1 }
 0x22b   :  { %v2847_v27 = vpop.trf.xlu0  ;;  %v2911_v15 = vcombine.low %v2799_v2, %v2863_v4 }
 0x22c   :  { %v2971_v61 = vcombine.low %v2783_v31, %v2847_v27 }
 0x22d   :  { %v2918_v55 = vrot.slane %v2911_v15, %v9438_v28 }
 0x22e   :  { %v2978_v29 = vrot.slane %v2971_v61, %v9438_v28 }
 0x22f   :  { %v2879_v24 = vpop.trf.xlu0  ;;  %v2935_v14 = vcombine.low %v2910_v57, %v2918_v55  ;;  %v2936_v42 = vcombine.high %v2910_v57, %v2918_v55 }
 0x230   :  { %v2979_v59 = vcombine.low %v2815_v9, %v2879_v24 }
 0x231   :  { %v2943_v38 = vrot.slane %v2935_v14, %v9450_v30  ;;  %v2950_v39 = vrot.slane %v2936_v42, %v9450_v30 }
 0x232   :  { %v2986_v37 = vrot.slane %v2979_v59, %v9438_v28  ;;  %v93_v59 = vsub.s32 2, %v9226_v21 }
 0x233   :  { %v2953_v43 = vcombine.low %v2934_v6, %v2950_v39  ;;  %v2951_v2 = vcombine.low %v2927_v16, %v2943_v38  ;;  %v2954_v25 = vcombine.high %v2934_v6, %v2950_v39  ;;  %v2952_v4 = vcombine.high %v2927_v16, %v2943_v38  ;;  %v11498_v16 = vld [vmem:[#allocation10_spill] sm:$0xff]  ;;  %v11499_v6 = vld [vmem:[#allocation8_spill] sm:$0xff] }
 0x234   :  { %v3003_v19 = vcombine.low %v2978_v29, %v2986_v37  ;;  %v3004_v33 = vcombine.high %v2978_v29, %v2986_v37  ;;  %v94_v0 = vrot.slane %v9232_v23, %v93_v59  ;;  %v403_v29 = vcombine.high %v9237_v26, %v9396_v47 }
 0x235   :  { %v3027_v54 = vshrl.u32 %v2951_v2, 16  ;;  %v3035_v55 = vshrl.u32 %v2952_v4, 16  ;;  %v3043_v1 = vshrl.u32 %v2953_v43, 16  ;;  %v3051_v14 = vshrl.u32 %v2954_v25, 16 }
 0x236   :  { %v3011_v58 = vrot.slane %v3003_v19, %v9450_v30  ;;  %v3018_v34 = vrot.slane %v3004_v33, %v9450_v30  ;;  %v9647_v40 = vadd.f32 %v9604_v62, %v94_v0  ;;  %v9662_v23 = vadd.f32 %v9608_v7, %v94_v0 }
 0x237   :  { %v402_v62 = vcombine.low %v9237_v26, %v9396_v47  ;;  %v418_v7 = vcombine.low %v9392_v45, %v9390_v44  ;;  %v451_v37 = vcombine.high %v9398_v48, %v9404_v52  ;;  %v434_v39 = vcombine.low %v9394_v46, %v9400_v50  ;;  %v11497_v52 = vld [vmem:[#allocation6_spill] sm:$0xff] }
 0x238   :  { %v3021_v11 = vcombine.low %v3002_v63, %v3018_v34  ;;  %v3019_v31 = vcombine.low %v2995_v10, %v3011_v58  ;;  %v3022_v60 = vcombine.high %v3002_v63, %v3018_v34  ;;  %v3020_v49 = vcombine.high %v2995_v10, %v3011_v58 }
 0x239   :  { %v410_v38 = vrot.slane %v402_v62, %v9438_v28  ;;  %v690_v44 = vcombine.low %v9474_v3, %v9406_v53  ;;  %v426_v45 = vrot.slane %v418_v7, %v9438_v28  ;;  %v691_v47 = vcombine.high %v9474_v3, %v9406_v53 }
 0x23a   :  { %v3041_v35 = vpack.i.b16 %v3021_v11, %v2953_v43  ;;  %v3025_v9 = vpack.i.b16 %v3019_v31, %v2951_v2  ;;  %v3049_v8 = vpack.i.b16 %v3022_v60, %v2954_v25  ;;  %v3033_v27 = vpack.i.b16 %v3020_v49, %v2952_v4  ;;  %v11500_v43 = vld [vmem:[#allocation9_spill] sm:$0xff] }
 0x23b   :  { %v3028_v15 = vshrl.u32 %v3019_v31, 16  ;;  %v3036_v20 = vshrl.u32 %v3020_v49, 16  ;;  %v3044_v61 = vshrl.u32 %v3021_v11, 16  ;;  %v3052_v18 = vshrl.u32 %v3022_v60, 16  ;;  %v11501_v11 = vld [vmem:[#allocation7_spill] sm:$0xff] }
 0x23c   :  { %3119 = vxpose.xlu1.c.b16.start.end [1/1] (short) (narrow) %v3041_v35, 16  ;;  %3055 = vxpose.xlu0.c.b16.start.end [1/1] (short) (narrow) %v3025_v9, 16  ;;  %v433_v48 = vrot.slane %v419_v41, %v9438_v28  ;;  %v674_v19 = vcombine.low %v9257_v32, %v11497_v52  ;;  %v458_v33 = vrot.slane %v450_v17, %v9438_v28 }
 0x23d   :  { %v3029_v56 = vpack.i.b16 %v3028_v15, %v3027_v54  ;;  %v3037_v57 = vpack.i.b16 %v3036_v20, %v3035_v55  ;;  %v3045_v24 = vpack.i.b16 %v3044_v61, %v3043_v1  ;;  %v3053_v42 = vpack.i.b16 %v3052_v18, %v3051_v14 }
 0x23e   :  { %v722_v10 = vcombine.low %v11499_v6, %v11498_v16  ;;  %v417_v63 = vrot.slane %v403_v29, %v9438_v28  ;;  %v675_v58 = vcombine.high %v9257_v32, %v11497_v52  ;;  %v9750_v53 = vpop.permute.xlu1 %368  ;;  %v466_v3 = vcombine.low %v410_v38, %v426_v45 }
 0x23f   :  { %v442_v34 = vrot.slane %v434_v39, %v9438_v28  ;;  %v706_v2 = vcombine.low %v11501_v11, %v11500_v43  ;;  %v698_v31 = vrot.slane %v690_v44, %v9438_v28  ;;  %v707_v9 = vcombine.high %v11501_v11, %v11500_v43 }
 0x240   :  { %3151 = vxpose.xlu1.c.b16.start.end [1/1] (short) (narrow) %v3049_v8, 16  ;;  %3087 = vxpose.xlu0.c.b16.start.end [1/1] (short) (narrow) %v3033_v27, 16  ;;  %v705_v60 = vrot.slane %v691_v47, %v9438_v28  ;;  %v682_v49 = vrot.slane %v674_v19, %v9438_v28  ;;  %v730_v8 = vrot.slane %v722_v10, %v9438_v28 }
 0x241   :  { %v498_v25 = vcombine.low %v442_v34, %v458_v33  ;;  %v499_v4 = vcombine.high %v442_v34, %v458_v33  ;;  %v689_v27 = vrot.slane %v675_v58, %v9438_v28  ;;  %v482_v55 = vcombine.low %v417_v63, %v433_v48 }
 0x242   :  { %v739_v61 = vcombine.high %v682_v49, %v698_v31  ;;  %v483_v1 = vcombine.high %v417_v63, %v433_v48  ;;  %v474_v39 = vrot.slane %v466_v3, %v9450_v30 }
 0x243   :  { %v754_v18 = vcombine.low %v689_v27, %v705_v60  ;;  %v755_v14 = vcombine.high %v689_v27, %v705_v60  ;;  %v506_v0 = vrot.slane %v498_v25, %v9450_v30  ;;  %v513_v62 = vrot.slane %v499_v4, %v9450_v30 }
 0x244   :  { %3071 = vxpose.xlu1.c.b16.start.end [1/1] (short) (narrow) %v3029_v56, 16  ;;  %3103 = vxpose.xlu0.c.b16.start.end [1/1] (short) (narrow) %v3037_v57, 16  ;;  %v714_v56 = vrot.slane %v706_v2, %v9438_v28  ;;  %v738_v57 = vcombine.low %v682_v49, %v698_v31  ;;  %v490_v47 = vrot.slane %v482_v55, %v9450_v30 }
 0x245   :  { %v497_v48 = vrot.slane %v483_v1, %v9450_v30  ;;  %v762_v52 = vrot.slane %v754_v18, %v9450_v30  ;;  %v769_v19 = vrot.slane %v755_v14, %v9450_v30  ;;  %v531_v4 = vcombine.high %v474_v39, %v506_v0 }
 0x246   :  { %v770_v7 = vcombine.low %v714_v56, %v730_v8  ;;  %v771_v41 = vcombine.high %v714_v56, %v730_v8 }
 0x248   :  { %380 = vrot.lane.b32.xlu1 %v9257_v32, %s9088_s26  ;;  %3135 = vxpose.xlu0.c.b16.start.end [1/1] (short) (narrow) %v3045_v24, 16  ;;  %v721_v24 = vrot.slane %v707_v9, %v9438_v28  ;;  %v9772_v59 = vpop.permute.xlu0 %378  ;;  %v778_v63 = vrot.slane %v770_v7, %v9450_v30  ;;  %v785_v58 = vrot.slane %v771_v41, %v9450_v30 }
 0x24c   :  { %386 = vrot.lane.b32.xlu1 %v9257_v32, %s9089_s27  ;;  %3167 = vxpose.xlu0.c.b16.start.end [1/1] (short) (narrow) %v3053_v42, 16  ;;  %v9770_v42 = vpop.permute.xlu1 %374 }
 0x250   :  { %392 = vrot.lane.b32.xlu1 %v9257_v32, %s9090_s28 }
 0x254   :  { %398 = vrot.lane.b32.xlu1 %v9257_v32, %s9091_s17  ;;  %v467_v32 = vcombine.high %v410_v38, %v426_v45  ;;  %v746_v45 = vrot.slane %v738_v57, %v9450_v30 }
 0x255   :  { %384 = vrot.lane.b32.xlu0 %v9237_v26, %s9089_s27 }
 0x256   :  { %v481_v44 = vrot.slane %v467_v32, %v9450_v30  ;;  %v802_v43 = vcombine.low %v746_v45, %v778_v63  ;;  %v803_v11 = vcombine.high %v746_v45, %v778_v63 }
 0x258   :  { %1616 = vrot.lane.b32.xlu1 %v9647_v40, %s9076_s30  ;;  %v532_v10 = vcombine.low %v481_v44, %v513_v62  ;;  %v533_v8 = vcombine.high %v481_v44, %v513_v62 }
 0x259   :  { %390 = vrot.lane.b32.xlu0 %v9237_v26, %s9090_s28 }
 0x25c   :  { %1622 = vrot.lane.b32.xlu1 %v9647_v40, %s9078_s14 }
 0x25d   :  { %396 = vrot.lane.b32.xlu0 %v9237_v26, %s9091_s17  ;;  %v435_v26 = vcombine.high %v9394_v46, %v9400_v50  ;;  %v465_v46 = vrot.slane %v451_v37, %v9438_v28  ;;  %v723_v50 = vcombine.high %v11499_v6, %v11498_v16  ;;  %v530_v6 = vcombine.low %v474_v39, %v506_v0 }
 0x25f   :  { %v449_v35 = vrot.slane %v435_v26, %v9438_v28  ;;  %v737_v54 = vrot.slane %v723_v50, %v9438_v28  ;;  %v753_v26 = vrot.slane %v739_v61, %v9450_v30 }
 0x260   :  { %1624 = vrot.lane.b32.xlu1 %v9662_v23, %s9078_s14 }
 0x261   :  { %1618 = vrot.lane.b32.xlu0 %v9662_v23, %s9076_s30  ;;  %v514_v15 = vcombine.low %v449_v35, %v465_v46  ;;  %v515_v20 = vcombine.high %v449_v35, %v465_v46  ;;  %v786_v37 = vcombine.low %v721_v24, %v737_v54  ;;  %v787_v38 = vcombine.high %v721_v24, %v737_v54 }
 0x262   :  { %v804_v2 = vcombine.low %v753_v26, %v785_v58  ;;  %v805_v31 = vcombine.high %v753_v26, %v785_v58 }
 0x263   :  { %v522_v17 = vrot.slane %v514_v15, %v9450_v30  ;;  %v529_v29 = vrot.slane %v515_v20, %v9450_v30  ;;  %v794_v3 = vrot.slane %v786_v37, %v9450_v30  ;;  %v801_v34 = vrot.slane %v787_v38, %v9450_v30 }
 0x264   :  { %1630 = vrot.lane.b32.xlu1 %v9662_v23, %s9075_s29 }
 0x265   :  { %1628 = vrot.lane.b32.xlu0 %v9647_v40, %s9075_s29  ;;  %v534_v46 = vcombine.low %v490_v47, %v522_v17  ;;  %v536_v50 = vcombine.low %v497_v48, %v529_v29  ;;  %v806_v32 = vcombine.low %v762_v52, %v794_v3  ;;  %v807_v35 = vcombine.high %v762_v52, %v794_v3 }
 0x266   :  { %v808_v9 = vcombine.low %v769_v19, %v801_v34  ;;  %v809_v60 = vcombine.high %v769_v19, %v801_v34  ;;  %v535_v27 = vcombine.high %v490_v47, %v522_v17  ;;  %v537_v15 = vcombine.high %v497_v48, %v529_v29 }
 0x267   :  { %v8274_v20 = vpack.c.bf16 %v534_v46, %v530_v6  ;;  %v8276_v54 = vpack.c.bf16 %v536_v50, %v532_v10  ;;  %v8278_v55 = vpack.c.bf16 %v806_v32, %v802_v43  ;;  %v8286_v57 = vpack.c.bf16 %v807_v35, %v803_v11 }
 0x268   :  { %1636 = vrot.lane.b32.xlu1 %v9662_v23, %s9077_s2  ;;  %v8280_v56 = vpack.c.bf16 %v808_v9, %v804_v2  ;;  %v8288_v61 = vpack.c.bf16 %v809_v60, %v805_v31  ;;  %v8282_v18 = vpack.c.bf16 %v535_v27, %v531_v4  ;;  %v8284_v14 = vpack.c.bf16 %v537_v15, %v533_v8 }
 0x269   :  { %1634 = vrot.lane.b32.xlu0 %v9647_v40, %s9077_s2  ;;  %v2319_v37 = vrot.slane %v8274_v20, %v9438_v28  ;;  %v2335_v38 = vrot.slane %v8276_v54, %v9438_v28  ;;  %v2351_v17 = vrot.slane %v8278_v55, %v9438_v28  ;;  %v2487_v39 = vrot.slane %v8286_v57, %v9438_v28 }
 0x26a   :  { %v2367_v29 = vrot.slane %v8280_v56, %v9438_v28  ;;  %v2503_v44 = vrot.slane %v8288_v61, %v9438_v28  ;;  %v2455_v19 = vrot.slane %v8282_v18, %v9438_v28  ;;  %v2471_v6 = vrot.slane %v8284_v14, %v9438_v28 }
 0x26b   :  { %v2375_v50 = vcombine.low %v2319_v37, %v2335_v38  ;;  %v2376_v35 = vcombine.high %v2319_v37, %v2335_v38 }
 0x26c   :  { %1642 = vrot.lane.b32.xlu1 %v9662_v23, %s9079_s15  ;;  %v2407_v3 = vcombine.low %v2351_v17, %v2367_v29  ;;  %v2408_v34 = vcombine.high %v2351_v17, %v2367_v29  ;;  %v2543_v43 = vcombine.low %v2487_v39, %v2503_v44  ;;  %v2544_v2 = vcombine.high %v2487_v39, %v2503_v44 }
 0x26d   :  { %1640 = vrot.lane.b32.xlu0 %v9647_v40, %s9079_s15  ;;  %v2511_v9 = vcombine.low %v2455_v19, %v2471_v6  ;;  %v9810_v15 = vrot.slane %v2375_v50, %v9450_v30  ;;  %v2390_v14 = vrot.slane %v2376_v35, %v9450_v30 }
 0x26e   :  { %v9813_v20 = vrot.slane %v2407_v3, %v9450_v30  ;;  %v2422_v54 = vrot.slane %v2408_v34, %v9450_v30  ;;  %v2558_v57 = vrot.slane %v2544_v2, %v9450_v30 }
 0x26f   :  { %v9827_v18 = vrot.slane %v2511_v9, %v9450_v30 }
 0x270   :  { %1648 = vrot.lane.b32.xlu1 %v9662_v23, %s9080_s16 }
 0x271   :  { %1646 = vrot.lane.b32.xlu0 %v9647_v40, %s9080_s16 }
 0x274   :  { %1654 = vrot.lane.b32.xlu1 %v9662_v23, %s9081_s19 }
 0x275   :  { %1652 = vrot.lane.b32.xlu0 %v9647_v40, %s9081_s19 }
 0x278   :  { %1660 = vrot.lane.b32.xlu1 %v9662_v23, %s9083_s23 }
 0x279   :  { %1658 = vrot.lane.b32.xlu0 %v9647_v40, %s9083_s23 }
 0x27c   :  { %1666 = vrot.lane.b32.xlu1 %v9662_v23, %s9085_s24 }
 0x27d   :  { %1664 = vrot.lane.b32.xlu0 %v9647_v40, %s9085_s24 }
 0x280   :  { %1672 = vrot.lane.b32.xlu1 %v9662_v23, %s9086_s1 }
 0x281   :  { %1670 = vrot.lane.b32.xlu0 %v9647_v40, %s9086_s1 }
 0x284   :  { %1678 = vrot.lane.b32.xlu1 %v9662_v23, %s9087_s25 }
 0x285   :  { %1676 = vrot.lane.b32.xlu0 %v9647_v40, %s9087_s25 }
 0x288   :  { %1684 = vrot.lane.b32.xlu1 %v9662_v23, %s9088_s26 }
 0x289   :  { %1682 = vrot.lane.b32.xlu0 %v9647_v40, %s9088_s26 }
 0x28c   :  { %1690 = vrot.lane.b32.xlu1 %v9662_v23, %s9089_s27 }
 0x28d   :  { %1688 = vrot.lane.b32.xlu0 %v9647_v40, %s9089_s27 }
 0x290   :  { %1696 = vrot.lane.b32.xlu1 %v9662_v23, %s9090_s28 }
 0x291   :  { %1694 = vrot.lane.b32.xlu0 %v9647_v40, %s9090_s28 }
 0x294   :  { %1702 = vrot.lane.b32.xlu1 %v9662_v23, %s9091_s17 }
 0x295   :  { %1700 = vrot.lane.b32.xlu0 %v9647_v40, %s9091_s17 }
 0x29e   :  { %v3063_v33 = vpop.trf.xlu0  ;;  %v3127_v16 = vpop.trf.xlu1 }
 0x29f   :  { %v3187_v7 = vshrl.u32 %v3063_v33, 16  ;;  %v3203_v0 = vshrl.u32 %v3127_v16, 16 }
 0x2a2   :  { %v3095_v49 = vpop.trf.xlu0  ;;  %v3159_v25 = vpop.trf.xlu1 }
 0x2a3   :  { %v3195_v26 = vshrl.u32 %v3095_v49, 16  ;;  %v3211_v58 = vshrl.u32 %v3159_v25, 16 }
 0x2a6   :  { %v3111_v1 = vpop.trf.xlu0  ;;  %v3079_v24 = vpop.trf.xlu1 }
 0x2a7   :  { %v3188_v41 = vshrl.u32 %v3079_v24, 16  ;;  %v3185_v62 = vpack.i.b16 %v3079_v24, %v3063_v33  ;;  %v3196_v47 = vshrl.u32 %v3111_v1, 16  ;;  %v3193_v33 = vpack.i.b16 %v3111_v1, %v3095_v49 }
 0x2a8   :  { %v2512_v49 = vcombine.high %v2455_v19, %v2471_v6  ;;  %v11502_v6 = vmov 0  }
 0x2a9   :  { %v9798_v10 = vpack.i.b16 %v3188_v41, %v3187_v7  ;;  %v9802_v31 = vpack.i.b16 %v3196_v47, %v3195_v26 }
 0x2aa   :  { %v3143_v45 = vpop.trf.xlu0  ;;  %v2526_v37 = vrot.slane %v2512_v49, %v9450_v30 }
 0x2ab   :  { %v3201_v48 = vpack.i.b16 %v3143_v45, %v3127_v16  ;;  %v3204_v52 = vshrl.u32 %v3143_v45, 16 }
 0x2ac   :  { %v9842_v44 = vcombine.low %v2526_v37, %v2558_v57  ;;  %v9888_v49 = vcombine.high %v2526_v37, %v2558_v57  ;;  %v827_v57 = vcombine.high %v9620_v5, %v9770_v42 }
 0x2ad   :  { %v9800_v63 = vpack.i.b16 %v3204_v52, %v3203_v0  ;;  %v3215_v46 = vcombine.low %v3185_v62, %v3201_v48  ;;  %v3216_v24 = vcombine.high %v3185_v62, %v3201_v48  ;;  %v2439_v0 = vcombine.low %v9810_v15, %v9813_v20 }
 0x2ae   :  { %v3175_v11 = vpop.trf.xlu0  ;;  %v9838_v62 = vcombine.low %v2390_v14, %v2422_v54 }
 0x2af   :  { %v3209_v16 = vpack.i.b16 %v3175_v11, %v3159_v25  ;;  %v3212_v32 = vshrl.u32 %v3175_v11, 16  ;;  %v3283_v60 = vcombine.low %v9798_v10, %v9800_v63  ;;  %v3223_v27 = vrot.slane %v3215_v46, %v9438_v28 }
 0x2b0   :  { %v9816_v25 = vrot.slane %v2543_v43, %v9450_v30  ;;  %v9850_v47 = vrot.slane %v3216_v24, %v9438_v28  ;;  %v555_v46 = vcombine.high %v9616_v36, %v9618_v51  ;;  %v2597_v34 = vpack.i.b16 %v9842_v44, %v9838_v62 }
 0x2b1   :  { %v9806_v4 = vpack.i.b16 %v3212_v32, %v3211_v58  ;;  %v3231_v8 = vcombine.low %v3193_v33, %v3209_v16  ;;  %v9824_v61 = vrot.slane %v3283_v60, %v9438_v28  ;;  %v3232_v1 = vcombine.high %v3193_v33, %v3209_v16 }
 0x2b2   :  { %v2575_v17 = vcombine.low %v9827_v18, %v9816_v25  ;;  %v554_v58 = vcombine.low %v9616_v36, %v9618_v51  ;;  %v11503_v43 = vmov 0.0   ;;  %v538_v36 = vcombine.low %v9612_v22, %v9614_v12 }
 0x2b3   :  { %v3239_v55 = vrot.slane %v3231_v8, %v9438_v28  ;;  %v3299_v56 = vcombine.low %v9802_v31, %v9806_v4  ;;  %v9847_v26 = vrot.slane %v3232_v1, %v9438_v28  ;;  %v539_v51 = vcombine.high %v9612_v22, %v9614_v12 }
 0x2b4   :  { %v2585_v3 = vpack.i.b16 %v2575_v17, %v2439_v0  ;;  %v562_v32 = vrot.slane %v554_v58, %v9438_v28  ;;  %v9881_v35 = vrot.slane %v555_v46, %v9438_v28  ;;  %v2586_v22 = vshrl.u32 %v2439_v0, 16 }
 0x2b5   :  { %v3247_v7 = vcombine.low %v3223_v27, %v3239_v55  ;;  %v3248_v41 = vcombine.high %v3223_v27, %v3239_v55  ;;  %v9832_v38 = vrot.slane %v3299_v56, %v9438_v28  ;;  %v3263_v16 = vcombine.low %v9850_v47, %v9847_v26 }
 0x2b6   :  { %v2587_v12 = vshrl.u32 %v2575_v17, 16  ;;  %v9886_v60 = vcombine.high %v2390_v14, %v2422_v54  ;;  %v546_v8 = vrot.slane %v538_v36, %v9438_v28  ;;  %v553_v27 = vrot.slane %v539_v51, %v9438_v28 }
 0x2b7   :  { %v3255_v29 = vrot.slane %v3247_v7, %v9450_v30  ;;  %v3262_v39 = vrot.slane %v3248_v41, %v9450_v30  ;;  %v3315_v45 = vcombine.low %v9824_v61, %v9832_v38  ;;  %v9897_v56 = vrot.slane %v3263_v16, %v9450_v30 }
 0x2b8   :  { %v602_v1 = vcombine.low %v546_v8, %v562_v32  ;;  %v603_v24 = vcombine.high %v546_v8, %v562_v32  ;;  %v826_v54 = vcombine.low %v9620_v5, %v9770_v42  ;;  %v618_v7 = vcombine.low %v553_v27, %v9881_v35 }
 0x2b9   :  { %v3357_v48 = vsel %vm3355_vm1, %v3255_v29, 0  ;;  %v3545_v52 = vsel %vm3355_vm1, %v3262_v39, 0  ;;  %v9855_v19 = vrot.slane %v3315_v45, %v9450_v30  ;;  %v3280_v33 = vcombine.high %v3262_v39, %v11502_v6 }
 0x2ba   :  { %8525 = vmatpush3.bf16.msra.mxu1 %v3357_v48  ;;  %8549 = vmatpush3.bf16.msra.mxu0 %v3545_v52  ;;  %v9862_v50 = vpop.permute.xlu1 %380  ;;  %v3279_v55 = vcombine.high %v3255_v29, %v11502_v6  ;;  %v2588_v41 = vpack.i.b16 %v2587_v12, %v2586_v22  ;;  %v2603_v37 = vpack.i.b16 %v9888_v49, %v9886_v60 }
 0x2bb   :  { %8530 = vmatprep.subr.bf16.mxu1 %v11503_v43  ;;  %8560 = vmatprep.subr.bf16.mxu0 %v11503_v43  ;;  %v3404_v11 = vsel %vm3355_vm1, %v9855_v19, 0  ;;  %v3639_v2 = vsel %vm3355_vm1, %v3280_v33, 0  ;;  %v2440_v0 = vcombine.high %v9810_v15, %v9813_v20  ;;  %v619_v17 = vcombine.high %v553_v27, %v9881_v35 }
 0x2bc   :  { %v810_v29 = vcombine.low %v9610_v13, %v9750_v53  ;;  %v811_v39 = vcombine.high %v9610_v13, %v9750_v53  ;;  %v2576_v5 = vcombine.high %v9827_v18, %v9816_v25  ;;  %v3451_v48 = vsel %vm3355_vm1, %v3279_v55, 0 }
 0x2bd   :  { %8527 = vmatmul.mubr.msk.bf16.vlgmr.msra.gmra.mxu1 %vm3351_vm2, %v2585_v3  ;;  %8551 = vmatmul.mubr.msk.bf16.vlgmr.msra.gmra.mxu0 %vm3351_vm2, %v2597_v34  ;;  %v3733_v15 = vsel %vm3355_vm1, %v9897_v56, 0  ;;  %v9923_v20 = vrot.slane %v602_v1, %v9450_v30  ;;  %v834_v13 = vrot.slane %v826_v54, %v9438_v28  ;;  %v841_v53 = vrot.slane %v827_v57, %v9438_v28 }
 0x2be   :  { %v387_v9 = vpop.permute.xlu1 %386  ;;  %8531 = vmatpush3.bf16.msra.mxu1 %v3404_v11  ;;  %8561 = vmatpush3.bf16.msra.mxu0 %v3639_v2  ;;  %v9928_v18 = vrot.slane %v603_v24, %v9450_v30  ;;  %v2592_v46 = vshrl.u32 %v2440_v0, 16  ;;  %v825_v3 = vrot.slane %v811_v39, %v9438_v28  ;;  %v3347_v34 = vcombine.high %v9855_v19, %v11502_v6 }
 0x2bf   :  { %8532 = vmatprep.mubr.msk.bf16.mxu1 %vm9084_vm0, %v11503_v43  ;;  %8536 = vmatprep.subr.bf16.mxu1 %v11503_v43  ;;  %v2593_v11 = vshrl.u32 %v2576_v5, 16  ;;  %v2591_v19 = vpack.i.b16 %v2576_v5, %v2440_v0  ;;  %v9949_v24 = vrot.slane %v618_v7, %v9450_v30  ;;  %v9952_v54 = vrot.slane %v619_v17, %v9450_v30 }
 0x2c0   :  { %8562 = vmatprep.mubr.msk.bf16.mxu0 %vm9084_vm0, %v11503_v43  ;;  %8572 = vmatprep.subr.bf16.mxu0 %v11503_v43  ;;  %v891_v57 = vcombine.high %v825_v3, %v841_v53  ;;  %v3498_v0 = vsel %vm3355_vm1, %v3347_v34, 0 }
 0x2c2   :  { %v393_v14 = vpop.permute.xlu1 %392 }
 0x2c3   :  { %v842_v42 = vcombine.low %v9862_v50, %v393_v14  ;;  %v843_v45 = vcombine.high %v9862_v50, %v393_v14  ;;  %v818_v50 = vrot.slane %v810_v29, %v9438_v28  ;;  %v3316_v14 = vcombine.high %v9824_v61, %v9832_v38 }
 0x2c4   :  { %v2594_v29 = vpack.i.b16 %v2593_v11, %v2592_v46  ;;  %v2598_v61 = vshrl.u32 %v9838_v62, 16 }
 0x2c5   :  { %8533 = vmatmul.mubr.msk.bf16.vlgmr.msra.gmra.mxu1 %vm3351_vm2, %v2588_v41  ;;  %8563 = vmatmul.mubr.msk.bf16.vlgmr.msra.gmra.mxu0 %vm3351_vm2, %v2603_v37  ;;  %v850_v2 = vrot.slane %v842_v42, %v9438_v28  ;;  %v857_v36 = vrot.slane %v843_v45, %v9438_v28  ;;  %v874_v32 = vcombine.low %v818_v50, %v834_v13 }
 0x2c6   :  { %8537 = vmatpush3.bf16.msra.mxu1 %v3451_v48  ;;  %8573 = vmatpush3.bf16.msra.mxu0 %v3733_v15  ;;  %v399_v25 = vpop.permute.xlu1 %398  ;;  %v875_v35 = vcombine.high %v818_v50, %v834_v13  ;;  %v905_v13 = vrot.slane %v891_v57, %v9450_v30 }
 0x2c7   :  { %v858_v52 = vcombine.low %v387_v9, %v399_v25  ;;  %v859_v33 = vcombine.high %v387_v9, %v399_v25  ;;  %v9930_v58 = vpop.permute.xlu0 %384  ;;  %8538 = vmatprep.mubr.msk.bf16.mxu1 %vm9084_vm0, %v11503_v43  ;;  %8542 = vmatprep.subr.bf16.mxu1 %v11503_v43  ;;  %v890_v9 = vcombine.low %v825_v3, %v841_v53 }
 0x2c8   :  { %8574 = vmatprep.mubr.msk.bf16.mxu0 %vm9084_vm0, %v11503_v43  ;;  %8584 = vmatprep.subr.bf16.mxu0 %v11503_v43  ;;  %v882_v39 = vrot.slane %v874_v32, %v9450_v30  ;;  %v889_v38 = vrot.slane %v875_v35, %v9450_v30 }
 0x2c9   :  { %v866_v51 = vrot.slane %v858_v52, %v9438_v28  ;;  %v873_v16 = vrot.slane %v859_v33, %v9438_v28  ;;  %v898_v42 = vrot.slane %v890_v9, %v9450_v30  ;;  %v3330_v52 = vrot.slane %v3316_v14, %v9450_v30 }
 0x2ca   :  { %v9946_v22 = vpop.permute.xlu1 %1616  ;;  %v3300_v9 = vcombine.high %v9802_v31, %v9806_v4 }
 0x2cb   :  { %v906_v12 = vcombine.low %v850_v2, %v866_v51  ;;  %v907_v8 = vcombine.high %v850_v2, %v866_v51  ;;  %v922_v27 = vcombine.low %v857_v36, %v873_v16  ;;  %v923_v55 = vcombine.high %v857_v36, %v873_v16  ;;  %v391_v1 = vpop.permute.xlu0 %390 }
 0x2cc   :  { %v570_v45 = vcombine.low %v9772_v59, %v391_v1  ;;  %v571_v48 = vcombine.high %v9772_v59, %v391_v1 }
 0x2cd   :  { %v914_v41 = vrot.slane %v906_v12, %v9450_v30  ;;  %v921_v37 = vrot.slane %v907_v8, %v9450_v30  ;;  %8539 = vmatmul.mubr.msk.bf16.vlgmr.msra.gmra.mxu1 %vm3351_vm2, %v2591_v19  ;;  %v930_v7 = vrot.slane %v922_v27, %v9450_v30  ;;  %v937_v17 = vrot.slane %v923_v55, %v9450_v30 }
 0x2ce   :  { %8543 = vmatpush3.bf16.msra.mxu1 %v3498_v0  ;;  %v9963_v5 = vpop.permute.xlu1 %1622  ;;  %8544 = vmatprep.mubr.msk.bf16.mxu1 %vm9084_vm0, %v11503_v43  ;;  %v578_v36 = vrot.slane %v570_v45, %v9438_v28  ;;  %v585_v51 = vrot.slane %v571_v48, %v9438_v28  ;;  %v3592_v19 = vsel %vm3355_vm1, %v3330_v52, 0  ;;  %v2599_v12 = vshrl.u32 %v9842_v44, 16 }
 0x2cf   :  { %v397_v15 = vpop.permute.xlu0 %396  ;;  %8554 = vmatprep.subr.bf16.mxu1 %v11503_v43  ;;  %v938_v53 = vcombine.low %v882_v39, %v914_v41  ;;  %v939_v25 = vcombine.high %v882_v39, %v914_v41  ;;  %v940_v33 = vcombine.low %v889_v38, %v921_v37  ;;  %v941_v46 = vcombine.high %v889_v38, %v921_v37 }
 0x2d0   :  { %v586_v62 = vcombine.low %v9930_v58, %v397_v15  ;;  %v587_v50 = vcombine.high %v9930_v58, %v397_v15  ;;  %v942_v3 = vcombine.low %v898_v42, %v930_v7  ;;  %v943_v34 = vcombine.high %v898_v42, %v930_v7 }
 0x2d1   :  { %v944_v11 = vcombine.low %v905_v13, %v937_v17  ;;  %v945_v2 = vcombine.high %v905_v13, %v937_v17  ;;  %v3284_v58 = vcombine.high %v9798_v10, %v9800_v63  ;;  %v3348_v39 = vcombine.high %v3330_v52, %v11502_v6 }
 0x2d2   :  { %v9977_v59 = vpop.permute.xlu1 %1624  ;;  %v594_v16 = vrot.slane %v586_v62, %v9438_v28  ;;  %v601_v32 = vrot.slane %v587_v50, %v9438_v28  ;;  %v8279_v57 = vpack.c.bf16 %v942_v3, %v938_v53  ;;  %v8287_v41 = vpack.c.bf16 %v943_v34, %v939_v25 }
 0x2d3   :  { %v9983_v35 = vpop.permute.xlu0 %1618  ;;  %v8281_v14 = vpack.c.bf16 %v944_v11, %v940_v33  ;;  %v8289_v37 = vpack.c.bf16 %v945_v2, %v941_v46  ;;  %v10005_v7 = vrot.slane %v3284_v58, %v9438_v28  ;;  %v10008_v17 = vrot.slane %v3300_v9, %v9438_v28 }
 0x2d4   :  { %v634_v8 = vcombine.low %v578_v36, %v594_v16  ;;  %v635_v27 = vcombine.high %v578_v36, %v594_v16  ;;  %v650_v55 = vcombine.low %v585_v51, %v601_v32  ;;  %v651_v1 = vcombine.high %v585_v51, %v601_v32 }
 0x2d5   :  { %8545 = vmatmul.mubr.msk.bf16.vlgmr.msra.gmra.mxu1 %vm3351_vm2, %v2594_v29  ;;  %v2600_v29 = vpack.i.b16 %v2599_v12, %v2598_v61  ;;  %v10021_v52 = vrot.slane %v8279_v57, %v9438_v28  ;;  %v10024_v33 = vrot.slane %v8281_v14, %v9438_v28  ;;  %v3686_v3 = vsel %vm3355_vm1, %v3348_v39, 0 }
 0x2d6   :  { %8555 = vmatpush3.bf16.msra.mxu1 %v3592_v19  ;;  %v9992_v0 = vpop.permute.xlu1 %1630  ;;  %v642_v31 = vrot.slane %v634_v8, %v9450_v30  ;;  %v649_v10 = vrot.slane %v635_v27, %v9450_v30  ;;  %v658_v63 = vrot.slane %v650_v55, %v9450_v30  ;;  %v665_v4 = vrot.slane %v651_v1, %v9450_v30 }
 0x2d7   :  { %v9998_v44 = vpop.permute.xlu0 %1628  ;;  %8556 = vmatprep.mubr.msk.bf16.mxu1 %vm9084_vm0, %v11503_v43  ;;  %8566 = vmatprep.subr.bf16.mxu1 %v11503_v43  ;;  %v3331_v34 = vcombine.low %v10005_v7, %v10008_v17  ;;  %v2423_v32 = vcombine.low %v10021_v52, %v10024_v33  ;;  %v2604_v19 = vshrl.u32 %v9886_v60, 16  ;;  %v2605_v12 = vshrl.u32 %v9888_v49, 16 }
 0x2d8   :  { %v666_v38 = vcombine.low %v9923_v20, %v642_v31  ;;  %v667_v42 = vcombine.high %v9923_v20, %v642_v31  ;;  %v668_v45 = vcombine.low %v9928_v18, %v649_v10  ;;  %v669_v48 = vcombine.high %v9928_v18, %v649_v10 }
 0x2d9   :  { %v670_v15 = vcombine.low %v9949_v24, %v658_v63  ;;  %v671_v61 = vcombine.high %v9949_v24, %v658_v63  ;;  %v672_v13 = vcombine.low %v9952_v54, %v665_v4  ;;  %v673_v53 = vcombine.high %v9952_v54, %v665_v4 }
 0x2da   :  { %v10018_v25 = vpop.permute.xlu1 %1636  ;;  %v10027_v20 = vrot.slane %v8287_v41, %v9438_v28  ;;  %v10030_v18 = vrot.slane %v8289_v37, %v9438_v28  ;;  %v3339_v55 = vrot.slane %v3331_v34, %v9450_v30  ;;  %v2606_v37 = vpack.i.b16 %v2605_v12, %v2604_v19 }
 0x2db   :  { %v10032_v46 = vpop.permute.xlu0 %1634  ;;  %v8275_v24 = vpack.c.bf16 %v670_v15, %v666_v38  ;;  %v8277_v62 = vpack.c.bf16 %v672_v13, %v668_v45  ;;  %v8283_v50 = vpack.c.bf16 %v671_v61, %v667_v42  ;;  %v8285_v54 = vpack.c.bf16 %v673_v53, %v669_v48 }
 0x2dc   :  { %v2559_v9 = vcombine.low %v10027_v20, %v10030_v18  ;;  %v2431_v31 = vrot.slane %v2423_v32, %v9450_v30  ;;  %v3780_v49 = vsel %vm3355_vm1, %v3339_v55, 0  ;;  %v3281_v4 = vcombine.high %v9897_v56, %v11502_v6 }
 0x2dd   :  { %8557 = vmatmul.mubr.msk.bf16.vlgmr.msra.gmra.mxu1 %vm3351_vm2, %v2600_v29  ;;  %v2326_v11 = vrot.slane %v8275_v24, %v9438_v28  ;;  %v2342_v2 = vrot.slane %v8277_v62, %v9438_v28  ;;  %v10041_v36 = vrot.slane %v8283_v50, %v9438_v28  ;;  %v10044_v51 = vrot.slane %v8285_v54, %v9438_v28 }
 0x2de   :  { %8567 = vmatpush3.bf16.msra.mxu1 %v3686_v3  ;;  %v10046_v16 = vpop.permute.xlu1 %1642  ;;  %8568 = vmatprep.mubr.msk.bf16.mxu1 %vm9084_vm0, %v11503_v43  ;;  %v2567_v60 = vrot.slane %v2559_v9, %v9450_v30  ;;  %v3264_v48 = vcombine.high %v9850_v47, %v9847_v26  ;;  %v3827_v56 = vsel %vm3355_vm1, %v3281_v4, 0  ;;  %v3349_v15 = vcombine.high %v3339_v55, %v11502_v6 }
 0x2df   :  { %v10052_v58 = vpop.permute.xlu0 %1640  ;;  %8578 = vmatprep.subr.bf16.mxu1 %v11503_v43  ;;  %v2391_v8 = vcombine.low %v2326_v11, %v2342_v2  ;;  %v2527_v27 = vcombine.low %v10041_v36, %v10044_v51  ;;  %v2392_v61 = vcombine.high %v2326_v11, %v2342_v2  ;;  %v2528_v53 = vcombine.high %v10041_v36, %v10044_v51 }
 0x2e0   :  { %v3278_v50 = vrot.slane %v3264_v48, %v9450_v30  ;;  %v2424_v54 = vcombine.high %v10021_v52, %v10024_v33  ;;  %v2560_v3 = vcombine.high %v10027_v20, %v10030_v18  ;;  %v3874_v34 = vsel %vm3355_vm1, %v3349_v15, 0 }
 0x2e1   :  { %v2399_v57 = vrot.slane %v2391_v8, %v9450_v30  ;;  %v2535_v14 = vrot.slane %v2527_v27, %v9450_v30  ;;  %v3332_v11 = vcombine.high %v10005_v7, %v10008_v17  ;;  %v2406_v36 = vrot.slane %v2392_v61, %v9450_v30 }
 0x2e2   :  { %v10062_v1 = vpop.permute.xlu1 %1648  ;;  %v2542_v18 = vrot.slane %v2528_v53, %v9450_v30  ;;  %v3921_v7 = vsel %vm3355_vm1, %v3278_v50, 0  ;;  %v2438_v32 = vrot.slane %v2424_v54, %v9450_v30  ;;  %v2574_v9 = vrot.slane %v2560_v3, %v9450_v30 }
 0x2e3   :  { %v10066_v41 = vpop.permute.xlu0 %1646  ;;  %v2443_v10 = vcombine.low %v2399_v57, %v2431_v31  ;;  %v2579_v63 = vcombine.low %v2535_v14, %v2567_v60  ;;  %v2444_v26 = vcombine.high %v2399_v57, %v2431_v31  ;;  %v2580_v47 = vcombine.high %v2535_v14, %v2567_v60 }
 0x2e4   :  { %v3346_v17 = vrot.slane %v3332_v11, %v9450_v30  ;;  %v2445_v27 = vcombine.low %v2406_v36, %v2438_v32  ;;  %v2581_v55 = vcombine.low %v2542_v18, %v2574_v9  ;;  %v3282_v14 = vcombine.high %v3278_v50, %v11502_v6 }
 0x2e5   :  { %8569 = vmatmul.mubr.msk.bf16.vlgmr.msra.gmra.mxu1 %vm3351_vm2, %v2606_v37  ;;  %v2609_v39 = vpack.i.b16 %v2579_v63, %v2443_v10  ;;  %v2610_v42 = vshrl.u32 %v2443_v10, 16  ;;  %v2611_v45 = vshrl.u32 %v2579_v63, 16  ;;  %v2615_v51 = vpack.i.b16 %v2580_v47, %v2444_v26 }
 0x2e6   :  { %8579 = vmatpush3.bf16.msra.mxu1 %v3780_v49  ;;  %v10074_v29 = vpop.permute.xlu1 %1654  ;;  %8580 = vmatprep.mubr.msk.bf16.mxu1 %vm9084_vm0, %v11503_v43  ;;  %v2616_v33 = vshrl.u32 %v2444_v26, 16  ;;  %v2617_v20 = vshrl.u32 %v2580_v47, 16  ;;  %v3968_v57 = vsel %vm3355_vm1, %v3346_v17, 0  ;;  %v2621_v31 = vpack.i.b16 %v2581_v55, %v2445_v27 }
 0x2e7   :  { %v10076_v38 = vpop.permute.xlu0 %1652  ;;  %8590 = vmatprep.subr.bf16.mxu1 %v11503_v43  ;;  %8575 = vmatmul.mubr.msk.bf16.vlgmr.msra.gmra.mxu0 %vm3351_vm2, %v2609_v39  ;;  %v2612_v62 = vpack.i.b16 %v2611_v45, %v2610_v42  ;;  %v2622_v49 = vshrl.u32 %v2445_v27, 16  ;;  %v2623_v10 = vshrl.u32 %v2581_v55, 16  ;;  %v1994_v63 = vcombine.low %v9983_v35, %v9992_v0 }
 0x2e8   :  { %8585 = vmatpush3.bf16.msra.mxu0 %v3827_v56  ;;  %8586 = vmatprep.mubr.msk.bf16.mxu0 %vm9084_vm0, %v11503_v43  ;;  %v2618_v8 = vpack.i.b16 %v2617_v20, %v2616_v33  ;;  %v1706_v4 = vcombine.low %v9647_v40, %v9963_v5  ;;  %v1722_v39 = vcombine.low %v9946_v22, %v9998_v44  ;;  %v4015_v42 = vsel %vm3355_vm1, %v3282_v14, 0 }
 0x2e9   :  { %8596 = vmatprep.subr.bf16.mxu0 %v11503_v43  ;;  %v3350_v45 = vcombine.high %v3346_v17, %v11502_v6  ;;  %v1707_v48 = vcombine.high %v9647_v40, %v9963_v5  ;;  %v1978_v56 = vcombine.low %v9662_v23, %v9977_v59  ;;  %v2624_v53 = vpack.i.b16 %v2623_v10, %v2622_v49 }
 0x2ea   :  { %v10086_v13 = vpop.permute.xlu1 %1660  ;;  %v2582_v26 = vcombine.high %v2542_v18, %v2574_v9  ;;  %v1995_v47 = vcombine.high %v9983_v35, %v9992_v0  ;;  %v10158_v40 = vrot.slane %v1994_v63, %v9438_v28  ;;  %v1723_v5 = vcombine.high %v9946_v22, %v9998_v44 }
 0x2eb   :  { %v10092_v24 = vpop.permute.xlu0 %1658  ;;  %v10163_v50 = vrot.slane %v1706_v4, %v9438_v28  ;;  %v10166_v54 = vrot.slane %v1722_v39, %v9438_v28  ;;  %v1754_v3 = vcombine.low %v10052_v58, %v10076_v38  ;;  %v10173_v35 = vrot.slane %v1707_v48, %v9438_v28 }
 0x2ec   :  { %v10176_v0 = vrot.slane %v1978_v56, %v9438_v28  ;;  %v1738_v22 = vcombine.low %v10032_v46, %v10066_v41  ;;  %v2026_v11 = vcombine.low %v10046_v16, %v10074_v29  ;;  %v2629_v20 = vshrl.u32 %v2582_v26, 16 }
 0x2ed   :  { %8581 = vmatmul.mubr.msk.bf16.vlgmr.msra.gmra.mxu1 %vm3351_vm2, %v2612_v62  ;;  %v2446_v62 = vcombine.high %v2406_v36, %v2438_v32  ;;  %v1979_v18 = vcombine.high %v9662_v23, %v9977_v59  ;;  %v10195_v32 = vrot.slane %v1723_v5, %v9438_v28  ;;  %v1770_v9 = vcombine.low %v10163_v50, %v10166_v54 }
 0x2ee   :  { %8591 = vmatpush3.bf16.msra.mxu1 %v3874_v34  ;;  %v10104_v2 = vpop.permute.xlu1 %1666  ;;  %8592 = vmatprep.mubr.msk.bf16.mxu1 %vm9084_vm0, %v11503_v43  ;;  %v4062_v34 = vsel %vm3355_vm1, %v3350_v45, 0  ;;  %v2042_v17 = vcombine.low %v10176_v0, %v10158_v40  ;;  %v1755_v27 = vcombine.high %v10052_v58, %v10076_v38  ;;  %v1762_v55 = vrot.slane %v1754_v3, %v9438_v28 }
 0x2ef   :  { %v10109_v52 = vpop.permute.xlu0 %1664  ;;  %8602 = vmatprep.subr.bf16.mxu1 %v11503_v43  ;;  %8587 = vmatmul.mubr.msk.bf16.vlgmr.msra.gmra.mxu0 %vm3351_vm2, %v2615_v51  ;;  %v2627_v36 = vpack.i.b16 %v2582_v26, %v2446_v62  ;;  %v2628_v33 = vshrl.u32 %v2446_v62, 16  ;;  %v2011_v14 = vcombine.high %v10018_v25, %v10062_v1  ;;  %v1746_v58 = vrot.slane %v1738_v22, %v9438_v28 }
 0x2f0   :  { %8597 = vmatpush3.bf16.msra.mxu0 %v3921_v7  ;;  %8598 = vmatprep.mubr.msk.bf16.mxu0 %vm9084_vm0, %v11503_v43  ;;  %v10190_v7 = vrot.slane %v1995_v47, %v9438_v28  ;;  %v2027_v38 = vcombine.high %v10046_v16, %v10074_v29  ;;  %v10219_v10 = vrot.slane %v2026_v11, %v9438_v28  ;;  %vm7687_vm1 = vcmask 916480  }
 0x2f1   :  { %8608 = vmatprep.subr.bf16.mxu0 %v11503_v43  ;;  %v2630_v4 = vpack.i.b16 %v2629_v20, %v2628_v33  ;;  %v1778_v16 = vrot.slane %v1770_v9, %v9450_v30  ;;  %v1802_v45 = vcombine.low %v1746_v58, %v1762_v55  ;;  %v10240_v48 = vrot.slane %v2011_v14, %v9438_v28 }
 0x2f2   :  { %v10118_v19 = vpop.permute.xlu1 %1672  ;;  %v10250_v26 = vrot.slane %v2027_v38, %v9438_v28  ;;  %v1803_v5 = vcombine.high %v1746_v58, %v1762_v55  ;;  %v11504_v59 = vcombine.high %v10176_v0, %v10158_v40 }
 0x2f3   :  { %v10122_v12 = vpop.permute.xlu0 %1670  ;;  %v1810_v33 = vrot.slane %v1802_v45, %v9450_v30 }
 0x2f4   :  { %v1843_v9 = vcombine.high %v10092_v24, %v10122_v12 }
 0x2f5   :  { %8593 = vmatmul.mubr.msk.bf16.vlgmr.msra.gmra.mxu1 %vm3351_vm2, %v2618_v8  ;;  %v2010_v8 = vcombine.low %v10018_v25, %v10062_v1  ;;  %v1771_v25 = vcombine.high %v10163_v50, %v10166_v54  ;;  %v1787_v1 = vcombine.high %v10173_v35, %v10195_v32 }
 0x2f6   :  { %8603 = vmatpush3.bf16.msra.mxu1 %v3968_v57  ;;  %v10128_v37 = vpop.permute.xlu1 %1678  ;;  %8604 = vmatprep.mubr.msk.bf16.mxu1 %vm9084_vm0, %v11503_v43  ;;  %v1857_v45 = vrot.slane %v1843_v9, %v9438_v28 }
 0x2f7   :  { %v10132_v60 = vpop.permute.xlu0 %1676  ;;  %8614 = vmatprep.subr.bf16.mxu1 %v11503_v43  ;;  %8599 = vmatmul.mubr.msk.bf16.vlgmr.msra.gmra.mxu0 %vm3351_vm2, %v2621_v31  ;;  %v1739_v31 = vcombine.high %v10032_v46, %v10066_v41  ;;  %v1786_v46 = vcombine.low %v10173_v35, %v10195_v32  ;;  %v1842_v41 = vcombine.low %v10092_v24, %v10122_v12 }
 0x2f8   :  { %8609 = vmatpush3.bf16.msra.mxu0 %v4015_v42  ;;  %8610 = vmatprep.mubr.msk.bf16.mxu0 %vm9084_vm0, %v11503_v43  ;;  %v1858_v49 = vcombine.low %v10109_v52, %v10132_v60  ;;  %v10233_v29 = vrot.slane %v2010_v8, %v9438_v28  ;;  %v10236_v42 = vrot.slane %v1755_v27, %v9438_v28 }
 0x2f9   :  { %8620 = vmatprep.subr.bf16.mxu0 %v11503_v43  ;;  %v10243_v56 = vrot.slane %v1739_v31, %v9438_v28  ;;  %v1850_v3 = vrot.slane %v1842_v41, %v9438_v28  ;;  %v1785_v14 = vrot.slane %v1771_v25, %v9450_v30  ;;  %v1817_v31 = vrot.slane %v1803_v5, %v9450_v30 }
 0x2fa   :  { %v10148_v15 = vpop.permute.xlu1 %1684  ;;  %v2074_v47 = vcombine.low %v10233_v29, %v10219_v10  ;;  %v1794_v41 = vrot.slane %v1786_v46, %v9450_v30  ;;  %v1834_v5 = vcombine.low %v1778_v16, %v1810_v33 }
 0x2fb   :  { %v10152_v61 = vpop.permute.xlu0 %1682  ;;  %v1818_v20 = vcombine.low %v10243_v56, %v10236_v42 }
 0x2fd   :  { %8605 = vmatmul.mubr.msk.bf16.vlgmr.msra.gmra.mxu1 %vm3351_vm2, %v2624_v53  ;;  %v1866_v53 = vrot.slane %v1858_v49, %v9438_v28 }
 0x2fe   :  { %8615 = vmatpush3.bf16.msra.mxu1 %v4062_v34  ;;  %v10180_v44 = vpop.permute.xlu1 %1690  ;;  %8616 = vmatprep.mubr.msk.bf16.mxu1 %vm9084_vm0, %v11503_v43  ;;  %v1859_v34 = vcombine.high %v10109_v52, %v10132_v60  ;;  %v1819_v60 = vcombine.high %v10243_v56, %v10236_v42 }
 0x2ff   :  { %v1689_v51 = vpop.permute.xlu0 %1688  ;;  %8626 = vmatprep.subr.bf16.mxu1 %v11503_v43  ;;  %8611 = vmatmul.mubr.msk.bf16.vlgmr.msra.gmra.mxu0 %vm3351_vm2, %v2627_v36  ;;  %v2075_v36 = vcombine.high %v10233_v29, %v10219_v10  ;;  %v1907_v24 = vcombine.high %v1850_v3, %v1866_v53 }
 0x300   :  { %8622 = vmatprep.mubr.msk.bf16.mxu0 %vm9084_vm0, %v11503_v43  ;;  %v1873_v49 = vrot.slane %v1859_v34, %v9438_v28 }
 0x301   :  { %v1921_v34 = vrot.slane %v1907_v24, %v9450_v30 }
 0x302   :  { %v10229_v39 = vpop.permute.xlu1 %1696  ;;  %v1923_v24 = vcombine.high %v1857_v45, %v1873_v49 }
 0x303   :  { %v1695_v63 = vpop.permute.xlu0 %1694 }
 0x304   :  { %v1874_v62 = vcombine.low %v10152_v61, %v1695_v63  ;;  %v1875_v50 = vcombine.high %v10152_v61, %v1695_v63  ;;  %v1906_v61 = vcombine.low %v1850_v3, %v1866_v53  ;;  %v2146_v53 = vcombine.low %v10148_v15, %v10229_v39 }
 0x305   :  { %8617 = vmatmul.mubr.msk.bf16.vlgmr.msra.gmra.mxu1 %vm3351_vm2, %v2630_v4  ;;  %v1835_v4 = vcombine.high %v1778_v16, %v1810_v33  ;;  %v1837_v33 = vcombine.high %v1785_v14, %v1817_v31 }
 0x306   :  { %8628 = vmatprep.mubr.msk.bf16.mxu1 %vm9084_vm0, %v11503_v43  ;;  %v1882_v8 = vrot.slane %v1874_v62, %v9438_v28  ;;  %v1703_v27 = vpop.permute.xlu1 %1702  ;;  %v1914_v42 = vrot.slane %v1906_v61, %v9450_v30  ;;  %v2130_v62 = vcombine.low %v10104_v2, %v10128_v37  ;;  %v2154_v16 = vrot.slane %v2146_v53, %v9438_v28 }
 0x307   :  { %v1701_v54 = vpop.permute.xlu0 %1700  ;;  %v2162_v38 = vcombine.low %v10180_v44, %v1703_v27 }
 0x308   :  { %v1890_v22 = vcombine.low %v1689_v51, %v1701_v54  ;;  %v1891_v11 = vcombine.high %v1689_v51, %v1701_v54  ;;  %v1889_v51 = vrot.slane %v1875_v50, %v9438_v28  ;;  %v1826_v50 = vrot.slane %v1818_v20, %v9450_v30 }
 0x309   :  { %v1922_v54 = vcombine.low %v1857_v45, %v1873_v49  ;;  %v1836_v20 = vcombine.low %v1785_v14, %v1817_v31  ;;  %v2115_v14 = vcombine.high %v10086_v13, %v10118_v19  ;;  %v2131_v31 = vcombine.high %v10104_v2, %v10128_v37 }
 0x30a   :  { %v1898_v55 = vrot.slane %v1890_v22, %v9438_v28  ;;  %v1905_v52 = vrot.slane %v1891_v11, %v9438_v28  ;;  %v2114_v22 = vcombine.low %v10086_v13, %v10118_v19  ;;  %v2170_v11 = vrot.slane %v2162_v38, %v9438_v28 }
 0x30b   :  { %v1839_v57 = vcombine.high %v1794_v41, %v1826_v50  ;;  %v2147_v49 = vcombine.high %v10148_v15, %v10229_v39  ;;  %v1833_v45 = vrot.slane %v1819_v60, %v9450_v30  ;;  %v1801_v13 = vrot.slane %v1787_v1, %v9450_v30 }
 0x30c   :  { %v1938_v12 = vcombine.low %v1882_v8, %v1898_v55  ;;  %v1939_v58 = vcombine.high %v1882_v8, %v1898_v55  ;;  %v1954_v63 = vcombine.low %v1889_v51, %v1905_v52  ;;  %v1955_v9 = vcombine.high %v1889_v51, %v1905_v52 }
 0x30d   :  { %v2122_v52 = vrot.slane %v2114_v22, %v9438_v28  ;;  %v2163_v51 = vcombine.high %v10180_v44, %v1703_v27  ;;  %v2210_v38 = vcombine.low %v2154_v16, %v2170_v11  ;;  %v1838_v44 = vcombine.low %v1794_v41, %v1826_v50 }
 0x30e   :  { %v1946_v56 = vrot.slane %v1938_v12, %v9450_v30  ;;  %v1953_v25 = vrot.slane %v1939_v58, %v9450_v30  ;;  %v1962_v61 = vrot.slane %v1954_v63, %v9450_v30  ;;  %v1969_v63 = vrot.slane %v1955_v9, %v9450_v30 }
 0x30f   :  { %v1937_v27 = vrot.slane %v1923_v24, %v9450_v30  ;;  %v2145_v39 = vrot.slane %v2131_v31, %v9438_v28  ;;  %v2161_v60 = vrot.slane %v2147_v49, %v9438_v28  ;;  %v1841_v41 = vcombine.high %v1801_v13, %v1833_v45 }
 0x310   :  { %v1971_v3 = vcombine.high %v1914_v42, %v1946_v56  ;;  %v1970_v46 = vcombine.low %v1914_v42, %v1946_v56  ;;  %v1973_v12 = vcombine.high %v1921_v34, %v1953_v25  ;;  %v1972_v58 = vcombine.low %v1921_v34, %v1953_v25 }
 0x311   :  { %v2138_v42 = vrot.slane %v2130_v62, %v9438_v28  ;;  %v1930_v56 = vrot.slane %v1922_v54, %v9450_v30  ;;  %v2177_v54 = vrot.slane %v2163_v51, %v9438_v28  ;;  %v1977_v37 = vcombine.high %v1937_v27, %v1969_v63 }
 0x312   :  { %v2251_v8 = vpack.c.bf16 %v1971_v3, %v1835_v4  ;;  %v2250_v55 = vpack.c.bf16 %v1970_v46, %v1834_v5  ;;  %v2253_v4 = vpack.c.bf16 %v1973_v12, %v1837_v33  ;;  %v2252_v25 = vpack.c.bf16 %v1972_v58, %v1836_v20 }
 0x313   :  { %v1975_v53 = vcombine.high %v1930_v56, %v1962_v61  ;;  %v1974_v5 = vcombine.low %v1930_v56, %v1962_v61  ;;  %v2178_v62 = vcombine.low %v2122_v52, %v2138_v42  ;;  %v2211_v3 = vcombine.high %v2154_v16, %v2170_v11 }
 0x314   :  { %4490 = vxpose.xlu0.c.b16.start.end [1/1] (short) (narrow) %v2251_v8, 16  ;;  %4474 = vxpose.xlu1.c.b16.start.end [1/1] (short) (narrow) %v2250_v55, 16  ;;  %v2218_v46 = vrot.slane %v2210_v38, %v9450_v30  ;;  %v1976_v15 = vcombine.low %v1937_v27, %v1969_v63  ;;  %v2082_v50 = vrot.slane %v2074_v47, %v9450_v30 }
 0x315   :  { %v2255_v2 = vpack.c.bf16 %v1975_v53, %v1839_v57  ;;  %v2254_v19 = vpack.c.bf16 %v1974_v5, %v1838_v44  ;;  %v2179_v34 = vcombine.high %v2122_v52, %v2138_v42  ;;  %v2186_v22 = vrot.slane %v2178_v62, %v9450_v30 }
 0x316   :  { %v1840_v35 = vcombine.low %v1801_v13, %v1833_v45  ;;  %v2129_v32 = vrot.slane %v2115_v14, %v9438_v28  ;;  %v2225_v57 = vrot.slane %v2211_v3, %v9450_v30  ;;  %v2226_v1 = vcombine.low %v2161_v60, %v2177_v54 }
 0x317   :  { %v2050_v11 = vrot.slane %v2042_v17, %v9450_v30  ;;  %v2257_v9 = vpack.c.bf16 %v1977_v37, %v1841_v41  ;;  %v2243_v8 = vcombine.high %v2186_v22, %v2218_v46  ;;  %v2242_v47 = vcombine.low %v2186_v22, %v2218_v46 }
 0x318   :  { %4522 = vxpose.xlu0.c.b16.start.end [1/1] (short) (narrow) %v2253_v4, 16  ;;  %4506 = vxpose.xlu1.c.b16.start.end [1/1] (short) (narrow) %v2252_v25, 16  ;;  %v2256_v61 = vpack.c.bf16 %v1976_v15, %v1840_v35  ;;  %v1993_v55 = vrot.slane %v1979_v18, %v9438_v28  ;;  %v2090_v12 = vcombine.low %v10240_v48, %v10250_v26 }
 0x319   :  { %v2194_v58 = vcombine.low %v2129_v32, %v2145_v39  ;;  %v2107_v16 = vcombine.high %v2050_v11, %v2082_v50  ;;  %v2193_v33 = vrot.slane %v2179_v34, %v9450_v30  ;;  %v2106_v20 = vcombine.low %v2050_v11, %v2082_v50 }
 0x31a   :  { %v2089_v17 = vrot.slane %v2075_v36, %v9450_v30  ;;  %v2058_v42 = vcombine.low %v1993_v55, %v10190_v7  ;;  %v2227_v24 = vcombine.high %v2161_v60, %v2177_v54  ;;  %v2234_v23 = vrot.slane %v2226_v1, %v9450_v30 }
 0x31b   :  { %v2057_v18 = vrot.slane %v11504_v59, %v9450_v30  ;;  %v2259_v56 = vpack.c.bf16 %v2243_v8, %v2107_v16  ;;  %v2258_v52 = vpack.c.bf16 %v2242_v47, %v2106_v20  ;;  %v2245_v51 = vcombine.high %v2193_v33, %v2225_v57 }
 0x31c   :  { %4554 = vxpose.xlu0.c.b16.start.end [1/1] (short) (narrow) %v2255_v2, 16  ;;  %4538 = vxpose.xlu1.c.b16.start.end [1/1] (short) (narrow) %v2254_v19, 16  ;;  %v2244_v38 = vcombine.low %v2193_v33, %v2225_v57  ;;  %v2091_v63 = vcombine.high %v10240_v48, %v10250_v26  ;;  %v2195_v4 = vcombine.high %v2129_v32, %v2145_v39 }
 0x31d   :  { %v2202_v10 = vrot.slane %v2194_v58, %v9450_v30  ;;  %v2109_v29 = vcombine.high %v2057_v18, %v2089_v17  ;;  %v2108_v36 = vcombine.low %v2057_v18, %v2089_v17  ;;  %v2098_v25 = vrot.slane %v2090_v12, %v9450_v30 }
 0x31e   :  { %v2059_v53 = vcombine.high %v1993_v55, %v10190_v7  ;;  %v2241_v40 = vrot.slane %v2227_v24, %v9450_v30  ;;  %v2066_v0 = vrot.slane %v2058_v42, %v9450_v30  ;;  %v2209_v48 = vrot.slane %v2195_v4, %v9450_v30 }
 0x31f   :  { %v2261_v5 = vpack.c.bf16 %v2245_v51, %v2109_v29  ;;  %v2260_v14 = vpack.c.bf16 %v2244_v38, %v2108_v36  ;;  %v2247_v31 = vcombine.high %v2202_v10, %v2234_v23  ;;  %v2246_v49 = vcombine.low %v2202_v10, %v2234_v23 }
 0x320   :  { %4586 = vxpose.xlu0.c.b16.start.end [1/1] (short) (narrow) %v2257_v9, 16  ;;  %4570 = vxpose.xlu1.c.b16.start.end [1/1] (short) (narrow) %v2256_v61, 16  ;;  %v2111_v26 = vcombine.high %v2066_v0, %v2098_v25  ;;  %v2110_v45 = vcombine.low %v2066_v0, %v2098_v25  ;;  %v2105_v62 = vrot.slane %v2091_v63, %v9450_v30 }
 0x321   :  { %v2073_v44 = vrot.slane %v2059_v53, %v9450_v30  ;;  %v2249_v54 = vcombine.high %v2209_v48, %v2241_v40  ;;  %v2248_v3 = vcombine.low %v2209_v48, %v2241_v40 }
 0x322   :  { %v2263_v27 = vpack.c.bf16 %v2247_v31, %v2111_v26  ;;  %v2262_v7 = vpack.c.bf16 %v2246_v49, %v2110_v45 }
 0x323   :  { %v2113_v46 = vcombine.high %v2073_v44, %v2105_v62  ;;  %v2112_v13 = vcombine.low %v2073_v44, %v2105_v62 }
 0x324   :  { %4618 = vxpose.xlu0.c.b16.start.end [1/1] (short) (narrow) %v2259_v56, 16  ;;  %4602 = vxpose.xlu1.c.b16.start.end [1/1] (short) (narrow) %v2258_v52, 16 }
 0x325   :  { %v2265_v2 = vpack.c.bf16 %v2249_v54, %v2113_v46  ;;  %v2264_v19 = vpack.c.bf16 %v2248_v3, %v2112_v13 }
 0x328   :  { %4650 = vxpose.xlu0.c.b16.start.end [1/1] (short) (narrow) %v2261_v5, 16  ;;  %4634 = vxpose.xlu1.c.b16.start.end [1/1] (short) (narrow) %v2260_v14, 16 }
 0x32c   :  { %4682 = vxpose.xlu0.c.b16.start.end [1/1] (short) (narrow) %v2263_v27, 16  ;;  %4666 = vxpose.xlu1.c.b16.start.end [1/1] (short) (narrow) %v2262_v7, 16 }
 0x330   :  { %4714 = vxpose.xlu0.c.b16.start.end [1/1] (short) (narrow) %v2265_v2, 16  ;;  %4698 = vxpose.xlu1.c.b16.start.end [1/1] (short) (narrow) %v2264_v19, 16 }
 0x376   :  { %v4498_v37 = vpop.trf.xlu0  ;;  %v4482_v15 = vpop.trf.xlu1 }
 0x37a   :  { %v4530_v39 = vpop.trf.xlu0  ;;  %v4514_v60 = vpop.trf.xlu1 }
 0x37d   :  { %v10350_v41 = vpop.f32.mrf.mxu1  ;;  %v10352_v50 = vpop.f32.mrf.mxu0 }
 0x37e   :  { %v4562_v34 = vpop.trf.xlu0  ;;  %v4546_v22 = vpop.trf.xlu1 }
 0x37f   :  { %v8528_v35 = vpop.f32.mrf.mxu1  ;;  %v8552_v32 = vpop.f32.mrf.mxu0  ;;  %v4798_v51 = vcombine.low %v4498_v37, %v4562_v34  ;;  %v4730_v38 = vcombine.low %v4482_v15, %v4546_v22 }
 0x381   :  { %v10354_v57 = vpop.f32.mrf.mxu1  ;;  %v10356_v1 = vpop.f32.mrf.mxu0  ;;  %v4805_v0 = vrot.slane %v4798_v51, %v9438_v28  ;;  %v4737_v5 = vrot.slane %v4730_v38, %v9438_v28 }
 0x382   :  { %v4594_v11 = vpop.trf.xlu0  ;;  %v4578_v9 = vpop.trf.xlu1 }
 0x383   :  { %v8529_v61 = vpop.f32.mrf.mxu1  ;;  %v8553_v8 = vpop.f32.mrf.mxu0  ;;  %v4806_v18 = vcombine.low %v4530_v39, %v4594_v11  ;;  %v4738_v56 = vcombine.low %v4514_v60, %v4578_v9 }
 0x385   :  { %v10358_v47 = vpop.f32.mrf.mxu1  ;;  %v10360_v55 = vpop.f32.mrf.mxu0  ;;  %v4813_v29 = vrot.slane %v4806_v18, %v9438_v28  ;;  %v4745_v36 = vrot.slane %v4738_v56, %v9438_v28 }
 0x386   :  { %v4626_v12 = vpop.trf.xlu0  ;;  %v4610_v58 = vpop.trf.xlu1 }
 0x387   :  { %v8534_v16 = vpop.f32.mrf.mxu1  ;;  %v8564_v33 = vpop.f32.mrf.mxu0  ;;  %v4830_v45 = vcombine.low %v4805_v0, %v4813_v29  ;;  %v4831_v62 = vcombine.high %v4805_v0, %v4813_v29  ;;  %v4762_v44 = vcombine.low %v4737_v5, %v4745_v36  ;;  %v4763_v27 = vcombine.high %v4737_v5, %v4745_v36 }
 0x388   :  { %v11505_v0 = vlaneseq }
 0x389   :  { %v10362_v20 = vpop.f32.mrf.mxu1  ;;  %v10364_v17 = vpop.f32.mrf.mxu0  ;;  %v4838_v60 = vrot.slane %v4830_v45, %v9450_v30  ;;  %v4845_v34 = vrot.slane %v4831_v62, %v9450_v30  ;;  %v4770_v22 = vrot.slane %v4762_v44, %v9450_v30  ;;  %v4777_v35 = vrot.slane %v4763_v27, %v9450_v30 }
 0x38a   :  { %v4658_v42 = vpop.trf.xlu0  ;;  %v4642_v24 = vpop.trf.xlu1  ;;  %v2294_v5 = vand.u32 127, %v11505_v0  ;;  %v2268_v27 = vadd.s32 8, %v9226_v21 }
 0x38b   :  { %v8535_v23 = vpop.f32.mrf.mxu1  ;;  %v8565_v59 = vpop.f32.mrf.mxu0 }
 0x38d   :  { %v10366_v52 = vpop.f32.mrf.mxu1 }
 0x38e   :  { %v4690_v63 = vpop.trf.xlu0  ;;  %v4674_v4 = vpop.trf.xlu1 }
 0x38f   :  { %v8540_v10 = vpop.f32.mrf.mxu1  ;;  %v4814_v25 = vcombine.low %v4626_v12, %v4690_v63  ;;  %v4746_v53 = vcombine.low %v4610_v58, %v4674_v4 }
 0x391   :  { %v10370_v40 = vpop.f32.mrf.mxu1  ;;  %v4821_v7 = vrot.slane %v4814_v25, %v9438_v28  ;;  %v4753_v54 = vrot.slane %v4746_v53, %v9438_v28 }
 0x392   :  { %v4722_v14 = vpop.trf.xlu0  ;;  %v4706_v31 = vpop.trf.xlu1 }
 0x393   :  { %v4822_v49 = vcombine.low %v4658_v42, %v4722_v14  ;;  %v4754_v48 = vcombine.low %v4642_v24, %v4706_v31  ;;  %v8541_v26 = vpop.f32.mrf.mxu1 }
 0x395   :  { %v4829_v3 = vrot.slane %v4822_v49, %v9438_v28  ;;  %v4761_v46 = vrot.slane %v4754_v48, %v9438_v28  ;;  %v10378_v13 = vpop.f32.mrf.mxu1 }
 0x397   :  { %v4846_v2 = vcombine.low %v4821_v7, %v4829_v3  ;;  %v4847_v19 = vcombine.high %v4821_v7, %v4829_v3  ;;  %v4778_v37 = vcombine.low %v4753_v54, %v4761_v46  ;;  %v4779_v15 = vcombine.high %v4753_v54, %v4761_v46  ;;  %v8546_v39 = vpop.f32.mrf.mxu1 }
 0x398   :  { %v2273_v7 = vand.u32 1, %v9226_v21  ;;  %v2299_v54 = vand.u32 1, %v2294_v5 }
 0x399   :  { %v4854_v32 = vrot.slane %v4846_v2, %v9450_v30  ;;  %v4861_v11 = vrot.slane %v4847_v19, %v9450_v30  ;;  %v4786_v9 = vrot.slane %v4778_v37, %v9450_v30  ;;  %v4793_v61 = vrot.slane %v4779_v15, %v9450_v30  ;;  %v10388_v8 = vpop.f32.mrf.mxu1 }
 0x39a   :  { %v2280_v37 = vand.u32 1, %v2268_v27  ;;  %vm2307_vm3 = vcmp.eq.s32.totalorder %v2273_v7, %v2299_v54 }
 0x39b   :  { %v10390_v12 = vcombine.high %v4845_v34, %v4861_v11  ;;  %v10392_v58 = vcombine.high %v4777_v35, %v4793_v61  ;;  %v8547_v16 = vpop.f32.mrf.mxu1  ;;  %v4794_v33 = vcombine.low %v4770_v22, %v4786_v9  ;;  %v4862_v42 = vcombine.low %v4838_v60, %v4854_v32 }
 0x39c   :  { %v4795_v24 = vcombine.high %v4770_v22, %v4786_v9  ;;  %v4863_v23 = vcombine.high %v4838_v60, %v4854_v32  ;;  %v4796_v38 = vcombine.low %v4777_v35, %v4793_v61  ;;  %v4864_v36 = vcombine.low %v4845_v34, %v4861_v11 }
 0x39d   :  { %v10394_v59 = vpop.f32.mrf.mxu1  ;;  %v4868_v18 = vpack.i.b16 %v4862_v42, %v4794_v33  ;;  %v4870_v56 = vshrl.u32 %v4794_v33, 16  ;;  %v4871_v51 = vshrl.u32 %v4862_v42, 16  ;;  %v4892_v25 = vpack.i.b16 %v10390_v12, %v10392_v58 }
 0x39e   :  { %v4878_v10 = vshrl.u32 %v4795_v24, 16  ;;  %v4879_v29 = vshrl.u32 %v4863_v23, 16  ;;  %v4894_v53 = vshrl.u32 %v10392_v58, 16  ;;  %v4876_v31 = vpack.i.b16 %v4863_v23, %v4795_v24 }
 0x39f   :  { %v8558_v63 = vpop.f32.mrf.mxu1  ;;  %4898 = vxpose.xlu1.c.b16.start.end [1/1] (short) (narrow) %v4868_v18, 16  ;;  %v4872_v4 = vpack.i.b16 %v4871_v51, %v4870_v56  ;;  %v4895_v49 = vshrl.u32 %v10390_v12, 16  ;;  %v4886_v45 = vshrl.u32 %v4796_v38, 16  ;;  %v4887_v62 = vshrl.u32 %v4864_v36, 16 }
 0x3a0   :  { %v4880_v26 = vpack.i.b16 %v4879_v29, %v4878_v10  ;;  %v4884_v46 = vpack.i.b16 %v4864_v36, %v4796_v38  ;;  %v9094_v22 = vmov -1e+30   ;;  %vm2308_vm4 = vcmp.eq.s32.totalorder %v2280_v37, %v2299_v54 }
 0x3a1   :  { %v10400_v14 = vpop.f32.mrf.mxu1  ;;  %4914 = vxpose.xlu0.c.b16.start.end [1/1] (short) (narrow) %v4872_v4, 16  ;;  %v10403_v44 = vpack.i.b16 %v4895_v49, %v4894_v53  ;;  %v4888_v19 = vpack.i.b16 %v4887_v62, %v4886_v45  ;;  %v10411_v35 = vsel %vm2307_vm3, 0.0, %v9094_v22  ;;  %v10421_v33 = vsel %vm2308_vm4, 0.0, %v9094_v22 }
 0x3a2   :  { %v10419_v9 = vadd.f32 %v10352_v50, %v10411_v35  ;;  %v10425_v42 = vadd.f32 %v10350_v41, %v10411_v35  ;;  %v10431_v18 = vadd.f32 %v10354_v57, %v10421_v33  ;;  %v10437_v38 = vadd.f32 %v10356_v1, %v10421_v33 }
 0x3a3   :  { %v8559_v48 = vpop.f32.mrf.mxu1  ;;  %4930 = vxpose.xlu1.c.b16.start.end [1/1] (short) (narrow) %v4876_v31, 16  ;;  %v10447_v57 = vadd.f32 %v10364_v17, %v10421_v33  ;;  %v10453_v1 = vadd.f32 %v10358_v47, %v10411_v35  ;;  %v10461_v17 = vadd.f32 %v10366_v52, %v10411_v35  ;;  %v10467_v47 = vadd.f32 %v10360_v55, %v10411_v35 }
 0x3a4   :  { %v4130_v50 = vsel %vm4105_vm5, %v10419_v9, -inf  ;;  %v4106_v4 = vsel %vm4105_vm5, %v10425_v42, -inf  ;;  %v4109_v36 = vsel %vm4105_vm5, %v10431_v18, -inf  ;;  %v4133_v5 = vsel %vm4105_vm5, %v10437_v38, -inf }
 0x3a5   :  { %v10407_v3 = vpop.f32.mrf.mxu1  ;;  %4946 = vxpose.xlu0.c.b16.start.end [1/1] (short) (narrow) %v4880_v26, 16  ;;  %v4145_v48 = vsel %vm4105_vm5, %v10447_v57, -inf  ;;  %v4112_v62 = vsel %vm4105_vm5, %v10453_v1, -inf  ;;  %v4118_v54 = vsel %vm4105_vm5, %v10461_v17, -inf  ;;  %v10480_v55 = vadd.f32 %v10362_v20, %v10421_v33 }
 0x3a6   :  { %v10488_v37 = vadd.f32 %v10378_v13, %v10411_v35  ;;  %v10494_v20 = vadd.f32 %v10370_v40, %v10421_v33 }
 0x3a7   :  { %v8570_v2 = vpop.f32.mrf.mxu1  ;;  %4962 = vxpose.xlu1.c.b16.start.end [1/1] (short) (narrow) %v4884_v46, 16  ;;  %v3769_v15 = vpop.f32.mrf.mxu0 }
 0x3a8   :  { %v10474_v52 = vadd.f32 %v3769_v15, %v10411_v35 }
 0x3a9   :  { %v10409_v39 = vpop.f32.mrf.mxu1  ;;  %4978 = vxpose.xlu0.c.b16.start.end [1/1] (short) (narrow) %v4888_v19, 16  ;;  %v8576_v60 = vpop.f32.mrf.mxu0  ;;  %v4142_v19 = vsel %vm4105_vm5, %v10467_v47, -inf }
 0x3ab   :  { %v8571_v34 = vpop.f32.mrf.mxu1  ;;  %v10413_v32 = vpop.f32.mrf.mxu0 }
 0x3ac   :  { %v4154_v34 = vsel %vm4105_vm5, %v10474_v52, -inf }
 0x3ad   :  { %v10415_v11 = vpop.f32.mrf.mxu1  ;;  %v8577_v61 = vpop.f32.mrf.mxu0 }
 0x3af   :  { %v8582_v16 = vpop.f32.mrf.mxu1  ;;  %v3863_v24 = vpop.f32.mrf.mxu0 }
 0x3b0   :  { %v4115_v16 = vsel %vm4105_vm5, %v10480_v55, -inf }
 0x3b1   :  { %v10427_v23 = vpop.f32.mrf.mxu1  ;;  %v8588_v56 = vpop.f32.mrf.mxu0 }
 0x3b2   :  { %v10499_v56 = vadd.f32 %v3863_v24, %v10411_v35 }
 0x3b3   :  { %v8583_v51 = vpop.f32.mrf.mxu1  ;;  %v10439_v63 = vpop.f32.mrf.mxu0 }
 0x3b4   :  { %4131 = vmax.xlane.f32.xlu1 %v4130_v50  ;;  %v4124_v50 = vsel %vm4105_vm5, %v10488_v37, -inf }
 0x3b5   :  { %v10441_v41 = vpop.f32.mrf.mxu1  ;;  %v8589_v10 = vpop.f32.mrf.mxu0 }
 0x3b6   :  { %4107 = vmax.xlane.f32.xlu0 %v4106_v4  ;;  %v10505_v4 = vadd.f32 %v10413_v32, %v10421_v33  ;;  %v4121_v10 = vsel %vm4105_vm5, %v10494_v20, -inf }
 0x3b7   :  { %v8594_v29 = vpop.f32.mrf.mxu1  ;;  %v3957_v53 = vpop.f32.mrf.mxu0 }
 0x3b8   :  { %4110 = vmax.xlane.f32.xlu1 %v4109_v36  ;;  %v10511_v29 = vadd.f32 %v10394_v59, %v10411_v35  ;;  %v4166_v36 = vsel %vm4105_vm5, %v10499_v56, -inf  ;;  %v4157_v32 = vsel %vm4105_vm5, %v10505_v4, -inf }
 0x3b9   :  { %v10455_v0 = vpop.f32.mrf.mxu1  ;;  %v8600_v31 = vpop.f32.mrf.mxu0 }
 0x3ba   :  { %4134 = vmax.xlane.f32.xlu0 %v4133_v5  ;;  %v10517_v5 = vadd.f32 %v10388_v8, %v10421_v33  ;;  %v10522_v31 = vadd.f32 %v3957_v53, %v10411_v35  ;;  %v4136_v59 = vsel %vm4105_vm5, %v10511_v29, -inf  ;;  %v10539_v53 = vadd.f32 %v10400_v14, %v10421_v33 }
 0x3bb   :  { %v8595_v49 = vpop.f32.mrf.mxu1  ;;  %v3960_v26 = vpop.f32.mrf.mxu0  ;;  %v10556_v14 = vadd.f32 %v10441_v41, %v10411_v35 }
 0x3bc   :  { %4146 = vmax.xlane.f32.xlu1 %v4145_v48  ;;  %v10528_v49 = vadd.f32 %v10439_v63, %v10421_v33  ;;  %v4127_v48 = vsel %vm4105_vm5, %v10517_v5, -inf  ;;  %v10545_v63 = vadd.f32 %v10415_v11, %v10411_v35  ;;  %v10562_v11 = vadd.f32 %v10407_v3, %v10411_v35 }
 0x3bd   :  { %v10469_v45 = vpop.f32.mrf.mxu1  ;;  %v8601_v27 = vpop.f32.mrf.mxu0  ;;  %v4172_v41 = vsel %vm4105_vm5, %v10556_v14, -inf }
 0x3be   :  { %4113 = vmax.xlane.f32.xlu0 %v4112_v62  ;;  %v4178_v62 = vsel %vm4105_vm5, %v10522_v31, -inf  ;;  %v4169_v27 = vsel %vm4105_vm5, %v10528_v49, -inf  ;;  %v4148_v3 = vsel %vm4105_vm5, %v10562_v11, -inf }
 0x3bf   :  { %v8606_v7 = vpop.f32.mrf.mxu1  ;;  %v4051_v46 = vpop.f32.mrf.mxu0 }
 0x3c0   :  { %4119 = vmax.xlane.f32.xlu1 %v4118_v54  ;;  %v10533_v8 = vadd.f32 %v4051_v46, %v10411_v35  ;;  %v10550_v54 = vadd.f32 %v3960_v26, %v10421_v33  ;;  %v4139_v46 = vsel %vm4105_vm5, %v10539_v53, -inf }
 0x3c1   :  { %v10482_v2 = vpop.f32.mrf.mxu1  ;;  %v8612_v15 = vpop.f32.mrf.mxu0 }
 0x3c2   :  { %4143 = vmax.xlane.f32.xlu0 %v4142_v19  ;;  %v4190_v7 = vsel %vm4105_vm5, %v10533_v8, -inf  ;;  %v4160_v19 = vsel %vm4105_vm5, %v10545_v63, -inf  ;;  %v4181_v26 = vsel %vm4105_vm5, %v10550_v54, -inf  ;;  %v10568_v15 = vadd.f32 %v10469_v45, %v10411_v35 }
 0x3c3   :  { %v8607_v60 = vpop.f32.mrf.mxu1  ;;  %v4054_v22 = vpop.f32.mrf.mxu0 }
 0x3c4   :  { %4155 = vmax.xlane.f32.xlu1 %v4154_v34  ;;  %v10574_v60 = vadd.f32 %v10409_v39, %v10421_v33  ;;  %v10584_v45 = vadd.f32 %v4054_v22, %v10421_v33  ;;  %v10598_v22 = vadd.f32 %v10455_v0, %v10421_v33 }
 0x3c5   :  { %v4098_v61 = vpop.f32.mrf.mxu1  ;;  %v8613_v13 = vpop.f32.mrf.mxu0 }
 0x3c6   :  { %4116 = vmax.xlane.f32.xlu0 %v4115_v16  ;;  %v10579_v34 = vadd.f32 %v4098_v61, %v10411_v35  ;;  %v4184_v16 = vsel %vm4105_vm5, %v10568_v15, -inf  ;;  %v4151_v13 = vsel %vm4105_vm5, %v10574_v60, -inf  ;;  %v4193_v35 = vsel %vm4105_vm5, %v10584_v45, -inf }
 0x3c7   :  { %v8618_v51 = vpop.f32.mrf.mxu1 }
 0x3c8   :  { %4125 = vmax.xlane.f32.xlu1 %v4124_v50  ;;  %v4196_v39 = vsel %vm4105_vm5, %v10579_v34, -inf  ;;  %v10592_v51 = vadd.f32 %v10427_v23, %v10421_v33  ;;  %v10604_v50 = vadd.f32 %v10482_v2, %v10421_v33  ;;  %v4175_v23 = vsel %vm4105_vm5, %v10598_v22, -inf }
 0x3c9   :  { %v4101_v40 = vpop.f32.mrf.mxu1 }
 0x3ca   :  { %4122 = vmax.xlane.f32.xlu0 %v4121_v10  ;;  %v4163_v61 = vsel %vm4105_vm5, %v10592_v51, -inf  ;;  %v10609_v10 = vadd.f32 %v4101_v40, %v10421_v33 }
 0x3cb   :  { %v8619_v24 = vpop.f32.mrf.mxu1 }
 0x3cc   :  { %4167 = vmax.xlane.f32.xlu1 %v4166_v36  ;;  %v4187_v24 = vsel %vm4105_vm5, %v10604_v50, -inf  ;;  %v4199_v0 = vsel %vm4105_vm5, %v10609_v10, -inf }
 0x3ce   :  { %4158 = vmax.xlane.f32.xlu0 %v4157_v32 }
 0x3d0   :  { %4137 = vmax.xlane.f32.xlu1 %v4136_v59 }
 0x3d2   :  { %4128 = vmax.xlane.f32.xlu0 %v4127_v48 }
 0x3d4   :  { %4179 = vmax.xlane.f32.xlu1 %v4178_v62 }
 0x3d6   :  { %4170 = vmax.xlane.f32.xlu0 %v4169_v27 }
 0x3d8   :  { %4191 = vmax.xlane.f32.xlu1 %v4190_v7 }
 0x3da   :  { %4140 = vmax.xlane.f32.xlu0 %v4139_v46 }
 0x3dc   :  { %4161 = vmax.xlane.f32.xlu1 %v4160_v19 }
 0x3de   :  { %4182 = vmax.xlane.f32.xlu0 %v4181_v26 }
 0x3e0   :  { %4173 = vmax.xlane.f32.xlu1 %v4172_v41 }
 0x3e2   :  { %4149 = vmax.xlane.f32.xlu0 %v4148_v3 }
 0x3e4   :  { %4185 = vmax.xlane.f32.xlu1 %v4184_v16 }
 0x3e6   :  { %4152 = vmax.xlane.f32.xlu0 %v4151_v13 }
 0x3e8   :  { %4197 = vmax.xlane.f32.xlu1 %v4196_v39 }
 0x3ea   :  { %4194 = vmax.xlane.f32.xlu0 %v4193_v35 }
 0x3ee   :  { %4164 = vmax.xlane.f32.xlu0 %v4163_v61 }
 0x3f2   :  { %4176 = vmax.xlane.f32.xlu0 %v4175_v23 }
 0x3f6   :  { %4188 = vmax.xlane.f32.xlu0 %v4187_v24 }
 0x3fa   :  { %4200 = vmax.xlane.f32.xlu0 %v4199_v0 }
 0x401   :  { %v10619_v2 = vpop.trf.xlu1 }
 0x403   :  { %v10621_v36 = vpop.trf.xlu0 }
 0x405   :  { %v10623_v33 = vpop.trf.xlu1 }
 0x407   :  { %v10625_v40 = vpop.trf.xlu0 }
 0x409   :  { %v10627_v32 = vpop.trf.xlu1 }
 0x40b   :  { %v10629_v59 = vpop.trf.xlu0 }
 0x415   :  { %4994 = vxpose.xlu1.c.b16.start.end [1/1] (short) (narrow) %v4892_v25, 16 }
 0x427   :  { %5010 = vxpose.xlu0.c.b16.start.end [1/1] (short) (narrow) %v10403_v44, 16 }
 0x43d   :  { %v4132_v48 = vpop.xlane.xlu1 %4131 }
 0x43f   :  { %v4108_v62 = vpop.xlane.xlu0 %4107 }
 0x440   :  { %v4202_v27 = vsub.f32 %v10425_v42, %v4108_v62 }
 0x441   :  { %v4111_v12 = vpop.xlane.xlu1 %4110 }
 0x442   :  { %v4234_v58 = vmul.f32 1.442695, %v4202_v27  ;;  %v4203_v25 = vsub.f32 %v10431_v18, %v4111_v12  ;;  %v4210_v18 = vsub.f32 %v10419_v9, %v4132_v48 }
 0x443   :  { %v4135_v44 = vpop.xlane.xlu0 %4134 }
 0x444   :  { %8914 = vpow2.f32 %v4234_v58  ;;  %v4236_v7 = vmul.f32 1.442695, %v4203_v25  ;;  %v4250_v27 = vmul.f32 1.442695, %v4210_v18 }
 0x445   :  { %v10633_v46 = vpop.xlane.xlu1 %4146 }
 0x446   :  { %8916 = vpow2.f32 %v4236_v7 }
 0x447   :  { %v4114_v19 = vpop.xlane.xlu0 %4113 }
 0x448   :  { %v4204_v26 = vsub.f32 %v10453_v1, %v4114_v19 }
 0x449   :  { %v4120_v41 = vpop.xlane.xlu1 %4119 }
 0x44a   :  { %v4238_v3 = vmul.f32 1.442695, %v4204_v26  ;;  %v4206_v16 = vsub.f32 %v10461_v17, %v4120_v41  ;;  %v4211_v41 = vsub.f32 %v10437_v38, %v4135_v44 }
 0x44b   :  { %v4144_v13 = vpop.xlane.xlu0 %4143 }
 0x44c   :  { %8918 = vpow2.f32 %v4238_v3  ;;  %v4242_v42 = vmul.f32 1.442695, %v4206_v16  ;;  %v4214_v25 = vsub.f32 %v10467_v47, %v4144_v13  ;;  %v4252_v13 = vmul.f32 1.442695, %v4211_v41 }
 0x44d   :  { %v10637_v39 = vpop.xlane.xlu1 %4155 }
 0x44e   :  { %8920 = vpow2.f32 %v4242_v42  ;;  %v4258_v42 = vmul.f32 1.442695, %v4214_v25 }
 0x44f   :  { %v4117_v35 = vpop.xlane.xlu0 %4116 }
 0x450   :  { %v4205_v61 = vsub.f32 %v10480_v55, %v4117_v35 }
 0x451   :  { %v10641_v23 = vpop.eup %8914  ;;  %v4126_v24 = vpop.xlane.xlu1 %4125 }
 0x452   :  { %v4240_v0 = vmul.f32 1.442695, %v4205_v61  ;;  %v4208_v1 = vsub.f32 %v10488_v37, %v4126_v24  ;;  %v4298_v17 = vsel %vm4105_vm5, %v10641_v23, 0.0 }
 0x453   :  { %v10646_v62 = vpop.eup %8916  ;;  %v4123_v12 = vpop.xlane.xlu0 %4122  ;;  %4299 = vadd.xlane.f32.xlu1 %v4298_v17 }
 0x454   :  { %8922 = vpow2.f32 %v4240_v0  ;;  %v4246_v58 = vmul.f32 1.442695, %v4208_v1  ;;  %v4207_v9 = vsub.f32 %v10494_v20, %v4123_v12  ;;  %v4301_v55 = vsel %vm4105_vm5, %v10646_v62, 0.0 }
 0x455   :  { %4302 = vadd.xlane.f32.xlu0 %v4301_v55  ;;  %v10651_v48 = vpop.xlane.xlu1 %4167  ;;  %v4215_v0 = vsub.f32 %v10447_v57, %v10633_v46 }
 0x456   :  { %8924 = vpow2.f32 %v4246_v58  ;;  %v4244_v37 = vmul.f32 1.442695, %v4207_v9 }
 0x457   :  { %8926 = vpow2.f32 %v4250_v27  ;;  %v10654_v7 = vpop.xlane.xlu0 %4158  ;;  %v4260_v57 = vmul.f32 1.442695, %v4215_v0 }
 0x458   :  { %8928 = vpow2.f32 %v4244_v37 }
 0x459   :  { %v10656_v19 = vpop.eup %8918  ;;  %v4138_v26 = vpop.xlane.xlu1 %4137 }
 0x45a   :  { %v4212_v20 = vsub.f32 %v10511_v29, %v4138_v26  ;;  %v4304_v3 = vsel %vm4105_vm5, %v10656_v19, 0.0  ;;  %v4218_v26 = vsub.f32 %v10474_v52, %v10637_v39 }
 0x45b   :  { %v10662_v16 = vpop.eup %8920  ;;  %v4129_v18 = vpop.xlane.xlu0 %4128  ;;  %4305 = vadd.xlane.f32.xlu1 %v4304_v3 }
 0x45c   :  { %v4254_v35 = vmul.f32 1.442695, %v4212_v20  ;;  %v4209_v47 = vsub.f32 %v10517_v5, %v4129_v18  ;;  %v4310_v24 = vsel %vm4105_vm5, %v10662_v16, 0.0 }
 0x45d   :  { %v10667_v38 = vpop.xlane.xlu1 %4179 }
 0x45e   :  { %8930 = vpow2.f32 %v4254_v35  ;;  %v4248_v61 = vmul.f32 1.442695, %v4209_v47 }
 0x45f   :  { %8932 = vpow2.f32 %v4258_v42  ;;  %v10669_v29 = vpop.xlane.xlu0 %4170  ;;  %4311 = vadd.xlane.f32.xlu1 %v4310_v24 }
 0x460   :  { %8934 = vpow2.f32 %v4248_v61  ;;  %v4219_v61 = vsub.f32 %v10505_v4, %v10654_v7  ;;  %v4222_v4 = vsub.f32 %v10499_v56, %v10651_v48 }
 0x461   :  { %v10671_v44 = vpop.eup %8922  ;;  %8936 = vpow2.f32 %v4252_v13  ;;  %v10686_v55 = vpop.xlane.xlu1 %4191  ;;  %v4266_v13 = vmul.f32 1.442695, %v4218_v26 }
 0x462   :  { %v4307_v5 = vsel %vm4105_vm5, %v10671_v44, 0.0  ;;  %v4268_v7 = vmul.f32 1.442695, %v4219_v61 }
 0x463   :  { %v10677_v1 = vpop.eup %8924  ;;  %v4141_v17 = vpop.xlane.xlu0 %4140  ;;  %4308 = vadd.xlane.f32.xlu0 %v4307_v5 }
 0x464   :  { %v10679_v27 = vpop.eup %8926  ;;  %v4213_v12 = vsub.f32 %v10539_v53, %v4141_v17  ;;  %v4316_v58 = vsel %vm4105_vm5, %v10677_v1, 0.0 }
 0x465   :  { %v10684_v9 = vpop.eup %8928  ;;  %4317 = vadd.xlane.f32.xlu1 %v4316_v58  ;;  %v4322_v53 = vsel %vm4105_vm5, %v10679_v27, 0.0  ;;  %v4162_v20 = vpop.xlane.xlu1 %4161 }
 0x466   :  { %v4256_v46 = vmul.f32 1.442695, %v4213_v12  ;;  %v4313_v37 = vsel %vm4105_vm5, %v10684_v9, 0.0  ;;  %v4220_v52 = vsub.f32 %v10545_v63, %v4162_v20 }
 0x467   :  { %v10690_v25 = vpop.xlane.xlu0 %4182  ;;  %4314 = vadd.xlane.f32.xlu0 %v4313_v37  ;;  %v4274_v37 = vmul.f32 1.442695, %v4222_v4 }
 0x468   :  { %8938 = vpow2.f32 %v4256_v46  ;;  %v4270_v63 = vmul.f32 1.442695, %v4220_v52 }
 0x469   :  { %4323 = vadd.xlane.f32.xlu1 %v4322_v53  ;;  %8940 = vpow2.f32 %v4260_v57  ;;  %v4174_v57 = vpop.xlane.xlu1 %4173  ;;  %v4223_v53 = vsub.f32 %v10528_v49, %v10669_v29  ;;  %v4226_v49 = vsub.f32 %v10522_v31, %v10667_v38 }
 0x46a   :  { %v4224_v56 = vsub.f32 %v10556_v14, %v4174_v57 }
 0x46b   :  { %v10696_v41 = vpop.eup %8930  ;;  %v4150_v3 = vpop.xlane.xlu0 %4149  ;;  %v4282_v31 = vmul.f32 1.442695, %v4226_v49 }
 0x46c   :  { %v10698_v42 = vpop.eup %8932  ;;  %v4216_v18 = vsub.f32 %v10562_v11, %v4150_v3  ;;  %v4328_v35 = vsel %vm4105_vm5, %v10696_v41, 0.0 }
 0x46d   :  { %v10703_v47 = vpop.eup %8934  ;;  %4329 = vadd.xlane.f32.xlu1 %v4328_v35  ;;  %v4334_v17 = vsel %vm4105_vm5, %v10698_v42, 0.0  ;;  %v4278_v35 = vmul.f32 1.442695, %v4224_v56  ;;  %v4186_v29 = vpop.xlane.xlu1 %4185 }
 0x46e   :  { %v4262_v39 = vmul.f32 1.442695, %v4216_v18  ;;  %v4319_v24 = vsel %vm4105_vm5, %v10703_v47, 0.0  ;;  %v10710_v0 = vpop.eup %8936  ;;  %v4276_v18 = vmul.f32 1.442695, %v4223_v53  ;;  %v4228_v38 = vsub.f32 %v10568_v15, %v4186_v29 }
 0x46f   :  { %v4153_v5 = vpop.xlane.xlu0 %4152  ;;  %4320 = vadd.xlane.f32.xlu0 %v4319_v24  ;;  %v4325_v58 = vsel %vm4105_vm5, %v10710_v0, 0.0  ;;  %v4227_v24 = vsub.f32 %v10550_v54, %v10690_v25  ;;  %v4230_v15 = vsub.f32 %v10533_v8, %v10686_v55 }
 0x470   :  { %8942 = vpow2.f32 %v4262_v39  ;;  %v4217_v11 = vsub.f32 %v10574_v60, %v4153_v5 }
 0x471   :  { %8944 = vpow2.f32 %v4266_v13  ;;  %4335 = vadd.xlane.f32.xlu1 %v4334_v17  ;;  %v4198_v57 = vpop.xlane.xlu1 %4197 }
 0x472   :  { %v4264_v12 = vmul.f32 1.442695, %v4217_v11  ;;  %v4232_v8 = vsub.f32 %v10579_v34, %v4198_v57 }
 0x473   :  { %v10719_v46 = vpop.xlane.xlu0 %4194  ;;  %4326 = vadd.xlane.f32.xlu0 %v4325_v58  ;;  %v4286_v58 = vmul.f32 1.442695, %v4228_v38 }
 0x474   :  { %8946 = vpow2.f32 %v4264_v12  ;;  %v4294_v34 = vmul.f32 1.442695, %v4232_v8 }
 0x475   :  { %v10721_v60 = vpop.eup %8938  ;;  %8948 = vpow2.f32 %v4268_v7 }
 0x476   :  { %8950 = vpow2.f32 %v4270_v63  ;;  %v4331_v48 = vsel %vm4105_vm5, %v10721_v60, 0.0  ;;  %v10728_v26 = vpop.eup %8940  ;;  %v4284_v63 = vmul.f32 1.442695, %v4227_v24 }
 0x477   :  { %v4165_v20 = vpop.xlane.xlu0 %4164  ;;  %4332 = vadd.xlane.f32.xlu0 %v4331_v48  ;;  %8952 = vpow2.f32 %v4274_v37  ;;  %v4337_v61 = vsel %vm4105_vm5, %v10728_v26, 0.0 }
 0x478   :  { %v4221_v3 = vsub.f32 %v10592_v51, %v4165_v20  ;;  %v4290_v20 = vmul.f32 1.442695, %v4230_v15 }
 0x47a   :  { %v4272_v13 = vmul.f32 1.442695, %v4221_v3 }
 0x47b   :  { %v4177_v14 = vpop.xlane.xlu0 %4176  ;;  %4338 = vadd.xlane.f32.xlu0 %v4337_v61 }
 0x47c   :  { %8954 = vpow2.f32 %v4272_v13  ;;  %v4225_v52 = vsub.f32 %v10598_v22, %v4177_v14 }
 0x47d   :  { %v10736_v39 = vpop.eup %8942  ;;  %8956 = vpow2.f32 %v4276_v18 }
 0x47e   :  { %v10738_v51 = vpop.eup %8944  ;;  %8958 = vpow2.f32 %v4278_v35  ;;  %v4280_v5 = vmul.f32 1.442695, %v4225_v52  ;;  %v4340_v11 = vsel %vm4105_vm5, %v10736_v39, 0.0 }
 0x47f   :  { %v4189_v17 = vpop.xlane.xlu0 %4188  ;;  %4341 = vadd.xlane.f32.xlu1 %v4340_v11  ;;  %v4346_v22 = vsel %vm4105_vm5, %v10738_v51, 0.0 }
 0x480   :  { %8960 = vpow2.f32 %v4280_v5  ;;  %v4229_v54 = vsub.f32 %v10604_v50, %v4189_v17  ;;  %v4231_v50 = vsub.f32 %v10584_v45, %v10719_v46 }
 0x481   :  { %v10745_v4 = vpop.eup %8946  ;;  %8962 = vpow2.f32 %v4282_v31 }
 0x482   :  { %v10749_v7 = vpop.eup %8948  ;;  %v4343_v25 = vsel %vm4105_vm5, %v10745_v4, 0.0  ;;  %8964 = vpow2.f32 %v4284_v63  ;;  %v4288_v56 = vmul.f32 1.442695, %v4229_v54  ;;  %v4292_v13 = vmul.f32 1.442695, %v4231_v50 }
 0x483   :  { %v10754_v12 = vpop.eup %8950  ;;  %4344 = vadd.xlane.f32.xlu0 %v4343_v25  ;;  %4347 = vadd.xlane.f32.xlu1 %v4346_v22  ;;  %v4349_v37 = vsel %vm4105_vm5, %v10749_v7, 0.0  ;;  %8966 = vpow2.f32 %v4286_v58  ;;  %v4201_v55 = vpop.xlane.xlu0 %4200 }
 0x484   :  { %v10760_v53 = vpop.eup %8952  ;;  %v4352_v48 = vsel %vm4105_vm5, %v10754_v12, 0.0  ;;  %8968 = vpow2.f32 %v4288_v56  ;;  %v4233_v45 = vsub.f32 %v10609_v10, %v4201_v55 }
 0x485   :  { %v4358_v18 = vsel %vm4105_vm5, %v10760_v53, 0.0  ;;  %8970 = vpow2.f32 %v4290_v20 }
 0x486   :  { %8972 = vpow2.f32 %v4292_v13  ;;  %v4296_v49 = vmul.f32 1.442695, %v4233_v45  ;;  %v10822_v45 = vpack.i.b16 %v10621_v36, %v10619_v2 }
 0x487   :  { %4350 = vadd.xlane.f32.xlu0 %v4349_v37  ;;  %4353 = vadd.xlane.f32.xlu1 %v4352_v48  ;;  %8974 = vpow2.f32 %v4294_v34  ;;  %v5002_v48 = vpop.trf.xlu1  ;;  %v10830_v34 = vpack.i.b16 %v10625_v40, %v10623_v33 }
 0x488   :  { %8976 = vpow2.f32 %v4296_v49 }
 0x489   :  { %v10767_v3 = vpop.eup %8954  ;;  %v5018_v20 = vpop.trf.xlu0 }
 0x48a   :  { %v10771_v35 = vpop.eup %8956  ;;  %v4355_v46 = vsel %vm4105_vm5, %v10767_v3, 0.0  ;;  %v10818_v13 = vpack.i.b16 %v5018_v20, %v5002_v48 }
 0x48b   :  { %v10776_v61 = vpop.eup %8958  ;;  %4356 = vadd.xlane.f32.xlu0 %v4355_v46  ;;  %4359 = vadd.xlane.f32.xlu1 %v4358_v18  ;;  %v4361_v14 = vsel %vm4105_vm5, %v10771_v35, 0.0  ;;  %v10826_v46 = vpack.i.b16 %v10629_v59, %v10627_v32 }
 0x48c   :  { %v4364_v29 = vsel %vm4105_vm5, %v10776_v61, 0.0 }
 0x48d   :  { %v10782_v52 = vpop.eup %8960 }
 0x48e   :  { %v10784_v10 = vpop.eup %8962  ;;  %v4367_v24 = vsel %vm4105_vm5, %v10782_v52, 0.0 }
 0x48f   :  { %4362 = vadd.xlane.f32.xlu0 %v4361_v14  ;;  %4365 = vadd.xlane.f32.xlu1 %v4364_v29  ;;  %v10788_v5 = vpop.eup %8964  ;;  %v4370_v11 = vsel %vm4105_vm5, %v10784_v10, 0.0  ;;  %v5074_v29 = vcombine.low %v10830_v34, %v10818_v13 }
 0x490   :  { %v10792_v31 = vpop.eup %8966  ;;  %v4373_v38 = vsel %vm4105_vm5, %v10788_v5, 0.0 }
 0x491   :  { %v10796_v17 = vpop.eup %8968  ;;  %v4376_v22 = vsel %vm4105_vm5, %v10792_v31, 0.0 }
 0x492   :  { %v10800_v63 = vpop.eup %8970  ;;  %v4379_v54 = vsel %vm4105_vm5, %v10796_v17, 0.0 }
 0x493   :  { %4368 = vadd.xlane.f32.xlu0 %v4367_v24  ;;  %4371 = vadd.xlane.f32.xlu1 %v4370_v11  ;;  %v10804_v25 = vpop.eup %8972  ;;  %v4382_v15 = vsel %vm4105_vm5, %v10800_v63, 0.0  ;;  %v5058_v11 = vcombine.low %v10822_v45, %v10826_v46 }
 0x494   :  { %v10808_v58 = vpop.eup %8974  ;;  %v4385_v57 = vsel %vm4105_vm5, %v10804_v25, 0.0 }
 0x495   :  { %v10812_v37 = vpop.eup %8976  ;;  %v4388_v50 = vsel %vm4105_vm5, %v10808_v58, 0.0 }
 0x496   :  { %v4391_v56 = vsel %vm4105_vm5, %v10812_v37, 0.0 }
 0x497   :  { %4374 = vadd.xlane.f32.xlu0 %v4373_v38  ;;  %4377 = vadd.xlane.f32.xlu1 %v4376_v22 }
 0x49b   :  { %4380 = vadd.xlane.f32.xlu0 %v4379_v54  ;;  %4383 = vadd.xlane.f32.xlu1 %v4382_v15 }
 0x49f   :  { %4386 = vadd.xlane.f32.xlu0 %v4385_v57  ;;  %4389 = vadd.xlane.f32.xlu1 %v4388_v50  ;;  %v10839_v57 = vrot.slane %v5074_v29, %v9438_v28  ;;  %v5038_v29 = vshrl.u32 %v10623_v33, 16 }
 0x4a3   :  { %4392 = vadd.xlane.f32.xlu0 %v4391_v56  ;;  %v10842_v56 = vrot.slane %v5058_v11, %v9438_v28 }
 0x4dc   :  { %v4300_v8 = vpop.xlane.xlu1 %4299 }
 0x4dd   :  { %8978 = vrcp.f32 %v4300_v8 }
 0x4de   :  { %v4303_v55 = vpop.xlane.xlu0 %4302 }
 0x4df   :  { %8980 = vrcp.f32 %v4303_v55  ;;  %v5055_v55 = vshrl.u32 %v5018_v20, 16  ;;  %v5090_v20 = vcombine.low %v10842_v56, %v10839_v57 }
 0x4e4   :  { %v4306_v18 = vpop.xlane.xlu1 %4305 }
 0x4e5   :  { %8982 = vrcp.f32 %v4306_v18  ;;  %v5054_v18 = vshrl.u32 %v5002_v48, 16 }
 0x4e8   :  { %v4312_v14 = vpop.xlane.xlu1 %4311 }
 0x4ea   :  { %v8979_v49 = vpop.eup %8978 }
 0x4eb   :  { %v4426_v22 = vmul.f32 %v8979_v49, %v10641_v23  ;;  %v5030_v23 = vshrl.u32 %v10619_v2, 16  ;;  %v5046_v49 = vshrl.u32 %v10627_v32, 16 }
 0x4ec   :  { %v8981_v24 = vpop.eup %8980  ;;  %v4309_v38 = vpop.xlane.xlu0 %4308 }
 0x4ed   :  { %8984 = vrcp.f32 %v4309_v38  ;;  %v4427_v54 = vmul.f32 %v8981_v24, %v10646_v62  ;;  %v5031_v38 = vshrl.u32 %v10621_v36, 16  ;;  %v5047_v62 = vshrl.u32 %v10629_v59, 16 }
 0x4ee   :  { %v4318_v15 = vpop.xlane.xlu1 %4317  ;;  %8986 = vrcp.f32 %v4312_v14  ;;  %v5039_v14 = vshrl.u32 %v10625_v40, 16  ;;  %v10854_v24 = vpack.i.b16 %v5055_v55, %v5054_v18 }
 0x4ef   :  { %v4458_v50 = vpack.c.bf16 %v4427_v54, %v4426_v22  ;;  %v10856_v36 = vpack.i.b16 %v5031_v38, %v5030_v23  ;;  %v10858_v2 = vpack.i.b16 %v5047_v62, %v5046_v49 }
 0x4f0   :  { %v4315_v8 = vpop.xlane.xlu0 %4314  ;;  %v10860_v59 = vpack.i.b16 %v5039_v14, %v5038_v29 }
 0x4f1   :  { %8988 = vrcp.f32 %v4315_v8  ;;  %v5198_v21 = vsel %vm4105_vm5, %v4458_v50, 0  ;;  %v5126_v22 = vcombine.low %v10856_v36, %v10858_v2 }
 0x4f2   :  { %8621 = vmatpush3.bf16.xpose.msra.mxu0 %v5198_v21  ;;  %v4324_v48 = vpop.xlane.xlu1 %4323  ;;  %v5098_v21 = vrot.slane %v5090_v20, %v9450_v30  ;;  %8990 = vrcp.f32 %v4318_v15  ;;  %v8983_v40 = vpop.eup %8982  ;;  %v5142_v33 = vcombine.low %v10860_v59, %v10854_v24 }
 0x4f3   :  { %8632 = vmatprep.subr.bf16.mxu0 %v11503_v43  ;;  %v4428_v50 = vmul.f32 %v8983_v40, %v10656_v19  ;;  %v10876_v62 = vrot.slane %v5126_v22, %v9438_v28 }
 0x4f4   :  { %v10873_v18 = vrot.slane %v5142_v33, %v9438_v28 }
 0x4f6   :  { %v4330_v54 = vpop.xlane.xlu1 %4329  ;;  %v5158_v20 = vcombine.low %v10876_v62, %v10873_v18 }
 0x4f8   :  { %v4321_v32 = vpop.xlane.xlu0 %4320 }
 0x4f9   :  { %8992 = vrcp.f32 %v4321_v32  ;;  %8623 = vmatmul.mubr.msk.bf16.vlgmr.msra.gmra.mxu0 %vm4105_vm5, %v5098_v21 }
 0x4fa   :  { %v8985_v11 = vpop.eup %8984  ;;  %8634 = vmatprep.mubr.msk.bf16.mxu0 %vm9084_vm0, %v11503_v43  ;;  %8994 = vrcp.f32 %v4324_v48  ;;  %v4336_v29 = vpop.xlane.xlu1 %4335 }
 0x4fb   :  { %v4429_v15 = vmul.f32 %v8985_v11, %v10671_v44  ;;  %v8987_v8 = vpop.eup %8986 }
 0x4fc   :  { %v4327_v55 = vpop.xlane.xlu0 %4326  ;;  %v4430_v14 = vmul.f32 %v8987_v8, %v10662_v16  ;;  %v5166_v16 = vrot.slane %v5158_v20, %v9450_v30 }
 0x4fd   :  { %8996 = vrcp.f32 %v4327_v55  ;;  %v4459_v38 = vpack.c.bf16 %v4429_v15, %v4428_v50  ;;  %v5122_v15 = vcombine.high %v5098_v21, %v11502_v6 }
 0x4fe   :  { %v8989_v23 = vpop.eup %8988  ;;  %8998 = vrcp.f32 %v4330_v54 }
 0x4ff   :  { %v5244_v49 = vsel %vm4105_vm5, %v4459_v38, 0  ;;  %v4431_v19 = vmul.f32 %v8989_v23, %v10684_v9  ;;  %v8991_v32 = vpop.eup %8990 }
 0x500   :  { %v4333_v44 = vpop.xlane.xlu0 %4332  ;;  %8627 = vmatpush3.bf16.xpose.msra.mxu1 %v5244_v49  ;;  %v4432_v11 = vmul.f32 %v8991_v32, %v10677_v1  ;;  %v5190_v32 = vcombine.high %v5166_v16, %v11502_v6 }
 0x501   :  { %9000 = vrcp.f32 %v4333_v44  ;;  %v4460_v48 = vpack.c.bf16 %v4431_v19, %v4430_v14  ;;  %8638 = vmatprep.subr.bf16.mxu1 %v11503_v43 }
 0x502   :  { %9002 = vrcp.f32 %v4336_v29 }
 0x503   :  { %v5290_v40 = vsel %vm4105_vm5, %v4460_v48, 0 }
 0x504   :  { %v4339_v33 = vpop.xlane.xlu0 %4338  ;;  %8633 = vmatpush3.bf16.xpose.msra.mxu0 %v5290_v40  ;;  %v5091_v40 = vcombine.high %v10842_v56, %v10839_v57  ;;  %v5159_v56 = vcombine.high %v10876_v62, %v10873_v18 }
 0x505   :  { %9004 = vrcp.f32 %v4339_v33  ;;  %8644 = vmatprep.subr.bf16.mxu0 %v11503_v43 }
 0x506   :  { %v8993_v9 = vpop.eup %8992  ;;  %v5105_v57 = vrot.slane %v5091_v40, %v9450_v30 }
 0x507   :  { %8629 = vmatmul.mubr.msk.bf16.vlgmr.msra.gmra.mxu1 %vm4105_vm5, %v5166_v16  ;;  %v4433_v22 = vmul.f32 %v8993_v9, %v10703_v47  ;;  %v8995_v54 = vpop.eup %8994 }
 0x508   :  { %v4342_v50 = vpop.xlane.xlu1 %4341  ;;  %8640 = vmatprep.mubr.msk.bf16.mxu1 %vm9084_vm0, %v11503_v43  ;;  %v4434_v23 = vmul.f32 %v8995_v54, %v10679_v27 }
 0x509   :  { %v4461_v8 = vpack.c.bf16 %v4433_v22, %v4432_v11  ;;  %9006 = vrcp.f32 %v4342_v50 }
 0x50a   :  { %v8997_v55 = vpop.eup %8996 }
 0x50b   :  { %8635 = vmatmul.mubr.msk.bf16.vlgmr.msra.gmra.mxu0 %vm4105_vm5, %v5122_v15  ;;  %v5336_v38 = vsel %vm4105_vm5, %v4461_v8, 0  ;;  %v4435_v1 = vmul.f32 %v8997_v55, %v10710_v0  ;;  %v8999_v49 = vpop.eup %8998  ;;  %v5173_v8 = vrot.slane %v5159_v56, %v9450_v30 }
 0x50c   :  { %v4345_v47 = vpop.xlane.xlu0 %4344  ;;  %8639 = vmatpush3.bf16.xpose.msra.mxu1 %v5336_v38  ;;  %v4348_v14 = vpop.xlane.xlu1 %4347  ;;  %8646 = vmatprep.mubr.msk.bf16.mxu0 %vm9084_vm0, %v11503_v43  ;;  %v4436_v44 = vmul.f32 %v8999_v49, %v10696_v41  ;;  %v5123_v49 = vcombine.high %v5105_v57, %v11502_v6 }
 0x50d   :  { %9008 = vrcp.f32 %v4345_v47  ;;  %v4462_v21 = vpack.c.bf16 %v4435_v1, %v4434_v23  ;;  %8650 = vmatprep.subr.bf16.mxu1 %v11503_v43  ;;  %v5075_v23 = vcombine.high %v10830_v34, %v10818_v13 }
 0x50e   :  { %v9001_v19 = vpop.eup %9000  ;;  %9010 = vrcp.f32 %v4348_v14 }
 0x50f   :  { %v5382_v29 = vsel %vm4105_vm5, %v4462_v21, 0  ;;  %v4437_v27 = vmul.f32 %v9001_v19, %v10721_v60  ;;  %v9003_v0 = vpop.eup %9002  ;;  %v5059_v19 = vcombine.high %v10822_v45, %v10826_v46  ;;  %v5143_v45 = vcombine.high %v10860_v59, %v10854_v24 }
 0x510   :  { %v4351_v20 = vpop.xlane.xlu0 %4350  ;;  %8645 = vmatpush3.bf16.xpose.msra.mxu0 %v5382_v29  ;;  %v4354_v48 = vpop.xlane.xlu1 %4353  ;;  %v4438_v60 = vmul.f32 %v9003_v0, %v10698_v42  ;;  %v10938_v29 = vrot.slane %v5075_v23, %v9438_v28  ;;  %v5127_v0 = vcombine.high %v10856_v36, %v10858_v2  ;;  %v5191_v36 = vcombine.high %v5173_v8, %v11502_v6 }
 0x511   :  { %9012 = vrcp.f32 %v4351_v20  ;;  %v4463_v33 = vpack.c.bf16 %v4437_v27, %v4436_v44  ;;  %8656 = vmatprep.subr.bf16.mxu0 %v11503_v43 }
 0x512   :  { %v9005_v9 = vpop.eup %9004  ;;  %9014 = vrcp.f32 %v4354_v48 }
 0x513   :  { %8641 = vmatmul.mubr.msk.bf16.vlgmr.msra.gmra.mxu1 %vm4105_vm5, %v5190_v32  ;;  %v5428_v41 = vsel %vm4105_vm5, %v4463_v33, 0  ;;  %v4439_v11 = vmul.f32 %v9005_v9, %v10728_v26  ;;  %v10956_v33 = vrot.slane %v5143_v45, %v9438_v28 }
 0x514   :  { %v4357_v22 = vpop.xlane.xlu0 %4356  ;;  %8651 = vmatpush3.bf16.xpose.msra.mxu1 %v5428_v41  ;;  %v4360_v54 = vpop.xlane.xlu1 %4359  ;;  %8652 = vmatprep.mubr.msk.bf16.mxu1 %vm9084_vm0, %v11503_v43 }
 0x515   :  { %9016 = vrcp.f32 %v4357_v22  ;;  %v4464_v16 = vpack.c.bf16 %v4439_v11, %v4438_v60  ;;  %8662 = vmatprep.subr.bf16.mxu1 %v11503_v43 }
 0x516   :  { %9018 = vrcp.f32 %v4360_v54  ;;  %v9007_v26 = vpop.eup %9006 }
 0x517   :  { %8647 = vmatmul.mubr.msk.bf16.vlgmr.msra.gmra.mxu0 %vm4105_vm5, %v5105_v57  ;;  %v5474_v42 = vsel %vm4105_vm5, %v4464_v16, 0  ;;  %v4440_v62 = vmul.f32 %v9007_v26, %v10736_v39 }
 0x518   :  { %v4363_v50 = vpop.xlane.xlu0 %4362  ;;  %8657 = vmatpush3.bf16.xpose.msra.mxu0 %v5474_v42  ;;  %v4366_v15 = vpop.xlane.xlu1 %4365  ;;  %8658 = vmatprep.mubr.msk.bf16.mxu0 %vm9084_vm0, %v11503_v43 }
 0x519   :  { %9020 = vrcp.f32 %v4363_v50  ;;  %8668 = vmatprep.subr.bf16.mxu0 %v11503_v43 }
 0x51a   :  { %v9009_v18 = vpop.eup %9008  ;;  %9022 = vrcp.f32 %v4366_v15 }
 0x51b   :  { %8653 = vmatmul.mubr.msk.bf16.vlgmr.msra.gmra.mxu1 %vm4105_vm5, %v5173_v8  ;;  %v4441_v55 = vmul.f32 %v9009_v18, %v10745_v4  ;;  %v9011_v38 = vpop.eup %9010 }
 0x51c   :  { %v4369_v1 = vpop.xlane.xlu0 %4368  ;;  %8664 = vmatprep.mubr.msk.bf16.mxu1 %vm9084_vm0, %v11503_v43  ;;  %v4372_v47 = vpop.xlane.xlu1 %4371  ;;  %v4442_v4 = vmul.f32 %v9011_v38, %v10738_v51 }
 0x51d   :  { %9024 = vrcp.f32 %v4369_v1  ;;  %v4465_v14 = vpack.c.bf16 %v4441_v55, %v4440_v62 }
 0x51e   :  { %v9013_v21 = vpop.eup %9012  ;;  %9026 = vrcp.f32 %v4372_v47 }
 0x51f   :  { %8659 = vmatmul.mubr.msk.bf16.vlgmr.msra.gmra.mxu0 %vm4105_vm5, %v5123_v49  ;;  %v5520_v39 = vsel %vm4105_vm5, %v4465_v14, 0  ;;  %v4443_v13 = vmul.f32 %v9013_v21, %v10749_v7  ;;  %v9015_v34 = vpop.eup %9014  ;;  %v10946_v7 = vrot.slane %v5059_v19, %v9438_v28 }
 0x520   :  { %v4375_v44 = vpop.xlane.xlu0 %4374  ;;  %8663 = vmatpush3.bf16.xpose.msra.mxu1 %v5520_v39  ;;  %8670 = vmatprep.mubr.msk.bf16.mxu0 %vm9084_vm0, %v11503_v43  ;;  %v4378_v46 = vpop.xlane.xlu1 %4377  ;;  %v4444_v48 = vmul.f32 %v9015_v34, %v10754_v12  ;;  %v10961_v12 = vrot.slane %v5127_v0, %v9438_v28 }
 0x521   :  { %9028 = vrcp.f32 %v4375_v44  ;;  %v4466_v27 = vpack.c.bf16 %v4443_v13, %v4442_v4  ;;  %8674 = vmatprep.subr.bf16.mxu1 %v11503_v43  ;;  %v5106_v59 = vcombine.low %v10946_v7, %v10938_v29  ;;  %v5107_v19 = vcombine.high %v10946_v7, %v10938_v29 }
 0x522   :  { %v9017_v51 = vpop.eup %9016  ;;  %9030 = vrcp.f32 %v4378_v46  ;;  %v5174_v56 = vcombine.low %v10961_v12, %v10956_v33  ;;  %v5175_v45 = vcombine.high %v10961_v12, %v10956_v33 }
 0x523   :  { %v5566_v20 = vsel %vm4105_vm5, %v4466_v27, 0  ;;  %v4445_v40 = vmul.f32 %v9017_v51, %v10767_v3  ;;  %v9019_v24 = vpop.eup %9018  ;;  %v5114_v57 = vrot.slane %v5106_v59, %v9450_v30  ;;  %v5121_v29 = vrot.slane %v5107_v19, %v9450_v30 }
 0x524   :  { %v4381_v32 = vpop.xlane.xlu0 %4380  ;;  %8669 = vmatpush3.bf16.xpose.msra.mxu0 %v5566_v20  ;;  %v4384_v9 = vpop.xlane.xlu1 %4383  ;;  %v4446_v60 = vmul.f32 %v9019_v24, %v10760_v53  ;;  %v5182_v18 = vrot.slane %v5174_v56, %v9450_v30  ;;  %v5189_v7 = vrot.slane %v5175_v45, %v9450_v30 }
 0x525   :  { %9032 = vrcp.f32 %v4381_v32  ;;  %v4467_v2 = vpack.c.bf16 %v4445_v40, %v4444_v48  ;;  %8680 = vmatprep.subr.bf16.mxu0 %v11503_v43  ;;  %v5124_v1 = vcombine.high %v5114_v57, %v11502_v6 }
 0x526   :  { %v9021_v41 = vpop.eup %9020  ;;  %9034 = vrcp.f32 %v4384_v9  ;;  %v5192_v39 = vcombine.high %v5182_v18, %v11502_v6 }
 0x527   :  { %8665 = vmatmul.mubr.msk.bf16.vlgmr.msra.gmra.mxu1 %vm4105_vm5, %v5191_v36  ;;  %v5612_v3 = vsel %vm4105_vm5, %v4467_v2, 0  ;;  %v4447_v11 = vmul.f32 %v9021_v41, %v10771_v35  ;;  %v9023_v22 = vpop.eup %9022 }
 0x528   :  { %v4387_v54 = vpop.xlane.xlu0 %4386  ;;  %8675 = vmatpush3.bf16.xpose.msra.mxu1 %v5612_v3  ;;  %8676 = vmatprep.mubr.msk.bf16.mxu1 %vm9084_vm0, %v11503_v43  ;;  %v4390_v16 = vpop.xlane.xlu1 %4389  ;;  %v4448_v35 = vmul.f32 %v9023_v22, %v10776_v61 }
 0x529   :  { %9036 = vrcp.f32 %v4387_v54  ;;  %v4468_v42 = vpack.c.bf16 %v4447_v11, %v4446_v60  ;;  %8686 = vmatprep.subr.bf16.mxu1 %v11503_v43 }
 0x52a   :  { %v9025_v26 = vpop.eup %9024  ;;  %9038 = vrcp.f32 %v4390_v16 }
 0x52b   :  { %8671 = vmatmul.mubr.msk.bf16.vlgmr.msra.gmra.mxu0 %vm4105_vm5, %v5114_v57  ;;  %v5658_v53 = vsel %vm4105_vm5, %v4468_v42, 0  ;;  %v4449_v50 = vmul.f32 %v9025_v26, %v10782_v52  ;;  %v9027_v15 = vpop.eup %9026 }
 0x52c   :  { %v4393_v8 = vpop.xlane.xlu0 %4392  ;;  %8681 = vmatpush3.bf16.xpose.msra.mxu0 %v5658_v53  ;;  %8682 = vmatprep.mubr.msk.bf16.mxu0 %vm9084_vm0, %v11503_v43  ;;  %v4450_v61 = vmul.f32 %v9027_v15, %v10784_v10 }
 0x52d   :  { %9040 = vrcp.f32 %v4393_v8  ;;  %v4469_v62 = vpack.c.bf16 %v4449_v50, %v4448_v35  ;;  %8692 = vmatprep.subr.bf16.mxu0 %v11503_v43 }
 0x52e   :  { %v9029_v55 = vpop.eup %9028 }
 0x52f   :  { %8677 = vmatmul.mubr.msk.bf16.vlgmr.msra.gmra.mxu1 %vm4105_vm5, %v5182_v18  ;;  %v5704_v38 = vsel %vm4105_vm5, %v4469_v62, 0  ;;  %v4451_v52 = vmul.f32 %v9029_v55, %v10788_v5  ;;  %v9031_v23 = vpop.eup %9030 }
 0x530   :  { %8687 = vmatpush3.bf16.xpose.msra.mxu1 %v5704_v38  ;;  %8688 = vmatprep.mubr.msk.bf16.mxu1 %vm9084_vm0, %v11503_v43  ;;  %v4452_v21 = vmul.f32 %v9031_v23, %v10792_v31 }
 0x531   :  { %v4470_v49 = vpack.c.bf16 %v4451_v52, %v4450_v61  ;;  %8698 = vmatprep.subr.bf16.mxu1 %v11503_v43 }
 0x532   :  { %v9033_v47 = vpop.eup %9032 }
 0x533   :  { %8683 = vmatmul.mubr.msk.bf16.vlgmr.msra.gmra.mxu0 %vm4105_vm5, %v5124_v1  ;;  %v5750_v14 = vsel %vm4105_vm5, %v4470_v49, 0  ;;  %v4453_v10 = vmul.f32 %v9033_v47, %v10796_v17  ;;  %v9035_v5 = vpop.eup %9034 }
 0x534   :  { %8693 = vmatpush3.bf16.xpose.msra.mxu0 %v5750_v14  ;;  %8694 = vmatprep.mubr.msk.bf16.mxu0 %vm9084_vm0, %v11503_v43  ;;  %v4454_v17 = vmul.f32 %v9035_v5, %v10800_v63 }
 0x535   :  { %v4471_v4 = vpack.c.bf16 %v4453_v10, %v4452_v21  ;;  %8704 = vmatprep.subr.bf16.mxu0 %v11503_v43 }
 0x536   :  { %v9037_v13 = vpop.eup %9036 }
 0x537   :  { %8689 = vmatmul.mubr.msk.bf16.vlgmr.msra.gmra.mxu1 %vm4105_vm5, %v5192_v39  ;;  %v5796_v31 = vsel %vm4105_vm5, %v4471_v4, 0  ;;  %v4455_v34 = vmul.f32 %v9037_v13, %v10804_v25  ;;  %v9039_v44 = vpop.eup %9038 }
 0x538   :  { %8699 = vmatpush3.bf16.xpose.msra.mxu1 %v5796_v31  ;;  %8700 = vmatprep.mubr.msk.bf16.mxu1 %vm9084_vm0, %v11503_v43  ;;  %v4456_v25 = vmul.f32 %v9039_v44, %v10808_v58  ;;  %v5125_v58 = vcombine.high %v5121_v29, %v11502_v6 }
 0x539   :  { %v4472_v46 = vpack.c.bf16 %v4455_v34, %v4454_v17  ;;  %8710 = vmatprep.subr.bf16.mxu1 %v11503_v43 }
 0x53a   :  { %v9041_v27 = vpop.eup %9040 }
 0x53b   :  { %8695 = vmatmul.mubr.msk.bf16.vlgmr.msra.gmra.mxu0 %vm4105_vm5, %v5121_v29  ;;  %v5842_v63 = vsel %vm4105_vm5, %v4472_v46, 0  ;;  %v4457_v51 = vmul.f32 %v9041_v27, %v10812_v37  ;;  %v5193_v37 = vcombine.high %v5189_v7, %v11502_v6 }
 0x53c   :  { %8705 = vmatpush3.bf16.xpose.msra.mxu0 %v5842_v63  ;;  %8706 = vmatprep.mubr.msk.bf16.mxu0 %vm9084_vm0, %v11503_v43 }
 0x53d   :  { %v4473_v0 = vpack.c.bf16 %v4457_v51, %v4456_v25  ;;  %8716 = vmatprep.subr.bf16.mxu0 %v11503_v43 }
 0x53f   :  { %8701 = vmatmul.mubr.msk.bf16.vlgmr.msra.gmra.mxu1 %vm4105_vm5, %v5189_v7  ;;  %v5888_v20 = vsel %vm4105_vm5, %v4473_v0, 0 }
 0x540   :  { %8711 = vmatpush3.bf16.xpose.msra.mxu1 %v5888_v20  ;;  %8712 = vmatprep.mubr.msk.bf16.mxu1 %vm9084_vm0, %v11503_v43 }
 0x543   :  { %8707 = vmatmul.mubr.msk.bf16.vlgmr.msra.gmra.mxu0 %vm4105_vm5, %v5125_v58 }
 0x544   :  { %8732 = vmatprep.mubr.msk.bf16.mxu0 %vm9084_vm0, %v11503_v43  ;;  %vm7684_vm0 = vcmask 850944  }
 0x547   :  { %8713 = vmatmul.mubr.msk.bf16.vlgmr.msra.gmra.mxu1 %vm4105_vm5, %v5193_v37 }
 0x548   :  { %7993 = vmatprep.mubr.bf16.mxu1 %v11502_v6 }
 0x5b9   :  { %v5234_v48 = vpop.f32.mrf.mxu0 }
 0x5ba   :  { %5930 = vxpose.xlu1.b32.start.end [1/1] (short) (narrow) %v5234_v48, 16 }
 0x5bb   :  { %v8624_v40 = vpop.f32.mrf.mxu0 }
 0x5bd   :  { %v5237_v24 = vpop.f32.mrf.mxu0 }
 0x5bf   :  { %v8625_v59 = vpop.f32.mrf.mxu0 }
 0x5c7   :  { %v5280_v32 = vpop.f32.mrf.mxu1 }
 0x5c8   :  { %5962 = vxpose.xlu0.b32.start.end [1/1] (short) (narrow) %v5280_v32, 16 }
 0x5c9   :  { %v8630_v33 = vpop.f32.mrf.mxu1 }
 0x5cb   :  { %v5283_v9 = vpop.f32.mrf.mxu1  ;;  %v5326_v36 = vpop.f32.mrf.mxu0 }
 0x5cd   :  { %v8631_v2 = vpop.f32.mrf.mxu1  ;;  %5994 = vxpose.xlu0.b32.start.end [1/1] (short) (narrow) %v5326_v36, 16  ;;  %v8636_v41 = vpop.f32.mrf.mxu0 }
 0x5cf   :  { %v5329_v12 = vpop.f32.mrf.mxu0 }
 0x5d1   :  { %v8637_v3 = vpop.f32.mrf.mxu0 }
 0x5d3   :  { %v5372_v60 = vpop.f32.mrf.mxu1 }
 0x5d4   :  { %6026 = vxpose.xlu1.b32.start.end [1/1] (short) (narrow) %v5372_v60, 16 }
 0x5d5   :  { %v8642_v11 = vpop.f32.mrf.mxu1 }
 0x5d7   :  { %v5375_v22 = vpop.f32.mrf.mxu1  ;;  %v5418_v6 = vpop.f32.mrf.mxu0 }
 0x5d8   :  { %6058 = vxpose.xlu0.b32.start.end [1/1] (short) (narrow) %v5418_v6, 16 }
 0x5d9   :  { %v8643_v54 = vpop.f32.mrf.mxu1  ;;  %v8648_v57 = vpop.f32.mrf.mxu0 }
 0x5db   :  { %v5421_v56 = vpop.f32.mrf.mxu0  ;;  %v5464_v16 = vpop.f32.mrf.mxu1 }
 0x5dc   :  { %6090 = vxpose.xlu1.b32.start.end [1/1] (short) (narrow) %v5464_v16, 16 }
 0x5dd   :  { %v8649_v42 = vpop.f32.mrf.mxu0  ;;  %v8654_v26 = vpop.f32.mrf.mxu1 }
 0x5df   :  { %v5467_v53 = vpop.f32.mrf.mxu1  ;;  %v5510_v35 = vpop.f32.mrf.mxu0 }
 0x5e0   :  { %6122 = vxpose.xlu0.b32.start.end [1/1] (short) (narrow) %v5510_v35, 16 }
 0x5e1   :  { %v8655_v50 = vpop.f32.mrf.mxu1  ;;  %v8660_v15 = vpop.f32.mrf.mxu0 }
 0x5e3   :  { %v5513_v8 = vpop.f32.mrf.mxu0 }
 0x5e5   :  { %v8661_v18 = vpop.f32.mrf.mxu0 }
 0x5e7   :  { %v5556_v62 = vpop.f32.mrf.mxu1 }
 0x5e8   :  { %6154 = vxpose.xlu1.b32.start.end [1/1] (short) (narrow) %v5556_v62, 16 }
 0x5e9   :  { %v8666_v55 = vpop.f32.mrf.mxu1 }
 0x5eb   :  { %v5559_v38 = vpop.f32.mrf.mxu1  ;;  %v5602_v61 = vpop.f32.mrf.mxu0 }
 0x5ec   :  { %6186 = vxpose.xlu0.b32.start.end [1/1] (short) (narrow) %v5602_v61, 16 }
 0x5ed   :  { %v8667_v52 = vpop.f32.mrf.mxu1  ;;  %v8672_v23 = vpop.f32.mrf.mxu0 }
 0x5ef   :  { %v5605_v1 = vpop.f32.mrf.mxu0  ;;  %v5648_v49 = vpop.f32.mrf.mxu1 }
 0x5f0   :  { %6218 = vxpose.xlu1.b32.start.end [1/1] (short) (narrow) %v5648_v49, 16 }
 0x5f1   :  { %v8673_v47 = vpop.f32.mrf.mxu0  ;;  %v8678_v14 = vpop.f32.mrf.mxu1 }
 0x5f3   :  { %v5651_v21 = vpop.f32.mrf.mxu1  ;;  %v5694_v10 = vpop.f32.mrf.mxu0 }
 0x5f4   :  { %6250 = vxpose.xlu0.b32.start.end [1/1] (short) (narrow) %v5694_v10, 16 }
 0x5f5   :  { %v8679_v5 = vpop.f32.mrf.mxu1  ;;  %v8684_v19 = vpop.f32.mrf.mxu0 }
 0x5f7   :  { %v5697_v39 = vpop.f32.mrf.mxu0  ;;  %v5740_v4 = vpop.f32.mrf.mxu1 }
 0x5f8   :  { %6282 = vxpose.xlu1.b32.start.end [1/1] (short) (narrow) %v5740_v4, 16 }
 0x5f9   :  { %v8685_v13 = vpop.f32.mrf.mxu0  ;;  %v8690_v31 = vpop.f32.mrf.mxu1 }
 0x5fb   :  { %v5743_v17 = vpop.f32.mrf.mxu1  ;;  %v5786_v34 = vpop.f32.mrf.mxu0 }
 0x5fc   :  { %6314 = vxpose.xlu0.b32.start.end [1/1] (short) (narrow) %v5786_v34, 16 }
 0x5fd   :  { %v8691_v44 = vpop.f32.mrf.mxu1  ;;  %v8696_v29 = vpop.f32.mrf.mxu0 }
 0x5ff   :  { %v5789_v45 = vpop.f32.mrf.mxu0  ;;  %v5832_v46 = vpop.f32.mrf.mxu1 }
 0x600   :  { %6346 = vxpose.xlu1.b32.start.end [1/1] (short) (narrow) %v5832_v46, 16 }
 0x601   :  { %v8697_v27 = vpop.f32.mrf.mxu0  ;;  %v8702_v63 = vpop.f32.mrf.mxu1 }
 0x603   :  { %v5835_v25 = vpop.f32.mrf.mxu1  ;;  %v5878_v51 = vpop.f32.mrf.mxu0 }
 0x604   :  { %6378 = vxpose.xlu0.b32.start.end [1/1] (short) (narrow) %v5878_v51, 16 }
 0x605   :  { %v8703_v7 = vpop.f32.mrf.mxu1  ;;  %v8708_v0 = vpop.f32.mrf.mxu0 }
 0x607   :  { %v5881_v20 = vpop.f32.mrf.mxu0  ;;  %v5924_v58 = vpop.f32.mrf.mxu1 }
 0x608   :  { %6410 = vxpose.xlu1.b32.start.end [1/1] (short) (narrow) %v5924_v58, 16 }
 0x609   :  { %v8709_v37 = vpop.f32.mrf.mxu0  ;;  %v8714_v48 = vpop.f32.mrf.mxu1 }
 0x60b   :  { %v5927_v40 = vpop.f32.mrf.mxu1 }
 0x60d   :  { %v8715_v24 = vpop.f32.mrf.mxu1 }
 0x636   :  { %v5946_v32 = vpop.trf.xlu1 }
 0x63a   :  { %v5947_v9 = vpop.trf.xlu1 }
 0x644   :  { %v5978_v59 = vpop.trf.xlu0 }
 0x648   :  { %v5979_v33 = vpop.trf.xlu0 }
 0x64c   :  { %v6010_v36 = vpop.trf.xlu0 }
 0x64d   :  { %v6442_v2 = vcombine.low %v5946_v32, %v6010_v36  ;;  %v6443_v41 = vcombine.high %v5946_v32, %v6010_v36 }
 0x64f   :  { %v6450_v22 = vrot.slane %v6442_v2, %v9438_v28  ;;  %v6457_v6 = vrot.slane %v6443_v41, %v9438_v28 }
 0x650   :  { %v6042_v12 = vpop.trf.xlu1  ;;  %v6011_v3 = vpop.trf.xlu0 }
 0x651   :  { %v6458_v60 = vcombine.low %v5978_v59, %v6042_v12  ;;  %v6459_v11 = vcombine.high %v5978_v59, %v6042_v12  ;;  %v6714_v56 = vcombine.low %v5947_v9, %v6011_v3  ;;  %v6715_v16 = vcombine.high %v5947_v9, %v6011_v3 }
 0x653   :  { %v6466_v54 = vrot.slane %v6458_v60, %v9438_v28  ;;  %v6473_v57 = vrot.slane %v6459_v11, %v9438_v28  ;;  %v6722_v52 = vrot.slane %v6714_v56, %v9438_v28  ;;  %v6729_v23 = vrot.slane %v6715_v16, %v9438_v28 }
 0x654   :  { %v6043_v42 = vpop.trf.xlu1  ;;  %v11032_v26 = vpop.trf.xlu0 }
 0x655   :  { %v6506_v53 = vcombine.low %v6450_v22, %v6466_v54  ;;  %v6507_v35 = vcombine.high %v6450_v22, %v6466_v54  ;;  %v6522_v50 = vcombine.low %v6457_v6, %v6473_v57  ;;  %v6523_v15 = vcombine.high %v6457_v6, %v6473_v57 }
 0x656   :  { %v6730_v8 = vcombine.low %v5979_v33, %v6043_v42  ;;  %v6731_v18 = vcombine.high %v5979_v33, %v6043_v42 }
 0x657   :  { %v6514_v62 = vrot.slane %v6506_v53, %v9450_v30  ;;  %v6521_v55 = vrot.slane %v6507_v35, %v9450_v30  ;;  %v6530_v38 = vrot.slane %v6522_v50, %v9450_v30  ;;  %v6537_v61 = vrot.slane %v6523_v15, %v9450_v30 }
 0x658   :  { %v6738_v1 = vrot.slane %v6730_v8, %v9438_v28  ;;  %v6745_v49 = vrot.slane %v6731_v18, %v9438_v28  ;;  %v11042_v47 = vpop.trf.xlu0  ;;  %v6106_v14 = vpop.trf.xlu1 }
 0x659   :  { %v8322_v21 = vcombine.low %v6514_v62, %v6521_v55  ;;  %v8324_v10 = vcombine.high %v6514_v62, %v6521_v55  ;;  %v8326_v5 = vcombine.low %v6530_v38, %v6537_v61  ;;  %v8328_v19 = vcombine.high %v6530_v38, %v6537_v61 }
 0x65a   :  { %v6778_v39 = vcombine.low %v6722_v52, %v6738_v1  ;;  %v6779_v4 = vcombine.high %v6722_v52, %v6738_v1  ;;  %v6794_v13 = vcombine.low %v6729_v23, %v6745_v49  ;;  %v6795_v31 = vcombine.high %v6729_v23, %v6745_v49 }
 0x65b   :  { %v6994_v17 = vrot.slane %v8322_v21, %v9438_v28  ;;  %v7010_v34 = vrot.slane %v8324_v10, %v9438_v28  ;;  %v7026_v44 = vrot.slane %v8326_v5, %v9438_v28  ;;  %v7042_v29 = vrot.slane %v8328_v19, %v9438_v28 }
 0x65c   :  { %v6786_v45 = vrot.slane %v6778_v39, %v9450_v30  ;;  %v6793_v46 = vrot.slane %v6779_v4, %v9450_v30  ;;  %v6802_v27 = vrot.slane %v6794_v13, %v9450_v30  ;;  %v6809_v63 = vrot.slane %v6795_v31, %v9450_v30  ;;  %v6138_v25 = vpop.trf.xlu0  ;;  %v6107_v48 = vpop.trf.xlu1 }
 0x65d   :  { %v7051_v51 = vcombine.high %v6994_v17, %v7010_v34  ;;  %v7083_v7 = vcombine.high %v7026_v44, %v7042_v29  ;;  %v6474_v40 = vcombine.low %v11032_v26, %v6138_v25  ;;  %v6475_v36 = vcombine.high %v11032_v26, %v6138_v25 }
 0x65e   :  { %v8330_v0 = vcombine.low %v6786_v45, %v6793_v46  ;;  %v8332_v20 = vcombine.high %v6786_v45, %v6793_v46  ;;  %v8334_v58 = vcombine.low %v6802_v27, %v6809_v63  ;;  %v8336_v37 = vcombine.high %v6802_v27, %v6809_v63 }
 0x65f   :  { %v7065_v2 = vrot.slane %v7051_v51, %v9450_v30  ;;  %v7097_v41 = vrot.slane %v7083_v7, %v9450_v30  ;;  %v7050_v12 = vcombine.low %v6994_v17, %v7010_v34  ;;  %v7082_v11 = vcombine.low %v7026_v44, %v7042_v29 }
 0x660   :  { %v7130_v24 = vrot.slane %v8330_v0, %v9438_v28  ;;  %v7146_v59 = vrot.slane %v8332_v20, %v9438_v28  ;;  %v7162_v32 = vrot.slane %v8334_v58, %v9438_v28  ;;  %v7178_v33 = vrot.slane %v8336_v37, %v9438_v28  ;;  %v6139_v9 = vpop.trf.xlu0 }
 0x661   :  { %v6482_v6 = vrot.slane %v6474_v40, %v9438_v28  ;;  %v6746_v54 = vcombine.low %v11042_v47, %v6139_v9  ;;  %v11063_v57 = vrot.slane %v7050_v12, %v9450_v30  ;;  %v11068_v53 = vrot.slane %v7082_v11, %v9450_v30 }
 0x662   :  { %v7187_v3 = vcombine.high %v7130_v24, %v7146_v59  ;;  %v7219_v60 = vcombine.high %v7162_v32, %v7178_v33  ;;  %v7186_v22 = vcombine.low %v7130_v24, %v7146_v59  ;;  %v7218_v56 = vcombine.low %v7162_v32, %v7178_v33 }
 0x663   :  { %v6489_v50 = vrot.slane %v6475_v36, %v9438_v28  ;;  %v6747_v62 = vcombine.high %v11042_v47, %v6139_v9  ;;  %v7116_v55 = vcombine.low %v7065_v2, %v7097_v41  ;;  %v7114_v61 = vcombine.low %v11063_v57, %v11068_v53 }
 0x664   :  { %v6170_v16 = vpop.trf.xlu1  ;;  %v7201_v42 = vrot.slane %v7187_v3, %v9450_v30  ;;  %v7233_v26 = vrot.slane %v7219_v60, %v9450_v30  ;;  %v11071_v35 = vrot.slane %v7186_v22, %v9450_v30  ;;  %v11075_v18 = vrot.slane %v7218_v56, %v9450_v30 }
 0x665   :  { %v6490_v15 = vcombine.low %v6106_v14, %v6170_v16  ;;  %v6491_v8 = vcombine.high %v6106_v14, %v6170_v16  ;;  %v6754_v14 = vrot.slane %v6746_v54, %v9438_v28  ;;  %v7115_v5 = vcombine.high %v11063_v57, %v11068_v53 }
 0x666   :  { %v7252_v38 = vcombine.low %v7201_v42, %v7233_v26  ;;  %v7251_v1 = vcombine.high %v11071_v35, %v11075_v18  ;;  %v7250_v49 = vcombine.low %v11071_v35, %v11075_v18  ;;  %v7253_v19 = vcombine.high %v7201_v42, %v7233_v26 }
 0x667   :  { %v6498_v52 = vrot.slane %v6490_v15, %v9438_v28  ;;  %v6505_v23 = vrot.slane %v6491_v8, %v9438_v28  ;;  %v7117_v29 = vcombine.high %v7065_v2, %v7097_v41  ;;  %v6761_v25 = vrot.slane %v6747_v62, %v9438_v28 }
 0x668   :  { %v6202_v21 = vpop.trf.xlu0  ;;  %v6171_v10 = vpop.trf.xlu1  ;;  %v8764_v47 = vpack.i.bf16 %v7252_v38, %v7116_v55  ;;  %v8759_v44 = vpack.i.bf16 %v7251_v1, %v7115_v5 }
 0x669   :  { %v6538_v39 = vcombine.low %v6482_v6, %v6498_v52  ;;  %v6539_v4 = vcombine.high %v6482_v6, %v6498_v52  ;;  %v6554_v13 = vcombine.low %v6489_v50, %v6505_v23  ;;  %v6555_v31 = vcombine.high %v6489_v50, %v6505_v23 }
 0x66a   :  { %v6762_v17 = vcombine.low %v6107_v48, %v6171_v10  ;;  %v6763_v34 = vcombine.high %v6107_v48, %v6171_v10  ;;  %8765 = vrot.lane.b32.xlu1 %v8764_v47, %s9090_s28  ;;  %8760 = vrot.lane.b32.xlu0 %v8759_v44, %s9091_s17  ;;  %v8769_v58 = vpack.i.bf16 %v7253_v19, %v7117_v29 }
 0x66b   :  { %v6546_v45 = vrot.slane %v6538_v39, %v9450_v30  ;;  %v6553_v46 = vrot.slane %v6539_v4, %v9450_v30  ;;  %v6562_v27 = vrot.slane %v6554_v13, %v9450_v30  ;;  %v6569_v63 = vrot.slane %v6555_v31, %v9450_v30 }
 0x66c   :  { %v6770_v51 = vrot.slane %v6762_v17, %v9438_v28  ;;  %v6777_v7 = vrot.slane %v6763_v34, %v9438_v28  ;;  %v6203_v0 = vpop.trf.xlu0  ;;  %v6234_v20 = vpop.trf.xlu1 }
 0x66d   :  { %v8323_v37 = vcombine.low %v6546_v45, %v6553_v46  ;;  %v8325_v48 = vcombine.high %v6546_v45, %v6553_v46  ;;  %v8327_v40 = vcombine.low %v6562_v27, %v6569_v63  ;;  %v8329_v24 = vcombine.high %v6562_v27, %v6569_v63 }
 0x66e   :  { %v6810_v59 = vcombine.low %v6754_v14, %v6770_v51  ;;  %v6811_v32 = vcombine.high %v6754_v14, %v6770_v51  ;;  %v6826_v33 = vcombine.low %v6761_v25, %v6777_v7  ;;  %v6827_v9 = vcombine.high %v6761_v25, %v6777_v7  ;;  %8770 = vrot.lane.b32.xlu1 %v8769_v58, %s9089_s27 }
 0x66f   :  { %v11100_v36 = vrot.slane %v8323_v37, %v9438_v28  ;;  %v11103_v2 = vrot.slane %v8325_v48, %v9438_v28  ;;  %v11106_v41 = vrot.slane %v8327_v40, %v9438_v28  ;;  %v11109_v12 = vrot.slane %v8329_v24, %v9438_v28 }
 0x670   :  { %v6818_v3 = vrot.slane %v6810_v59, %v9450_v30  ;;  %v6825_v60 = vrot.slane %v6811_v32, %v9450_v30  ;;  %v6834_v11 = vrot.slane %v6826_v33, %v9450_v30  ;;  %v6841_v22 = vrot.slane %v6827_v9, %v9450_v30  ;;  %v6266_v6 = vpop.trf.xlu0  ;;  %v6235_v54 = vpop.trf.xlu1 }
 0x671   :  { %v6578_v56 = vcombine.low %v6202_v21, %v6266_v6  ;;  %v6579_v16 = vcombine.high %v6202_v21, %v6266_v6  ;;  %v7066_v42 = vcombine.low %v11100_v36, %v11103_v2  ;;  %v7098_v26 = vcombine.low %v11106_v41, %v11109_v12 }
 0x672   :  { %v8331_v50 = vcombine.low %v6818_v3, %v6825_v60  ;;  %v8333_v15 = vcombine.high %v6818_v3, %v6825_v60  ;;  %v8335_v8 = vcombine.low %v6834_v11, %v6841_v22  ;;  %v8337_v62 = vcombine.high %v6834_v11, %v6841_v22 }
 0x673   :  { %v6586_v55 = vrot.slane %v6578_v56, %v9438_v28  ;;  %v6593_v38 = vrot.slane %v6579_v16, %v9438_v28  ;;  %v7074_v52 = vrot.slane %v7066_v42, %v9450_v30  ;;  %v7106_v23 = vrot.slane %v7098_v26, %v9450_v30 }
 0x674   :  { %v11124_v1 = vrot.slane %v8331_v50, %v9438_v28  ;;  %v11127_v14 = vrot.slane %v8333_v15, %v9438_v28  ;;  %v11130_v21 = vrot.slane %v8335_v8, %v9438_v28  ;;  %v11133_v10 = vrot.slane %v8337_v62, %v9438_v28  ;;  %v6267_v47 = vpop.trf.xlu0  ;;  %v6298_v5 = vpop.trf.xlu1 }
 0x675   :  { %v6850_v19 = vcombine.low %v6203_v0, %v6267_v47  ;;  %v6851_v39 = vcombine.high %v6203_v0, %v6267_v47  ;;  %v6594_v4 = vcombine.low %v6234_v20, %v6298_v5  ;;  %v6595_v13 = vcombine.high %v6234_v20, %v6298_v5 }
 0x676   :  { %v7119_v31 = vcombine.high %v7074_v52, %v7106_v23  ;;  %v7202_v17 = vcombine.low %v11124_v1, %v11127_v14  ;;  %v7234_v34 = vcombine.low %v11130_v21, %v11133_v10  ;;  %v7118_v44 = vcombine.low %v7074_v52, %v7106_v23 }
 0x677   :  { %v6858_v29 = vrot.slane %v6850_v19, %v9438_v28  ;;  %v6865_v45 = vrot.slane %v6851_v39, %v9438_v28  ;;  %v6602_v46 = vrot.slane %v6594_v4, %v9438_v28  ;;  %v6609_v27 = vrot.slane %v6595_v13, %v9438_v28 }
 0x678   :  { %v6330_v63 = vpop.trf.xlu0  ;;  %v6299_v25 = vpop.trf.xlu1  ;;  %v7210_v51 = vrot.slane %v7202_v17, %v9450_v30  ;;  %v7242_v7 = vrot.slane %v7234_v34, %v9450_v30  ;;  %v7067_v0 = vcombine.high %v11100_v36, %v11103_v2  ;;  %v7099_v20 = vcombine.high %v11106_v41, %v11109_v12 }
 0x679   :  { %v6642_v58 = vcombine.low %v6586_v55, %v6602_v46  ;;  %v6643_v37 = vcombine.high %v6586_v55, %v6602_v46  ;;  %v6658_v48 = vcombine.low %v6593_v38, %v6609_v27  ;;  %v6659_v40 = vcombine.high %v6593_v38, %v6609_v27  ;;  %v8866_v27 = vld [vmem:[%s11466_s3 + $0x38] sm:$0xff]  }
 0x67a   :  { %v6866_v24 = vcombine.low %v6235_v54, %v6299_v25  ;;  %v6867_v59 = vcombine.high %v6235_v54, %v6299_v25  ;;  %v7255_v32 = vcombine.high %v7210_v51, %v7242_v7  ;;  %v7254_v33 = vcombine.low %v7210_v51, %v7242_v7  ;;  %8717 = vmatpush3.bf16.msra.mxu0 %v8866_v27 }
 0x67b   :  { %v6650_v9 = vrot.slane %v6642_v58, %v9450_v30  ;;  %v6657_v3 = vrot.slane %v6643_v37, %v9450_v30  ;;  %v6666_v60 = vrot.slane %v6658_v48, %v9450_v30  ;;  %v6673_v11 = vrot.slane %v6659_v40, %v9450_v30  ;;  %8718 = vmatprep.subr.bf16.mxu0 %v11503_v43 }
 0x67c   :  { %v6874_v36 = vrot.slane %v6866_v24, %v9438_v28  ;;  %v6881_v2 = vrot.slane %v6867_v59, %v9438_v28  ;;  %v6331_v41 = vpop.trf.xlu0  ;;  %v6362_v12 = vpop.trf.xlu1  ;;  %v8779_v22 = vpack.i.bf16 %v7255_v32, %v7119_v31  ;;  %v8774_v6 = vpack.i.bf16 %v7254_v33, %v7118_v44  ;;  %v8867_v24 = vld [vmem:[%s11466_s3 + $0x30] sm:$0xff]  }
 0x67d   :  { %v8338_v56 = vcombine.low %v6650_v9, %v6657_v3  ;;  %v8340_v54 = vcombine.high %v6650_v9, %v6657_v3  ;;  %v8342_v16 = vcombine.low %v6666_v60, %v6673_v11  ;;  %v8344_v42 = vcombine.high %v6666_v60, %v6673_v11 }
 0x67e   :  { %v6914_v26 = vcombine.low %v6858_v29, %v6874_v36  ;;  %v6915_v50 = vcombine.high %v6858_v29, %v6874_v36  ;;  %v6930_v15 = vcombine.low %v6865_v45, %v6881_v2  ;;  %v6931_v8 = vcombine.high %v6865_v45, %v6881_v2  ;;  %8780 = vrot.lane.b32.xlu0 %v8779_v22, %s9087_s25 }
 0x67f   :  { %v11157_v62 = vrot.slane %v8338_v56, %v9438_v28  ;;  %v11160_v55 = vrot.slane %v8340_v54, %v9438_v28  ;;  %v11163_v38 = vrot.slane %v8342_v16, %v9438_v28  ;;  %v11166_v52 = vrot.slane %v8344_v42, %v9438_v28  ;;  %8775 = vrot.lane.b32.xlu1 %v8774_v6, %s9088_s26 }
 0x680   :  { %v6922_v23 = vrot.slane %v6914_v26, %v9450_v30  ;;  %v6929_v47 = vrot.slane %v6915_v50, %v9450_v30  ;;  %v6938_v5 = vrot.slane %v6930_v15, %v9450_v30  ;;  %v6945_v19 = vrot.slane %v6931_v8, %v9450_v30  ;;  %v6394_v39 = vpop.trf.xlu0  ;;  %v6363_v4 = vpop.trf.xlu1  ;;  %8719 = vmatpush3.bf16.msra.mxu0 %v8867_v24 }
 0x681   :  { %v6610_v13 = vcombine.low %v6330_v63, %v6394_v39  ;;  %v6611_v31 = vcombine.high %v6330_v63, %v6394_v39  ;;  %v7081_v17 = vrot.slane %v7067_v0, %v9450_v30  ;;  %v7113_v34 = vrot.slane %v7099_v20, %v9450_v30  ;;  %8720 = vmatprep.subr.bf16.mxu0 %v11503_v43 }
 0x682   :  { %v8346_v44 = vcombine.low %v6922_v23, %v6929_v47  ;;  %v8348_v29 = vcombine.high %v6922_v23, %v6929_v47  ;;  %v8350_v45 = vcombine.low %v6938_v5, %v6945_v19  ;;  %v8352_v46 = vcombine.high %v6938_v5, %v6945_v19 }
 0x683   :  { %v6618_v25 = vrot.slane %v6610_v13, %v9438_v28  ;;  %v6625_v51 = vrot.slane %v6611_v31, %v9438_v28  ;;  %v7121_v7 = vcombine.high %v7081_v17, %v7113_v34  ;;  %v7203_v63 = vcombine.high %v11124_v1, %v11127_v14 }
 0x684   :  { %v11183_v0 = vrot.slane %v8346_v44, %v9438_v28  ;;  %v11186_v20 = vrot.slane %v8348_v29, %v9438_v28  ;;  %v11189_v58 = vrot.slane %v8350_v45, %v9438_v28  ;;  %v11192_v37 = vrot.slane %v8352_v46, %v9438_v28  ;;  %v6395_v48 = vpop.trf.xlu0  ;;  %v6426_v40 = vpop.trf.xlu1 }
 0x685   :  { %v7217_v1 = vrot.slane %v7203_v63, %v9450_v30  ;;  %v7235_v14 = vcombine.high %v11130_v21, %v11133_v10  ;;  %v7120_v59 = vcombine.low %v7081_v17, %v7113_v34  ;;  %v6882_v32 = vcombine.low %v6331_v41, %v6395_v48 }
 0x686   :  { %v6883_v33 = vcombine.high %v6331_v41, %v6395_v48  ;;  %v6626_v9 = vcombine.low %v6362_v12, %v6426_v40  ;;  %v6627_v3 = vcombine.high %v6362_v12, %v6426_v40  ;;  %v7322_v60 = vcombine.low %v11157_v62, %v11160_v55  ;;  %v8868_v48 = vld [vmem:[%s11466_s3 + $0x28] sm:$0xff]  }
 0x687   :  { %v7249_v11 = vrot.slane %v7235_v14, %v9450_v30  ;;  %v6890_v36 = vrot.slane %v6882_v32, %v9438_v28  ;;  %v7354_v2 = vcombine.low %v11163_v38, %v11166_v52  ;;  %v7458_v21 = vcombine.low %v11183_v0, %v11186_v20  ;;  %8721 = vmatpush3.bf16.msra.mxu0 %v8868_v48 }
 0x688   :  { %v6897_v10 = vrot.slane %v6883_v33, %v9438_v28  ;;  %v6634_v22 = vrot.slane %v6626_v9, %v9438_v28  ;;  %v6641_v41 = vrot.slane %v6627_v3, %v9438_v28  ;;  %v6427_v12 = vpop.trf.xlu1  ;;  %v11213_v6 = vrot.slane %v7322_v60, %v9450_v30  ;;  %8722 = vmatprep.subr.bf16.mxu0 %v11503_v43 }
 0x689   :  { %v7257_v56 = vcombine.high %v7217_v1, %v7249_v11  ;;  %v7256_v54 = vcombine.low %v7217_v1, %v7249_v11  ;;  %v6898_v16 = vcombine.low %v6363_v4, %v6427_v12  ;;  %v6899_v42 = vcombine.high %v6363_v4, %v6427_v12 }
 0x68a   :  { %v6674_v26 = vcombine.low %v6618_v25, %v6634_v22  ;;  %v6675_v50 = vcombine.high %v6618_v25, %v6634_v22  ;;  %v6690_v15 = vcombine.low %v6625_v51, %v6641_v41  ;;  %v6691_v8 = vcombine.high %v6625_v51, %v6641_v41 }
 0x68b   :  { %v8789_v23 = vpack.i.bf16 %v7257_v56, %v7121_v7  ;;  %v8784_v47 = vpack.i.bf16 %v7256_v54, %v7120_v59  ;;  %v6906_v5 = vrot.slane %v6898_v16, %v9438_v28  ;;  %v6913_v19 = vrot.slane %v6899_v42, %v9438_v28  ;;  %v8870_v42 = vld [vmem:[%s11466_s3 + $0x18] sm:$0xff]  }
 0x68c   :  { %v6682_v39 = vrot.slane %v6674_v26, %v9450_v30  ;;  %v6689_v13 = vrot.slane %v6675_v50, %v9450_v30  ;;  %v6698_v31 = vrot.slane %v6690_v15, %v9450_v30  ;;  %v6705_v4 = vrot.slane %v6691_v8, %v9450_v30 }
 0x68d   :  { %8790 = vrot.lane.b32.xlu0 %v8789_v23, %s9085_s24  ;;  %8785 = vrot.lane.b32.xlu1 %v8784_v47, %s9086_s1  ;;  %v6946_v17 = vcombine.low %v6890_v36, %v6906_v5  ;;  %v6947_v34 = vcombine.high %v6890_v36, %v6906_v5  ;;  %v6962_v44 = vcombine.low %v6897_v10, %v6913_v19  ;;  %s9095_s1 = smov [#allocation2]  }
 0x68e   :  { %v8339_v29 = vcombine.low %v6682_v39, %v6689_v13  ;;  %v8341_v45 = vcombine.high %v6682_v39, %v6689_v13  ;;  %v8343_v46 = vcombine.low %v6698_v31, %v6705_v4  ;;  %v8345_v27 = vcombine.high %v6698_v31, %v6705_v4  ;;  %v8871_v31 = vld [vmem:[%s11466_s3 + $0x10] sm:$0xff]   ;;  %s8239_s27 = sshll.u32 %s9095_s1, 4  ;;  %s8240_s27 = int_to_ptr.vmem [resolvable:$true] %s8239_s27 }
 0x68f   :  { %v6954_v25 = vrot.slane %v6946_v17, %v9450_v30  ;;  %v6961_v51 = vrot.slane %v6947_v34, %v9450_v30  ;;  %v6963_v7 = vcombine.high %v6897_v10, %v6913_v19  ;;  %v6970_v63 = vrot.slane %v6962_v44, %v9450_v30  ;;  %s9052_s28 = scalar_lea.vmem %s8240_s27, 256  ;;  %p9057_p1 = scmp.lt.s32.totalorder %s8240_s27, %s8240_s27 }
 0x690   :  { %v11231_v40 = vrot.slane %v8339_v29, %v9438_v28  ;;  %v11234_v24 = vrot.slane %v8341_v45, %v9438_v28  ;;  %v11237_v1 = vrot.slane %v8343_v46, %v9438_v28  ;;  %v11240_v14 = vrot.slane %v8345_v27, %v9438_v28  ;;  %p9053_p0 = scmp.ne.s32.totalorder %s8240_s27, %s9052_s28  ;;  %p9058_p2 = scmp.lt.s32.totalorder %s9052_s28, %s9052_s28 }
 0x691   :  { %v6977_v59 = vrot.slane %v6963_v7, %v9450_v30  ;;  %v8347_v32 = vcombine.low %v6954_v25, %v6961_v51  ;;  %v8349_v33 = vcombine.high %v6954_v25, %v6961_v51  ;;  %v7362_v9 = vrot.slane %v7354_v2, %v9450_v30 }
 0x692   :  { %v7466_v3 = vrot.slane %v7458_v21, %v9450_v30  ;;  %v7490_v60 = vcombine.low %v11189_v58, %v11192_v37  ;;  %v7323_v11 = vcombine.high %v11157_v62, %v11160_v55  ;;  %v7355_v36 = vcombine.high %v11163_v38, %v11166_v52  ;;  %v8869_v21 = vld [vmem:[%s11466_s3 + $0x20] sm:$0xff]   ;;  %p9059_p3 = por %p9058_p2, %p9057_p1 }
 0x693   :  { %v7409_v10 = vrot.slane %v8347_v32, %v9438_v28  ;;  %v7425_v22 = vrot.slane %v8349_v33, %v9438_v28  ;;  %v8351_v41 = vcombine.low %v6970_v63, %v6977_v59  ;;  %v8353_v2 = vcombine.high %v6970_v63, %v6977_v59  ;;  %8723 = vmatpush3.bf16.msra.mxu0 %v8869_v21 }
 0x694   :  { %v7387_v12 = vcombine.high %v11213_v6, %v7362_v9  ;;  %v7498_v56 = vrot.slane %v7490_v60, %v9450_v30  ;;  %v7386_v62 = vcombine.low %v11213_v6, %v7362_v9  ;;  %v7337_v55 = vrot.slane %v7323_v11, %v9450_v30  ;;  %8724 = vmatprep.subr.bf16.mxu0 %v11503_v43  ;;  %v8873_v60 = vld [vmem:[%s11466_s3] sm:$0xff]   ;;  %p9060_p4 = pnand %p9059_p3, %p9053_p0 }
 0x695   :  { %v7441_v38 = vrot.slane %v8351_v41, %v9438_v28  ;;  %v7457_v52 = vrot.slane %v8353_v2, %v9438_v28  ;;  %v7369_v54 = vrot.slane %v7355_v36, %v9450_v30  ;;  %v7459_v16 = vcombine.high %v11183_v0, %v11186_v20 }
 0x696   :  { %v7523_v26 = vcombine.high %v7466_v3, %v7498_v56  ;;  %v7522_v50 = vcombine.low %v7466_v3, %v7498_v56  ;;  %v7491_v6 = vcombine.high %v11189_v58, %v11192_v37  ;;  %v7338_v15 = vcombine.low %v11231_v40, %v11234_v24 }
 0x697   :  { %v7389_v28 = vcombine.high %v7337_v55, %v7369_v54  ;;  %v7473_v8 = vrot.slane %v7459_v16, %v9450_v30  ;;  %v7388_v23 = vcombine.low %v7337_v55, %v7369_v54  ;;  %v7370_v0 = vcombine.low %v11237_v1, %v11240_v14  ;;  %8725 = vmatpush3.bf16.msra.mxu0 %v8870_v42 }
 0x698   :  { %v8799_v20 = vpack.i.bf16 %v7523_v26, %v7387_v12  ;;  %v8794_v47 = vpack.i.bf16 %v7522_v50, %v7386_v62  ;;  %v7505_v5 = vrot.slane %v7491_v6, %v9450_v30  ;;  %v7346_v19 = vrot.slane %v7338_v15, %v9450_v30  ;;  %8726 = vmatprep.subr.bf16.mxu0 %v11503_v43 }
 0x699   :  { %v7378_v58 = vrot.slane %v7370_v0, %v9450_v30  ;;  %v7474_v37 = vcombine.low %v7409_v10, %v7425_v22  ;;  %v7506_v39 = vcombine.low %v7441_v38, %v7457_v52  ;;  %v7339_v13 = vcombine.high %v11231_v40, %v11234_v24  ;;  %v8872_v40 = vld [vmem:[%s11466_s3 + $0x8] sm:$0xff]  }
 0x69a   :  { %8800 = vrot.lane.b32.xlu0 %v8799_v20, %s9081_s19  ;;  %8795 = vrot.lane.b32.xlu1 %v8794_v47, %s9083_s23  ;;  %v7525_v4 = vcombine.high %v7473_v8, %v7505_v5  ;;  %v7524_v17 = vcombine.low %v7473_v8, %v7505_v5  ;;  %v7371_v34 = vcombine.high %v11237_v1, %v11240_v14 }
 0x69b   :  { %v7482_v44 = vrot.slane %v7474_v37, %v9450_v30  ;;  %v7514_v29 = vrot.slane %v7506_v39, %v9450_v30  ;;  %v7391_v27 = vcombine.high %v7346_v19, %v7378_v58  ;;  %v7390_v25 = vcombine.low %v7346_v19, %v7378_v58  ;;  %8727 = vmatpush3.bf16.msra.mxu0 %v8871_v31 }
 0x69c   :  { %v8809_v45 = vpack.i.bf16 %v7525_v4, %v7389_v28  ;;  %v8804_v46 = vpack.i.bf16 %v7524_v17, %v7388_v23  ;;  %v7475_v63 = vcombine.high %v7409_v10, %v7425_v22  ;;  %v7507_v48 = vcombine.high %v7441_v38, %v7457_v52  ;;  %8728 = vmatprep.subr.bf16.mxu0 %v11503_v43 }
 0x69d   :  { %v7527_v51 = vcombine.high %v7482_v44, %v7514_v29  ;;  %v7526_v7 = vcombine.low %v7482_v44, %v7514_v29  ;;  %v7353_v24 = vrot.slane %v7339_v13, %v9450_v30  ;;  %v7385_v1 = vrot.slane %v7371_v34, %v9450_v30 }
 0x69e   :  { %8810 = vrot.lane.b32.xlu0 %v8809_v45, %s9079_s15  ;;  %8805 = vrot.lane.b32.xlu1 %v8804_v46, %s9080_s16  ;;  %v7489_v32 = vrot.slane %v7475_v63, %v9450_v30  ;;  %v7521_v33 = vrot.slane %v7507_v48, %v9450_v30 }
 0x69f   :  { %v8819_v14 = vpack.i.bf16 %v7527_v51, %v7391_v27  ;;  %v8814_v59 = vpack.i.bf16 %v7526_v7, %v7390_v25  ;;  %8729 = vmatpush3.bf16.msra.mxu0 %v8872_v40  ;;  %v7393_v11 = vcombine.high %v7353_v24, %v7385_v1  ;;  %v7392_v36 = vcombine.low %v7353_v24, %v7385_v1 }
 0x6a0   :  { %v7529_v9 = vcombine.high %v7489_v32, %v7521_v33  ;;  %v7528_v3 = vcombine.low %v7489_v32, %v7521_v33  ;;  %8730 = vmatprep.subr.bf16.mxu0 %v11503_v43 }
 0x6a2   :  { %8820 = vrot.lane.b32.xlu0 %v8819_v14, %s9075_s29  ;;  %8815 = vrot.lane.b32.xlu1 %v8814_v59, %s9077_s2  ;;  %v8829_v10 = vpack.i.bf16 %v7529_v9, %v7393_v11  ;;  %v8824_v22 = vpack.i.bf16 %v7528_v3, %v7392_v36 }
 0x6a3   :  { %8731 = vmatpush3.bf16.msra.mxu0 %v8873_v60 }
 0x6a6   :  { %8830 = vrot.lane.b32.xlu0 %v8829_v10, %s9076_s30  ;;  %8825 = vrot.lane.b32.xlu1 %v8824_v22, %s9078_s14 }
 0x6dc   :  { %v8766_v30 = vpop.permute.xlu1 %8765  ;;  %v8761_v2 = vpop.permute.xlu0 %8760 }
 0x6dd   :  { %v8763_v21 = vunpack.i.h.bf16 %v8761_v2  ;;  %v8762_v12 = vunpack.i.l.bf16 %v8761_v2  ;;  %v8768_v62 = vunpack.i.h.bf16 %v8766_v30  ;;  %v8767_v55 = vunpack.i.l.bf16 %v8766_v30 }
 0x6df   :  { %v7650_v43 = vsel %vm3351_vm2, %v7114_v61, %v8762_v12  ;;  %v7651_v52 = vsel %vm3351_vm2, %v7250_v49, %v8763_v21  ;;  %vm7690_vm2 = vcmask 982016  }
 0x6e0   :  { %v8771_v41 = vpop.permute.xlu1 %8770  ;;  %v7653_v6 = vsel %vm4105_vm5, %v7651_v52, %v8768_v62  ;;  %v7652_v15 = vsel %vm4105_vm5, %v7650_v43, %v8767_v55 }
 0x6e1   :  { %v8773_v54 = vunpack.i.h.bf16 %v8771_v41  ;;  %v8772_v16 = vunpack.i.l.bf16 %v8771_v41 }
 0x6e3   :  { %v7655_v57 = vsel %vm7654_vm6, %v7652_v15, %v8772_v16  ;;  %v7656_v53 = vsel %vm7654_vm6, %v7653_v6, %v8773_v54  ;;  %v8354_v16 = vld [vmem:[%s11467_s4] ss:$0 sm:$0xff] }
 0x6e4   :  { %v9050_v6 = vld [vmem:[%s11463_s0] sm:$0xff] }
 0x6f0   :  { %v8781_v38 = vpop.permute.xlu0 %8780 }
 0x6f1   :  { %v8776_v56 = vpop.permute.xlu1 %8775  ;;  %v8783_v61 = vunpack.i.h.bf16 %v8781_v38  ;;  %v8782_v28 = vunpack.i.l.bf16 %v8781_v38 }
 0x6f2   :  { %v8778_v42 = vunpack.i.h.bf16 %v8776_v56  ;;  %v8777_v26 = vunpack.i.l.bf16 %v8776_v56 }
 0x6f4   :  { %v7658_v8 = vsel %vm7657_vm7, %v7655_v57, %v8777_v26  ;;  %v7659_v35 = vsel %vm7657_vm7, %v7656_v53, %v8778_v42 }
 0x6f5   :  { %v7661_v47 = vsel %vm7660_vm8, %v7658_v8, %v8782_v28  ;;  %v7662_v5 = vsel %vm7660_vm8, %v7659_v35, %v8783_v61  ;;  %v9051_v28 = vld [vmem:[%s11463_s0 + $0x8] sm:$0xff] }
 0x6ff   :  { %v8786_v50 = vpop.permute.xlu1 %8785  ;;  %v8791_v18 = vpop.permute.xlu0 %8790 }
 0x700   :  { %v8788_v49 = vunpack.i.h.bf16 %v8786_v50  ;;  %v8787_v23 = vunpack.i.l.bf16 %v8786_v50  ;;  %v8793_v0 = vunpack.i.h.bf16 %v8791_v18  ;;  %v8792_v20 = vunpack.i.l.bf16 %v8791_v18 }
 0x702   :  { %v7664_v19 = vsel %vm7663_vm9, %v7661_v47, %v8787_v23  ;;  %v7665_v58 = vsel %vm7663_vm9, %v7662_v5, %v8788_v49  ;;  %v8874_v49 = vld [vmem:[%s11470_s7 + $0x70] ss:$8 sps:$4 sm:$0xff]   ;;  %v8876_v23 = vld [vmem:[%s11470_s7 + $0x74] ss:$8 sps:$4 sm:$0xff]  }
 0x703   :  { %v7667_v34 = vsel %vm7666_vm10, %v7664_v19, %v8792_v20  ;;  %v7668_v44 = vsel %vm7666_vm10, %v7665_v58, %v8793_v0  ;;  %7961 = vmatprep.subr.bf16.mxu1 %v8876_v23  ;;  %v8877_v0 = vld [vmem:[%s11470_s7 + $0x60] ss:$8 sps:$4 sm:$0xff]   ;;  %v8879_v20 = vld [vmem:[%s11470_s7 + $0x64] ss:$8 sps:$4 sm:$0xff]   ;;  %v8882_v47 = vld [vmem:[%s11470_s7 + $0x54] ss:$8 sps:$4 sm:$0xff]  }
 0x704   :  { %7962 = vmatpush1.bf16.msra.mxu1 %v8874_v49  ;;  %v8880_v5 = vld [vmem:[%s11470_s7 + $0x50] ss:$8 sps:$4 sm:$0xff]   ;;  %v8885_v19 = vld [vmem:[%s11470_s7 + $0x44] ss:$8 sps:$4 sm:$0xff]   ;;  %v8883_v58 = vld [vmem:[%s11470_s7 + $0x40] ss:$8 sps:$4 sm:$0xff]  }
 0x705   :  { %7963 = vmatprep.subr.bf16.mxu1 %v8879_v20 }
 0x708   :  { %7964 = vmatpush1.bf16.msra.mxu1 %v8877_v0 }
 0x709   :  { %7965 = vmatprep.subr.bf16.mxu1 %v8882_v47 }
 0x70c   :  { %v8801_v37 = vpop.permute.xlu0 %8800  ;;  %v8796_v39 = vpop.permute.xlu1 %8795  ;;  %7966 = vmatpush1.bf16.msra.mxu1 %v8880_v5 }
 0x70d   :  { %v8798_v13 = vunpack.i.h.bf16 %v8796_v39  ;;  %v8797_v31 = vunpack.i.l.bf16 %v8796_v39  ;;  %v8803_v4 = vunpack.i.h.bf16 %v8801_v37  ;;  %v8802_v17 = vunpack.i.l.bf16 %v8801_v37  ;;  %7967 = vmatprep.subr.bf16.mxu1 %v8885_v19  ;;  %v8888_v37 = vld [vmem:[%s11470_s7 + $0x34] ss:$8 sps:$4 sm:$0xff]   ;;  %v8886_v39 = vld [vmem:[%s11470_s7 + $0x30] ss:$8 sps:$4 sm:$0xff]  }
 0x70f   :  { %v7670_v29 = vsel %vm7669_vm11, %v7667_v34, %v8797_v31  ;;  %v7671_v45 = vsel %vm7669_vm11, %v7668_v44, %v8798_v13  ;;  %v8891_v13 = vld [vmem:[%s11470_s7 + $0x24] ss:$8 sps:$4 sm:$0xff]   ;;  %v8889_v31 = vld [vmem:[%s11470_s7 + $0x20] ss:$8 sps:$4 sm:$0xff]   ;;  %v8898_v44 = vld [vmem:[%s11472_s9 + $0x78] sm:$0xff]  }
 0x710   :  { %v8811_v46 = vpop.permute.xlu0 %8810  ;;  %v8806_v27 = vpop.permute.xlu1 %8805  ;;  %v7673_v48 = vsel %vm7672_vm12, %v7670_v29, %v8802_v17  ;;  %v7674_v40 = vsel %vm7672_vm12, %v7671_v45, %v8803_v4  ;;  %7968 = vmatpush1.bf16.msra.mxu1 %v8883_v58  ;;  %v8894_v4 = vld [vmem:[%s11470_s7 + $0x14] ss:$8 sps:$4 sm:$0xff]   ;;  %v8892_v17 = vld [vmem:[%s11470_s7 + $0x10] ss:$8 sps:$4 sm:$0xff]   ;;  %v8897_v34 = vld [vmem:[%s11470_s7 + $0x4] ss:$8 sps:$4 sm:$0xff]   ;;  %8482 = vmatprep.subr.bf16.mxu0 %v8898_v44 }
 0x711   :  { %v8808_v25 = vunpack.i.h.bf16 %v8806_v27  ;;  %v8807_v51 = vunpack.i.l.bf16 %v8806_v27  ;;  %v8813_v7 = vunpack.i.h.bf16 %v8811_v46  ;;  %v8812_v63 = vunpack.i.l.bf16 %v8811_v46  ;;  %7969 = vmatprep.subr.bf16.mxu1 %v8888_v37  ;;  %v8899_v29 = vld [vmem:[%s11472_s9 + $0x38] sm:$0xff]   ;;  %v8900_v45 = vld [vmem:[%s11472_s9 + $0x70] sm:$0xff]   ;;  %v8895_v46 = vld [vmem:[%s11470_s7] ss:$8 sps:$4 sm:$0xff]  }
 0x712   :  { %v8901_v27 = vld [vmem:[%s11472_s9 + $0x30] sm:$0xff]  }
 0x713   :  { %v7676_v24 = vsel %vm7675_vm13, %v7673_v48, %v8807_v51  ;;  %v7677_v1 = vsel %vm7675_vm13, %v7674_v40, %v8808_v25  ;;  %v8902_v25 = vld [vmem:[%s11472_s9 + $0x68] sm:$0xff]   ;;  %v8906_v48 = vld [vmem:[%s11472_s9 + $0x58] sm:$0xff]  }
 0x714   :  { %v8821_v14 = vpop.permute.xlu0 %8820  ;;  %v8816_v59 = vpop.permute.xlu1 %8815  ;;  %v7679_v60 = vsel %vm7678_vm14, %v7676_v24, %v8812_v63  ;;  %v7680_v11 = vsel %vm7678_vm14, %v7677_v1, %v8813_v7  ;;  %7970 = vmatpush1.bf16.msra.mxu1 %v8886_v39  ;;  %v8903_v51 = vld [vmem:[%s11472_s9 + $0x28] sm:$0xff]   ;;  %v8904_v7 = vld [vmem:[%s11472_s9 + $0x60] sm:$0xff]   ;;  %v8907_v40 = vld [vmem:[%s11472_s9 + $0x18] sm:$0xff]  }
 0x715   :  { %v8818_v32 = vunpack.i.h.bf16 %v8816_v59  ;;  %v8817_v33 = vunpack.i.l.bf16 %v8816_v59  ;;  %v8823_v9 = vunpack.i.h.bf16 %v8821_v14  ;;  %v8822_v3 = vunpack.i.l.bf16 %v8821_v14  ;;  %7971 = vmatprep.subr.bf16.mxu1 %v8891_v13  ;;  %v8905_v63 = vld [vmem:[%s11472_s9 + $0x20] sm:$0xff]  }
 0x717   :  { %v7682_v36 = vsel %vm7681_vm15, %v7679_v60, %v8817_v33  ;;  %v7683_v10 = vsel %vm7681_vm15, %v7680_v11, %v8818_v32 }
 0x718   :  { %v8831_v22 = vpop.permute.xlu0 %8830  ;;  %v8826_v30 = vpop.permute.xlu1 %8825  ;;  %v7685_v56 = vsel %vm7684_vm0, %v7682_v36, %v8822_v3  ;;  %v7686_v62 = vsel %vm7684_vm0, %v7683_v10, %v8823_v9  ;;  %7972 = vmatpush1.bf16.msra.mxu1 %v8889_v31 }
 0x719   :  { %v8833_v41 = vunpack.i.h.bf16 %v8831_v22  ;;  %v8832_v2 = vunpack.i.l.bf16 %v8831_v22  ;;  %v8828_v21 = vunpack.i.h.bf16 %v8826_v30  ;;  %v8827_v12 = vunpack.i.l.bf16 %v8826_v30  ;;  %7973 = vmatprep.subr.bf16.mxu1 %v8894_v4 }
 0x71b   :  { %v7688_v55 = vsel %vm7687_vm1, %v7685_v56, %v8827_v12  ;;  %v7689_v38 = vsel %vm7687_vm1, %v7686_v62, %v8828_v21  ;;  %v8363_v21 = vld [vmem:[%s11468_s5] ss:$0 sm:$0xff] }
 0x71c   :  { %v7691_v43 = vsel %vm7690_vm2, %v7688_v55, %v8832_v2  ;;  %v7692_v52 = vsel %vm7690_vm2, %v7689_v38, %v8833_v41  ;;  %7974 = vmatpush1.bf16.msra.mxu1 %v8892_v17 }
 0x71d   :  { %v7693_v54 = vpack.c.bf16 %v7692_v52, %v7691_v43  ;;  %7975 = vmatprep.subr.bf16.mxu1 %v8897_v34  ;;  %v8364_v43 = vld [vmem:[%s11469_s6] ss:$0 sm:$0xff] }
 0x71f   :  { %8733 = vmatmul.mubr.bf16.vlgmr.msra.gmra.mxu0 %v7693_v54 }
 0x720   :  { %8483 = vmatpush3.bf16.msra.mxu0 %v8899_v29  ;;  %7976 = vmatpush1.bf16.msra.mxu1 %v8895_v46  ;;  %v8381_v29 = vld [vmem:[%s11473_s10] ss:$0 sm:$0xff] }
 0x721   :  { %8484 = vmatprep.subr.bf16.mxu0 %v8900_v45 }
 0x724   :  { %8485 = vmatpush3.bf16.msra.mxu0 %v8901_v27 }
 0x725   :  { %8486 = vmatprep.subr.bf16.mxu0 %v8902_v25 }
 0x728   :  { %8487 = vmatpush3.bf16.msra.mxu0 %v8903_v51 }
 0x729   :  { %8488 = vmatprep.subr.bf16.mxu0 %v8904_v7 }
 0x72c   :  { %8489 = vmatpush3.bf16.msra.mxu0 %v8905_v63 }
 0x72d   :  { %8490 = vmatprep.subr.bf16.mxu0 %v8906_v48 }
 0x730   :  { %8491 = vmatpush3.bf16.msra.mxu0 %v8907_v40 }
 0x7df   :  { %v7799_v42 = vpop.f32.mrf.mxu0 }
 0x7e0   :  { %v7800_v26 = vadd.f32 %v8354_v16, %v7799_v42 }
 0x7e1   :  { %v8734_v50 = vpop.f32.mrf.mxu0 }
 0x7e2   :  { %v11326_v15 = vadd.f32 %v9050_v6, %v7800_v26  ;;  %v8908_v26 = vld [vmem:[%s11472_s9 + $0x50] sm:$0xff]   ;;  %v8910_v6 = vld [vmem:[%s11472_s9 + $0x48] sm:$0xff]  }
 0x7e3   :  { %v7802_v57 = vpop.f32.mrf.mxu0  ;;  %v8909_v50 = vld [vmem:[%s11472_s9 + $0x10] sm:$0xff]   ;;  %8492 = vmatprep.subr.bf16.mxu0 %v8908_v26 }
 0x7e4   :  { %v7803_v53 = vadd.f32 %v8354_v16, %v7802_v57  ;;  %7810 = vadd.xlane.f32.xlu1 %v11326_v15  ;;  %v7814_v18 = vmul.f32 %v11326_v15, %v11326_v15  ;;  %8493 = vmatpush3.bf16.msra.mxu0 %v8909_v50  ;;  %v8912_v57 = vld [vmem:[%s11472_s9 + $0x40] sm:$0xff]  }
 0x7e5   :  { %v8735_v61 = vpop.f32.mrf.mxu0  ;;  %8494 = vmatprep.subr.bf16.mxu0 %v8910_v6 }
 0x7e6   :  { %v11332_v8 = vadd.f32 %v9051_v28, %v7803_v53  ;;  %v8913_v53 = vld [vmem:[%s11472_s9] sm:$0xff]  }
 0x7e7   :  { %v7869_v61 = vld [vmem:[%s11471_s8] sm:$0x3] }
 0x7e8   :  { %7812 = vadd.xlane.f32.xlu0 %v11332_v8  ;;  %v7815_v35 = vmul.f32 %v11332_v8, %v11332_v8 }
 0x7ea   :  { %7818 = vadd.xlane.f32.xlu1 %v7815_v35 }
 0x7ec   :  { %7816 = vadd.xlane.f32.xlu0 %v7814_v18 }
 0x86d   :  { %v7811_v24 = vpop.xlane.xlu1 %7810 }
 0x86e   :  { %v7820_v14 = vmul.f32 0.0078125, %v7811_v24 }
 0x870   :  { %v7824_v60 = vmul.f32 %v7820_v14, %v7820_v14  ;;  %v7828_v12 = vsub.f32 %v11326_v15, %v7820_v14  ;;  %v8911_v15 = vld [vmem:[%s11472_s9 + $0x8] sm:$0xff]  }
 0x871   :  { %v7813_v1 = vpop.xlane.xlu0 %7812  ;;  %8495 = vmatpush3.bf16.msra.mxu0 %v8911_v15 }
 0x872   :  { %v7821_v59 = vmul.f32 0.0078125, %v7813_v1  ;;  %8496 = vmatprep.subr.bf16.mxu0 %v8912_v57 }
 0x873   :  { %v7819_v32 = vpop.xlane.xlu1 %7818 }
 0x874   :  { %v7825_v33 = vmul.f32 %v7821_v59, %v7821_v59  ;;  %v7823_v9 = vmul.f32 0.0078125, %v7819_v32  ;;  %v7829_v41 = vsub.f32 %v11332_v8, %v7821_v59  ;;  %v11506_v8 = vld [vmem:[#allocation5_spill] sm:$0xff] }
 0x875   :  { %v7817_v3 = vpop.xlane.xlu0 %7816  ;;  %8497 = vmatpush3.bf16.msra.mxu0 %v8913_v53  ;;  %v11507_v35 = vsub.s32 1, %v11506_v8  ;;  %v11508_v49 = vsub.s32 0, %v11506_v8 }
 0x876   :  { %v7827_v11 = vsub.f32 %v7823_v9, %v7825_v33  ;;  %v7822_v36 = vmul.f32 0.0078125, %v7817_v3 }
 0x877   :  { %v7878_v18 = vrot.slane %v7869_v61, %v11507_v35  ;;  %v7874_v23 = vrot.slane %v7869_v61, %v11508_v49 }
 0x878   :  { %v7831_v10 = vadd.f32 1e-05, %v7827_v11  ;;  %v7826_v22 = vsub.f32 %v7822_v36, %v7824_v60 }
 0x87a   :  { %9042 = vrsqrt.f32 %v7831_v10  ;;  %v7830_v30 = vadd.f32 1e-05, %v7826_v22 }
 0x87c   :  { %9044 = vrsqrt.f32 %v7830_v30 }
 0x887   :  { %v9043_v2 = vpop.eup %9042 }
 0x888   :  { %v7835_v56 = vmul.f32 %v9043_v2, %v7829_v41 }
 0x889   :  { %v9045_v62 = vpop.eup %9044 }
 0x88a   :  { %v7834_v55 = vmul.f32 %v9045_v62, %v7828_v12  ;;  %v7843_v38 = vmul.f32 %v8363_v21, %v7835_v56  ;;  %v8398_v56 = vld [vmem:[%s11474_s11] ss:$0 sm:$0xff] }
 0x88c   :  { %v7842_v52 = vmul.f32 %v8363_v21, %v7834_v55  ;;  %v7851_v16 = vadd.f32 %v8364_v43, %v7843_v38  ;;  %v8399_v55 = vld [vmem:[%s11475_s12] ss:$0 sm:$0xff] }
 0x88e   :  { %v7850_v54 = vadd.f32 %v8364_v43, %v7842_v52 }
 0x890   :  { %v7852_v42 = vpack.c.bf16 %v7851_v16, %v7850_v54 }
 0x892   :  { %7994 = vmatmul.mubr.bf16.vlgmr.msra.gmra.mxu1 %v7852_v42 }
 0x952   :  { %v7995_v28 = vpop.f32.mrf.mxu1 }
 0x953   :  { %v7996_v19 = vadd.f32 %v7995_v28, %v7874_v23 }
 0x954   :  { %v7997_v0 = vpop.f32.mrf.mxu1 }
 0x955   :  { %v7998_v47 = vadd.f32 %v7997_v0, %v7878_v18  ;;  %v8004_v4 = vmax.f32 %v7996_v19, 0.0 }
 0x956   :  { %v7999_v20 = vpop.f32.mrf.mxu1 }
 0x957   :  { %v8000_v5 = vadd.f32 %v7999_v20, %v7874_v23  ;;  %v8005_v13 = vmax.f32 %v7998_v47, 0.0 }
 0x958   :  { %v8001_v58 = vpop.f32.mrf.mxu1 }
 0x959   :  { %v8002_v37 = vadd.f32 %v8001_v58, %v7878_v18  ;;  %v8006_v39 = vmax.f32 %v8000_v5, 0.0 }
 0x95b   :  { %v8007_v31 = vmax.f32 %v8002_v37, 0.0  ;;  %v8008_v34 = vpack.c.bf16 %v8006_v39, %v8004_v4 }
 0x95d   :  { %v8009_v17 = vpack.c.bf16 %v8007_v31, %v8005_v13 }
 0x95f   :  { %8177 = vmatprep.mubr.bf16.mxu0 %v8009_v17 }
 0x960   :  { %8178 = vmatmul.mubr.bf16.vlgmr.msra.gmra.mxu0 %v8008_v34 }
 0xa20   :  { %v8498_v44 = vpop.f32.mrf.mxu0 }
 0xa22   :  { %v8499_v45 = vpop.f32.mrf.mxu0 }
 0xa23   :  { %v8500_v46 = vadd.f32 %v8499_v45, %v8498_v44 }
 0xa24   :  { %v8501_v27 = vpop.f32.mrf.mxu0 }
 0xa25   :  { %v8180_v25 = vadd.f32 %v8500_v46, %v8381_v29 }
 0xa26   :  { %v8502_v51 = vpop.f32.mrf.mxu0 }
 0xa27   :  { %v8503_v7 = vadd.f32 %v8502_v51, %v8501_v27  ;;  %v8186_v63 = vadd.f32 %v8180_v25, %v7850_v54 }
 0xa29   :  { %v8183_v48 = vadd.f32 %v8503_v7, %v8381_v29  ;;  %8190 = vadd.xlane.f32.xlu0 %v8186_v63  ;;  %v8194_v24 = vmul.f32 %v8186_v63, %v8186_v63 }
 0xa2b   :  { %v8187_v40 = vadd.f32 %v8183_v48, %v7851_v16 }
 0xa2d   :  { %8192 = vadd.xlane.f32.xlu1 %v8187_v40  ;;  %8196 = vadd.xlane.f32.xlu0 %v8194_v24  ;;  %v8195_v1 = vmul.f32 %v8187_v40, %v8187_v40 }
 0xa31   :  { %8198 = vadd.xlane.f32.xlu1 %v8195_v1 }
 0xab2   :  { %v8191_v14 = vpop.xlane.xlu0 %8190 }
 0xab3   :  { %v8200_v59 = vmul.f32 0.0078125, %v8191_v14 }
 0xab5   :  { %v8204_v9 = vmul.f32 %v8200_v59, %v8200_v59  ;;  %v8208_v21 = vsub.f32 %v8186_v63, %v8200_v59 }
 0xab6   :  { %v8193_v32 = vpop.xlane.xlu1 %8192  ;;  %v8197_v33 = vpop.xlane.xlu0 %8196 }
 0xab7   :  { %v8201_v3 = vmul.f32 0.0078125, %v8193_v32  ;;  %v8202_v60 = vmul.f32 0.0078125, %v8197_v33 }
 0xab9   :  { %v8206_v11 = vsub.f32 %v8202_v60, %v8204_v9  ;;  %v8205_v10 = vmul.f32 %v8201_v3, %v8201_v3  ;;  %v8209_v38 = vsub.f32 %v8187_v40, %v8201_v3 }
 0xaba   :  { %v8199_v36 = vpop.xlane.xlu1 %8198 }
 0xabb   :  { %v8210_v22 = vadd.f32 1e-05, %v8206_v11  ;;  %v8203_v30 = vmul.f32 0.0078125, %v8199_v36 }
 0xabd   :  { %9046 = vrsqrt.f32 %v8210_v22  ;;  %v8207_v41 = vsub.f32 %v8203_v30, %v8205_v10 }
 0xabf   :  { %v8211_v2 = vadd.f32 1e-05, %v8207_v41 }
 0xac1   :  { %9048 = vrsqrt.f32 %v8211_v2 }
 0xaca   :  { %v9047_v12 = vpop.eup %9046 }
 0xacb   :  { %v8214_v62 = vmul.f32 %v9047_v12, %v8208_v21 }
 0xacd   :  { %v8222_v43 = vmul.f32 %v8398_v56, %v8214_v62 }
 0xace   :  { %v9049_v52 = vpop.eup %9048 }
 0xacf   :  { %v8215_v54 = vmul.f32 %v9049_v52, %v8209_v38  ;;  %v8230_v16 = vadd.f32 %v8399_v55, %v8222_v43 }
 0xad1   :  { %v8223_v42 = vmul.f32 %v8398_v56, %v8215_v54  ;;  %8232 = vst [vmem:[#allocation2] sm:$0xff] %v8230_v16 }
 0xad3   :  { %v8231_v26 = vadd.f32 %v8399_v55, %v8223_v42 }
 0xad5   :  { %8233 = vst [vmem:[#allocation2 + $0x8] sm:$0xff] %v8231_v26 }
 0xad6   :  { %9063 = shalt.err (!%p9060_p4)
}
 0xad7   :  { %s9096_s11 = smov 128  }
 0xad8   :  { %8245 = dma.vmem_to_hbm [thread:$0]  %s8240_s27, 256, %s11476_s13, [#allocation3], %s9096_s11, %s9096_s11, %s9091_s17  }
 0xad9   :  { %9072 = dma.done.wait [#allocation3], 256  }
 0xada   :  { %9073 = vsyncadd [#allocation3], 4294967040 }
 0xadb   :  { %8249 = vsyncpa [#allocation3], 1 }

</bundles_post_ra>
